<compile_context>
chip_gen: v5e
topology: v5e:2x2
jax: 0.10.0
libtpu: 0.0.40
codegen_flags: <defaults>
</compile_context>

<pallas_src>
import jax
import jax.numpy as jnp
from jax.experimental import pallas as pl
from jax.experimental.pallas import tpu as pltpu

EPS = 1e-5      # nn.BatchNorm2d default eps
LANE = 128      # lane width (f32)


# --------------------------------------------------------------------------
# in-kernel helpers
# --------------------------------------------------------------------------
def _zero_halo(pad_ref):
    """Zero the 1-pixel halo ring of a (NB, H+2, W+2, C) VMEM scratch."""
    NB, Hp, Wp, C = pad_ref.shape
    dt = pad_ref.dtype
    pad_ref[:, 0:1, :, :] = jnp.zeros((NB, 1, Wp, C), dt)
    pad_ref[:, Hp - 1:Hp, :, :] = jnp.zeros((NB, 1, Wp, C), dt)
    pad_ref[:, :, 0:1, :] = jnp.zeros((NB, Hp, 1, C), dt)
    pad_ref[:, :, Wp - 1:Wp, :] = jnp.zeros((NB, Hp, 1, C), dt)


def _conv3x3_acc(pad_ref, w_ref, acc_ref):
    """3x3 / stride-1 conv as 3 lane-dense MXU matmuls with K = 3*Cp.

    pad_ref: (NB, H+2, W+2, Cp) compute-dtype VMEM scratch (halo zeroed)
    w_ref:   (3, 3*Cp, Cp) weights, kw folded into the contraction dim
    acc_ref: (NB*H*W, Cp) f32 VMEM accumulator (fully rewritten here)
    """
    NB, Hp, Wp, C = pad_ref.shape
    H, W = Hp - 2, Wp - 2
    R = NB * H * W
    for kh in range(3):
        rows = pad_ref[:, kh:kh + H, :, :]                    # (NB, H, W+2, C)
        patch = jnp.concatenate(
            [rows[:, :, 0:W, :], rows[:, :, 1:W + 1, :], rows[:, :, 2:W + 2, :]],
            axis=-1).reshape(R, 3 * C)                        # (R, 3*Cp)
        contrib = jnp.dot(patch, w_ref[kh],
                          preferred_element_type=jnp.float32)
        if kh == 0:
            acc_ref[...] = contrib
        else:
            acc_ref[...] += contrib


def _tile_stats(acc, s_ref, q_ref):
    """Per-tile shifted statistics: channel sum + sum of squared deviations
    from the tile mean (combined Welford/Chan-style in the wrapper)."""
    R, C = acc.shape
    s = jnp.sum(acc, axis=0, keepdims=True)                   # (1, Cp)
    m = s * (1.0 / R)
    d = acc - m
    s_ref[...] = s.reshape(1, 1, C)
    q_ref[...] = jnp.sum(d * d, axis=0, keepdims=True).reshape(1, 1, C)


# --------------------------------------------------------------------------
# kernels
# --------------------------------------------------------------------------
def conv3x3_stats_kernel(x_ref, w_ref, y_ref, s_ref, q_ref, xpad_ref, acc_ref):
    """Pass 1: conv1 on one batch tile; emit partial BN1 statistics.

    (conv bias dropped: it cancels exactly through training-mode BN.)"""
    NB, H, W, C = x_ref.shape
    _zero_halo(xpad_ref)     # every step: megacore-safe (see header comment)
    xpad_ref[:, 1:H + 1, 1:W + 1, :] = x_ref[...].astype(xpad_ref.dtype)
    _conv3x3_acc(xpad_ref, w_ref, acc_ref)
    acc = acc_ref[...]                                         # (R, Cp) f32
    y_ref[...] = acc.reshape(NB, H, W, C).astype(y_ref.dtype)
    _tile_stats(acc, s_ref, q_ref)


def bn_relu_conv3x3_stats_kernel(y1_ref, sc_ref, sh_ref, w_ref,
                                 y2_ref, s_ref, q_ref, ypad_ref, acc_ref):
    """Pass 2: folded bn1 + relu + conv2; emit partial BN2 statistics."""
    NB, H, W, C = y1_ref.shape
    R = NB * H * W
    _zero_halo(ypad_ref)
    a = jnp.maximum(
        y1_ref[...].astype(jnp.float32).reshape(R, C) * sc_ref[...] + sh_ref[...],
        0.0)
    ypad_ref[:, 1:H + 1, 1:W + 1, :] = a.reshape(NB, H, W, C).astype(ypad_ref.dtype)
    _conv3x3_acc(ypad_ref, w_ref, acc_ref)
    acc = acc_ref[...]
    y2_ref[...] = acc.reshape(NB, H, W, C).astype(y2_ref.dtype)
    _tile_stats(acc, s_ref, q_ref)


def bn_residual_relu_kernel(y2_ref, x_ref, sc_ref, sh_ref, out_ref):
    """Pass 3: folded bn2 + identity residual + relu (pure elementwise)."""
    NB, H, W, C = out_ref.shape
    R = NB * H * W
    y = y2_ref[...].astype(jnp.float32).reshape(R, C) * sc_ref[...] + sh_ref[...]
    out = jnp.maximum(x_ref[...].astype(jnp.float32).reshape(R, C) + y, 0.0)
    out_ref[...] = out.reshape(NB, H, W, C).astype(out_ref.dtype)


# --------------------------------------------------------------------------
# wrapper
# --------------------------------------------------------------------------
def _bn_fold(psum, pm2, gamma, beta, tile_count, total_count):
    """Chan-style combination of per-tile stats; fold BN into scale/shift."""
    m_t = psum / tile_count                                    # (G, 1, Cp)
    gmean = jnp.sum(psum, axis=(0, 1)) / total_count           # (Cp,)
    m2 = (jnp.sum(pm2, axis=(0, 1))
          + tile_count * jnp.sum((m_t - gmean) ** 2, axis=(0, 1)))
    var = m2 / total_count                                     # biased variance
    scale = gamma[0] * jax.lax.rsqrt(var + EPS)
    shift = beta[0] - gmean * scale
    return scale.reshape(1, -1), shift.reshape(1, -1)


def basic_block_forward(x_nchw, params, *, compute_dtype=jnp.float32,
                        batch_block=1, vmem_limit_bytes=None):
    """stride=1 BasicBlock forward.  x_nchw: (N, C, H, W) float32 (NCHW)."""
    N, C, H, W = x_nchw.shape
    Cin, Cout = params["w1"].shape[2], params["w1"].shape[3]
    assert C == Cin == Cout, "identity residual requires in_ch == out_ch"
    assert N % batch_block == 0
    assert W % 8 == 0, "layout-free reshapes require W % 8 == 0"
    assert compute_dtype in (jnp.float32, jnp.bfloat16)
    NB, G = batch_block, N // batch_block
    Cp = -(-C // LANE) * LANE                                  # lane-dense channels
    inter_dtype = compute_dtype                                # y1/y2 HBM round-trip dtype

    # NHWC + channel pad only (no spatial pad round-trip through HBM).
    cpad = ((0, 0), (0, 0), (0, 0), (0, Cp - C))
    x = jnp.pad(jnp.transpose(x_nchw, (0, 2, 3, 1)).astype(jnp.float32), cpad)

    def pad_w(w):  # (3,3,Cin,Cout) -> (3, 3*Cp, Cp): kw folded into K, MXU dtype
        wp = jnp.pad(w, ((0, 0), (0, 0), (0, Cp - C), (0, Cp - C)))
        return wp.astype(compute_dtype).reshape(3, 3 * Cp, Cp)

    def pad_v(v):  # per-channel vector -> (1, Cp) f32
        return jnp.pad(jnp.reshape(v, (1, -1)).astype(jnp.float32),
                       ((0, 0), (0, Cp - C)))

    w1, w2 = pad_w(params["w1"]), pad_w(params["w2"])
    # conv biases cb1/cb2 intentionally unused: they cancel through training-mode BN.
    g1, be1 = pad_v(params["g1"]), pad_v(params["be1"])
    g2, be2 = pad_v(params["g2"]), pad_v(params["be2"])

    tspec = pl.BlockSpec((NB, H, W, Cp), lambda i: (i, 0, 0, 0))   # activation tiles
    wspec = pl.BlockSpec((3, 3 * Cp, Cp), lambda i: (0, 0, 0))
    vspec = pl.BlockSpec((1, Cp), lambda i: (0, 0))
    sspec = pl.BlockSpec((1, 1, Cp), lambda i: (i, 0, 0))

    cbytes = jnp.dtype(compute_dtype).itemsize
    ibytes = jnp.dtype(inter_dtype).itemsize
    tile_elems = NB * H * W * Cp
    if vmem_limit_bytes is None:
        est = (2 * tile_elems * (4 + 2 * ibytes)                # double-buffered act tiles
               + 2 * 9 * Cp * Cp * cbytes                       # double-buffered weights
               + NB * (H + 2) * (W + 2) * Cp * cbytes           # halo scratch
               + tile_elems * 4                                 # f32 accumulator scratch
               + 2 * 3 * tile_elems * cbytes)                   # kw-concat temporaries
        vmem_limit_bytes = int(min(max(2 * est, 32 << 20), 48 << 20))
    cparams = pltpu.CompilerParams(dimension_semantics=("parallel",),
                                   vmem_limit_bytes=vmem_limit_bytes)

    pad_scratch = pltpu.VMEM((NB, H + 2, W + 2, Cp), compute_dtype)
    acc_scratch = pltpu.VMEM((NB * H * W, Cp), jnp.float32)

    y_shape = jax.ShapeDtypeStruct((N, H, W, Cp), inter_dtype)
    o_shape = jax.ShapeDtypeStruct((N, H, W, Cp), jnp.float32)
    s_shape = jax.ShapeDtypeStruct((G, 1, Cp), jnp.float32)
    tile_count = NB * H * W
    total_count = N * H * W

    # ---- pass 1: conv1, partial BN1 statistics ----
    y1, s1, q1 = pl.pallas_call(
        conv3x3_stats_kernel,
        grid=(G,),
        in_specs=[tspec, wspec],
        out_specs=[tspec, sspec, sspec],
        out_shape=[y_shape, s_shape, s_shape],
        scratch_shapes=[pad_scratch, acc_scratch],
        compiler_params=cparams,
    )(x, w1)
    sc1, sh1 = _bn_fold(s1, q1, g1, be1, tile_count, total_count)

    # ---- pass 2: bn1 (folded) + relu + conv2, partial BN2 statistics ----
    y2, s2, q2 = pl.pallas_call(
        bn_relu_conv3x3_stats_kernel,
        grid=(G,),
        in_specs=[tspec, vspec, vspec, wspec],
        out_specs=[tspec, sspec, sspec],
        out_shape=[y_shape, s_shape, s_shape],
        scratch_shapes=[pad_scratch, acc_scratch],
        compiler_params=cparams,
    )(y1, sc1, sh1, w2)
    sc2, sh2 = _bn_fold(s2, q2, g2, be2, tile_count, total_count)

    # ---- pass 3: bn2 (folded) + identity residual + relu ----
    out_nhwc = pl.pallas_call(
        bn_residual_relu_kernel,
        grid=(G,),
        in_specs=[tspec, tspec, vspec, vspec],
        out_specs=tspec,
        out_shape=o_shape,
        compiler_params=cparams,
    )(y2, x, sc2, sh2)

    return jnp.transpose(out_nhwc[..., :C], (0, 3, 1, 2))       # drop pad, NCHW


# --------------------------------------------------------------------------
# pure-JAX reference (same math as the PyTorch training-mode forward)
# --------------------------------------------------------------------------
def reference_forward(x_nchw, params, *, compute_dtype=jnp.float32):
    def conv(x, w, b):
        y = jax.lax.conv_general_dilated(
            x.astype(compute_dtype), w.astype(compute_dtype),
            window_strides=(1, 1), padding=((1, 1), (1, 1)),
            dimension_numbers=("NHWC", "HWIO", "NHWC"),
            preferred_element_type=jnp.float32)
        return y + jnp.reshape(b, (1, 1, 1, -1)).astype(jnp.float32)

    def bn(x, g, b):
        mean = jnp.mean(x, axis=(0, 1, 2), keepdims=True)
        var = jnp.mean((x - mean) ** 2, axis=(0, 1, 2), keepdims=True)
        return ((x - mean) * jax.lax.rsqrt(var + EPS)
                * jnp.reshape(g, (1, 1, 1, -1)) + jnp.reshape(b, (1, 1, 1, -1)))

    x = jnp.transpose(x_nchw, (0, 2, 3, 1)).astype(jnp.float32)
    y = jax.nn.relu(bn(conv(x, params["w1"], params["cb1"]),
                       params["g1"], params["be1"]))
    y = bn(conv(y, params["w2"], params["cb2"]), params["g2"], params["be2"])
    out = jax.nn.relu(x + y)
    return jnp.transpose(out, (0, 3, 1, 2))


def init_params(key, cin, cout):
    ks = jax.random.split(key, 8)
    scale = 0.1
    return {
        # conv weights HWIO (3, 3, Cin, Cout); bias / BN params (1, Cout)
        "w1": scale * jax.random.normal(ks[0], (3, 3, cin, cout), jnp.float32),
        "cb1": scale * jax.random.normal(ks[1], (1, cout), jnp.float32),
        "g1": 1.0 + scale * jax.random.normal(ks[2], (1, cout), jnp.float32),
        "be1": scale * jax.random.normal(ks[3], (1, cout), jnp.float32),
        "w2": scale * jax.random.normal(ks[4], (3, 3, cout, cout), jnp.float32),
        "cb2": scale * jax.random.normal(ks[5], (1, cout), jnp.float32),
        "g2": 1.0 + scale * jax.random.normal(ks[6], (1, cout), jnp.float32),
        "be2": scale * jax.random.normal(ks[7], (1, cout), jnp.float32),
    }


if __name__ == "__main__":
    key = jax.random.PRNGKey(0)
    k_x, k_p = jax.random.split(key)

    N, C, H, W = 2, 8, 16, 16          # in_channels == out_channels, stride=1
    x = jax.random.normal(k_x, (N, C, H, W), jnp.float32)
    params = init_params(k_p, C, C)

    # f32 compute path (checked against the reference; bias drop / Chan stats
    # differ only at rounding level)
    out = jax.block_until_ready(basic_block_forward(x, params))
    ref = jax.block_until_ready(reference_forward(x, params))
    assert out.shape == (N, C, H, W)
    err = float(jnp.max(jnp.abs(out - ref)))
    assert jnp.allclose(out, ref, atol=2e-4, rtol=2e-4), f"f32 max diff {err}"

    # bf16 MXU path (bf16 weights, scratch and HBM intermediates) vs. a
    # bf16-input reference; intermediates rounded to bf16 -> looser tolerance.
    out_bf = jax.block_until_ready(
        basic_block_forward(x, params, compute_dtype=jnp.bfloat16))
    ref_bf = jax.block_until_ready(
        reference_forward(x, params, compute_dtype=jnp.bfloat16))
    err_bf = float(jnp.max(jnp.abs(out_bf - ref_bf)))
    assert jnp.allclose(out_bf, ref_bf, atol=5e-2, rtol=5e-2), \
        f"bf16 max diff {err_bf}"

    print("KERNEL_OK")
</pallas_src>

<mosaic_0001>
module attributes {stable_mosaic.version = 11 : i64} {
  func.func @conv3x3_stats_kernel(%arg0: i32, %arg1: memref<1x16x16x128xf32, #tpu.memory_space<vmem>>, %arg2: memref<3x384x128xf32, #tpu.memory_space<vmem>>, %arg3: memref<1x16x16x128xf32, #tpu.memory_space<vmem>>, %arg4: memref<1x1x128xf32, #tpu.memory_space<vmem>>, %arg5: memref<1x1x128xf32, #tpu.memory_space<vmem>>, %arg6: memref<1x18x18x128xf32, #tpu.memory_space<vmem>>, %arg7: memref<256x128xf32, #tpu.memory_space<vmem>>) attributes {dimension_semantics = [#tpu.dimension_semantics<parallel>], iteration_bounds = array<i64: 2>, scalar_prefetch = 0 : i64, scratch_operands = 2 : i64, tpu.core_type = #tpu.core_type<tc>, window_params = [{transform_indices = @transform_0, window_bounds = array<i64: 1, 16, 16, 128>}, {pipeline_mode = #tpu.pipeline_mode<synchronous>, transform_indices = @transform_1, window_bounds = array<i64: 3, 384, 128>}, {transform_indices = @transform_2, window_bounds = array<i64: 1, 16, 16, 128>}, {transform_indices = @transform_3, window_bounds = array<i64: 1, 1, 128>}, {transform_indices = @transform_4, window_bounds = array<i64: 1, 1, 128>}]} {
    %cst = arith.constant 0.000000e+00 : f32
    %0 = vector.broadcast %cst : f32 to vector<1x1x18x128xf32>
    %c0 = arith.constant 0 : index
    %c0_0 = arith.constant 0 : index
    %c0_1 = arith.constant 0 : index
    %c0_2 = arith.constant 0 : index
    %1 = vector.load %arg6[%c0, %c0_0, %c0_1, %c0_2] : memref<1x18x18x128xf32, #tpu.memory_space<vmem>>, vector<1x1x18x128xf32>
    tpu.vector_store %arg6[%c0, %c0_0, %c0_1, %c0_2], %0 {strides = array<i32>} : memref<1x18x18x128xf32, #tpu.memory_space<vmem>>, vector<1x1x18x128xf32>,
    %cst_3 = arith.constant 0.000000e+00 : f32
    %2 = vector.broadcast %cst_3 : f32 to vector<1x1x18x128xf32>
    %c0_4 = arith.constant 0 : index
    %c17 = arith.constant 17 : index
    %c0_5 = arith.constant 0 : index
    %c0_6 = arith.constant 0 : index
    %3 = vector.load %arg6[%c0_4, %c17, %c0_5, %c0_6] : memref<1x18x18x128xf32, #tpu.memory_space<vmem>>, vector<1x1x18x128xf32>
    tpu.vector_store %arg6[%c0_4, %c17, %c0_5, %c0_6], %2 {strides = array<i32>} : memref<1x18x18x128xf32, #tpu.memory_space<vmem>>, vector<1x1x18x128xf32>,
    %cst_7 = arith.constant 0.000000e+00 : f32
    %4 = vector.broadcast %cst_7 : f32 to vector<1x18x1x128xf32>
    %c0_8 = arith.constant 0 : index
    %c0_9 = arith.constant 0 : index
    %c0_10 = arith.constant 0 : index
    %c0_11 = arith.constant 0 : index
    %5 = vector.load %arg6[%c0_8, %c0_9, %c0_10, %c0_11] : memref<1x18x18x128xf32, #tpu.memory_space<vmem>>, vector<1x18x1x128xf32>
    tpu.vector_store %arg6[%c0_8, %c0_9, %c0_10, %c0_11], %4 {strides = array<i32>} : memref<1x18x18x128xf32, #tpu.memory_space<vmem>>, vector<1x18x1x128xf32>,
    %cst_12 = arith.constant 0.000000e+00 : f32
    %6 = vector.broadcast %cst_12 : f32 to vector<1x18x1x128xf32>
    %c0_13 = arith.constant 0 : index
    %c0_14 = arith.constant 0 : index
    %c17_15 = arith.constant 17 : index
    %c0_16 = arith.constant 0 : index
    %7 = vector.load %arg6[%c0_13, %c0_14, %c17_15, %c0_16] : memref<1x18x18x128xf32, #tpu.memory_space<vmem>>, vector<1x18x1x128xf32>
    tpu.vector_store %arg6[%c0_13, %c0_14, %c17_15, %c0_16], %6 {strides = array<i32>} : memref<1x18x18x128xf32, #tpu.memory_space<vmem>>, vector<1x18x1x128xf32>,
    %c0_17 = arith.constant 0 : index
    %c0_18 = arith.constant 0 : index
    %c0_19 = arith.constant 0 : index
    %c0_20 = arith.constant 0 : index
    %8 = vector.load %arg1[%c0_17, %c0_18, %c0_19, %c0_20] : memref<1x16x16x128xf32, #tpu.memory_space<vmem>>, vector<1x16x16x128xf32>
    %c0_21 = arith.constant 0 : index
    %c1 = arith.constant 1 : index
    %c1_22 = arith.constant 1 : index
    %c0_23 = arith.constant 0 : index
    %9 = vector.load %arg6[%c0_21, %c1, %c1_22, %c0_23] : memref<1x18x18x128xf32, #tpu.memory_space<vmem>>, vector<1x16x16x128xf32>
    tpu.vector_store %arg6[%c0_21, %c1, %c1_22, %c0_23], %8 {strides = array<i32>} : memref<1x18x18x128xf32, #tpu.memory_space<vmem>>, vector<1x16x16x128xf32>,
    %c0_24 = arith.constant 0 : index
    %c0_25 = arith.constant 0 : index
    %c0_26 = arith.constant 0 : index
    %c0_27 = arith.constant 0 : index
    %10 = vector.load %arg6[%c0_24, %c0_25, %c0_26, %c0_27] : memref<1x18x18x128xf32, #tpu.memory_space<vmem>>, vector<1x16x18x128xf32>
    %11 = vector.extract_strided_slice %10 {offsets = [0, 0, 0, 0], sizes = [1, 16, 16, 128], strides = [1, 1, 1, 1]} : vector<1x16x18x128xf32> to vector<1x16x16x128xf32>
    %12 = vector.extract_strided_slice %10 {offsets = [0, 0, 1, 0], sizes = [1, 16, 16, 128], strides = [1, 1, 1, 1]} : vector<1x16x18x128xf32> to vector<1x16x16x128xf32>
    %13 = vector.extract_strided_slice %10 {offsets = [0, 0, 2, 0], sizes = [1, 16, 16, 128], strides = [1, 1, 1, 1]} : vector<1x16x18x128xf32> to vector<1x16x16x128xf32>
    %14 = tpu.concatenate %11, %12, %13 in 3 : vector<1x16x16x128xf32>, vector<1x16x16x128xf32>, vector<1x16x16x128xf32> -> vector<1x16x16x384xf32>
    %15 = vector.shape_cast %14 : vector<1x16x16x384xf32> to vector<256x384xf32>
    %c0_28 = arith.constant 0 : index
    %c0_29 = arith.constant 0 : index
    %c0_30 = arith.constant 0 : index
    %16 = vector.load %arg2[%c0_28, %c0_29, %c0_30] : memref<3x384x128xf32, #tpu.memory_space<vmem>>, vector<1x384x128xf32>
    %17 = vector.shape_cast %16 : vector<1x384x128xf32> to vector<384x128xf32>
    %cst_31 = arith.constant dense<0.000000e+00> : vector<256x128xf32>
    %18 = tpu.matmul %15, %17, %cst_31 {dimension_numbers = #tpu.dot_dimension_numbers<[1], [0], [0], [1], [0, 0, 1, 1], [], []>} : vector<256x384xf32>, vector<384x128xf32>, vector<256x128xf32> -> vector<256x128xf32>
    %c0_32 = arith.constant 0 : index
    %c0_33 = arith.constant 0 : index
    %19 = vector.load %arg7[%c0_32, %c0_33] : memref<256x128xf32, #tpu.memory_space<vmem>>, vector<256x128xf32>
    tpu.vector_store %arg7[%c0_32, %c0_33], %18 {strides = array<i32>} : memref<256x128xf32, #tpu.memory_space<vmem>>, vector<256x128xf32>,
    %c0_34 = arith.constant 0 : index
    %c1_35 = arith.constant 1 : index
    %c0_36 = arith.constant 0 : index
    %c0_37 = arith.constant 0 : index
    %20 = vector.load %arg6[%c0_34, %c1_35, %c0_36, %c0_37] : memref<1x18x18x128xf32, #tpu.memory_space<vmem>>, vector<1x16x18x128xf32>
    %21 = vector.extract_strided_slice %20 {offsets = [0, 0, 0, 0], sizes = [1, 16, 16, 128], strides = [1, 1, 1, 1]} : vector<1x16x18x128xf32> to vector<1x16x16x128xf32>
    %22 = vector.extract_strided_slice %20 {offsets = [0, 0, 1, 0], sizes = [1, 16, 16, 128], strides = [1, 1, 1, 1]} : vector<1x16x18x128xf32> to vector<1x16x16x128xf32>
    %23 = vector.extract_strided_slice %20 {offsets = [0, 0, 2, 0], sizes = [1, 16, 16, 128], strides = [1, 1, 1, 1]} : vector<1x16x18x128xf32> to vector<1x16x16x128xf32>
    %24 = tpu.concatenate %21, %22, %23 in 3 : vector<1x16x16x128xf32>, vector<1x16x16x128xf32>, vector<1x16x16x128xf32> -> vector<1x16x16x384xf32>
    %25 = vector.shape_cast %24 : vector<1x16x16x384xf32> to vector<256x384xf32>
    %c1_38 = arith.constant 1 : index
    %c0_39 = arith.constant 0 : index
    %c0_40 = arith.constant 0 : index
    %26 = vector.load %arg2[%c1_38, %c0_39, %c0_40] : memref<3x384x128xf32, #tpu.memory_space<vmem>>, vector<1x384x128xf32>
    %27 = vector.shape_cast %26 : vector<1x384x128xf32> to vector<384x128xf32>
    %cst_41 = arith.constant dense<0.000000e+00> : vector<256x128xf32>
    %28 = tpu.matmul %25, %27, %cst_41 {dimension_numbers = #tpu.dot_dimension_numbers<[1], [0], [0], [1], [0, 0, 1, 1], [], []>} : vector<256x384xf32>, vector<384x128xf32>, vector<256x128xf32> -> vector<256x128xf32>
    %c0_42 = arith.constant 0 : index
    %c0_43 = arith.constant 0 : index
    %29 = vector.load %arg7[%c0_42, %c0_43] : memref<256x128xf32, #tpu.memory_space<vmem>>, vector<256x128xf32>
    %30 = arith.addf %29, %28 : vector<256x128xf32>
    %c0_44 = arith.constant 0 : index
    %c0_45 = arith.constant 0 : index
    %31 = vector.load %arg7[%c0_44, %c0_45] : memref<256x128xf32, #tpu.memory_space<vmem>>, vector<256x128xf32>
    tpu.vector_store %arg7[%c0_44, %c0_45], %30 {strides = array<i32>} : memref<256x128xf32, #tpu.memory_space<vmem>>, vector<256x128xf32>,
    %c0_46 = arith.constant 0 : index
    %c2 = arith.constant 2 : index
    %c0_47 = arith.constant 0 : index
    %c0_48 = arith.constant 0 : index
    %32 = vector.load %arg6[%c0_46, %c2, %c0_47, %c0_48] : memref<1x18x18x128xf32, #tpu.memory_space<vmem>>, vector<1x16x18x128xf32>
    %33 = vector.extract_strided_slice %32 {offsets = [0, 0, 0, 0], sizes = [1, 16, 16, 128], strides = [1, 1, 1, 1]} : vector<1x16x18x128xf32> to vector<1x16x16x128xf32>
    %34 = vector.extract_strided_slice %32 {offsets = [0, 0, 1, 0], sizes = [1, 16, 16, 128], strides = [1, 1, 1, 1]} : vector<1x16x18x128xf32> to vector<1x16x16x128xf32>
    %35 = vector.extract_strided_slice %32 {offsets = [0, 0, 2, 0], sizes = [1, 16, 16, 128], strides = [1, 1, 1, 1]} : vector<1x16x18x128xf32> to vector<1x16x16x128xf32>
    %36 = tpu.concatenate %33, %34, %35 in 3 : vector<1x16x16x128xf32>, vector<1x16x16x128xf32>, vector<1x16x16x128xf32> -> vector<1x16x16x384xf32>
    %37 = vector.shape_cast %36 : vector<1x16x16x384xf32> to vector<256x384xf32>
    %c2_49 = arith.constant 2 : index
    %c0_50 = arith.constant 0 : index
    %c0_51 = arith.constant 0 : index
    %38 = vector.load %arg2[%c2_49, %c0_50, %c0_51] : memref<3x384x128xf32, #tpu.memory_space<vmem>>, vector<1x384x128xf32>
    %39 = vector.shape_cast %38 : vector<1x384x128xf32> to vector<384x128xf32>
    %cst_52 = arith.constant dense<0.000000e+00> : vector<256x128xf32>
    %40 = tpu.matmul %37, %39, %cst_52 {dimension_numbers = #tpu.dot_dimension_numbers<[1], [0], [0], [1], [0, 0, 1, 1], [], []>} : vector<256x384xf32>, vector<384x128xf32>, vector<256x128xf32> -> vector<256x128xf32>
    %c0_53 = arith.constant 0 : index
    %c0_54 = arith.constant 0 : index
    %41 = vector.load %arg7[%c0_53, %c0_54] : memref<256x128xf32, #tpu.memory_space<vmem>>, vector<256x128xf32>
    %42 = arith.addf %41, %40 : vector<256x128xf32>
    %c0_55 = arith.constant 0 : index
    %c0_56 = arith.constant 0 : index
    %43 = vector.load %arg7[%c0_55, %c0_56] : memref<256x128xf32, #tpu.memory_space<vmem>>, vector<256x128xf32>
    tpu.vector_store %arg7[%c0_55, %c0_56], %42 {strides = array<i32>} : memref<256x128xf32, #tpu.memory_space<vmem>>, vector<256x128xf32>,
    %c0_57 = arith.constant 0 : index
    %c0_58 = arith.constant 0 : index
    %44 = vector.load %arg7[%c0_57, %c0_58] : memref<256x128xf32, #tpu.memory_space<vmem>>, vector<256x128xf32>
    %45 = vector.shape_cast %44 : vector<256x128xf32> to vector<1x16x16x128xf32>
    %c0_59 = arith.constant 0 : index
    %c0_60 = arith.constant 0 : index
    %c0_61 = arith.constant 0 : index
    %c0_62 = arith.constant 0 : index
    %46 = vector.load %arg3[%c0_59, %c0_60, %c0_61, %c0_62] : memref<1x16x16x128xf32, #tpu.memory_space<vmem>>, vector<1x16x16x128xf32>
    tpu.vector_store %arg3[%c0_59, %c0_60, %c0_61, %c0_62], %45 {strides = array<i32>} : memref<1x16x16x128xf32, #tpu.memory_space<vmem>>, vector<1x16x16x128xf32>,
    %cst_63 = arith.constant dense<0.000000e+00> : vector<128xf32>
    %47 = vector.multi_reduction <add>, %44, %cst_63 [0] : vector<256x128xf32> to vector<128xf32>
    %48 = vector.shape_cast %47 : vector<128xf32> to vector<1x128xf32>
    %cst_64 = arith.constant 3.906250e-03 : f32
    %49 = vector.broadcast %cst_64 : f32 to vector<1x128xf32>
    %50 = arith.mulf %48, %49 : vector<1x128xf32>
    %51 = vector.broadcast %50 : vector<1x128xf32> to vector<256x128xf32>
    %52 = arith.subf %44, %51 : vector<256x128xf32>
    %53 = vector.shape_cast %48 : vector<1x128xf32> to vector<1x1x128xf32>
    %c0_65 = arith.constant 0 : index
    %c0_66 = arith.constant 0 : index
    %c0_67 = arith.constant 0 : index
    %54 = vector.load %arg4[%c0_65, %c0_66, %c0_67] : memref<1x1x128xf32, #tpu.memory_space<vmem>>, vector<1x1x128xf32>
    tpu.vector_store %arg4[%c0_65, %c0_66, %c0_67], %53 {strides = array<i32>} : memref<1x1x128xf32, #tpu.memory_space<vmem>>, vector<1x1x128xf32>,
    %55 = arith.mulf %52, %52 : vector<256x128xf32>
    %cst_68 = arith.constant dense<0.000000e+00> : vector<128xf32>
    %56 = vector.multi_reduction <add>, %55, %cst_68 [0] : vector<256x128xf32> to vector<128xf32>
    %57 = vector.shape_cast %56 : vector<128xf32> to vector<1x128xf32>
    %58 = vector.shape_cast %57 : vector<1x128xf32> to vector<1x1x128xf32>
    %c0_69 = arith.constant 0 : index
    %c0_70 = arith.constant 0 : index
    %c0_71 = arith.constant 0 : index
    %59 = vector.load %arg5[%c0_69, %c0_70, %c0_71] : memref<1x1x128xf32, #tpu.memory_space<vmem>>, vector<1x1x128xf32>
    tpu.vector_store %arg5[%c0_69, %c0_70, %c0_71], %58 {strides = array<i32>} : memref<1x1x128xf32, #tpu.memory_space<vmem>>, vector<1x1x128xf32>,
    return
  }
  func.func @transform_0(%arg0: i32) -> (i32, i32, i32, i32) {
    %c0_i32 = arith.constant 0 : i32
    %c0_i32_0 = arith.constant 0 : i32
    %c0_i32_1 = arith.constant 0 : i32
    %c0_i32_2 = arith.constant 0 : i32
    return %arg0, %c0_i32, %c0_i32_0, %c0_i32_1 : i32, i32, i32, i32
  }
  func.func @transform_1(%arg0: i32) -> (i32, i32, i32) {
    %c0_i32 = arith.constant 0 : i32
    %c0_i32_0 = arith.constant 0 : i32
    %c0_i32_1 = arith.constant 0 : i32
    %c0_i32_2 = arith.constant 0 : i32
    return %c0_i32, %c0_i32_0, %c0_i32_1 : i32, i32, i32
  }
  func.func @transform_2(%arg0: i32) -> (i32, i32, i32, i32) {
    %c0_i32 = arith.constant 0 : i32
    %c0_i32_0 = arith.constant 0 : i32
    %c0_i32_1 = arith.constant 0 : i32
    %c0_i32_2 = arith.constant 0 : i32
    return %arg0, %c0_i32, %c0_i32_0, %c0_i32_1 : i32, i32, i32, i32
  }
  func.func @transform_3(%arg0: i32) -> (i32, i32, i32) {
    %c0_i32 = arith.constant 0 : i32
    %c0_i32_0 = arith.constant 0 : i32
    %c0_i32_1 = arith.constant 0 : i32
    return %arg0, %c0_i32, %c0_i32_0 : i32, i32, i32
  }
  func.func @transform_4(%arg0: i32) -> (i32, i32, i32) {
    %c0_i32 = arith.constant 0 : i32
    %c0_i32_0 = arith.constant 0 : i32
    %c0_i32_1 = arith.constant 0 : i32
    return %arg0, %c0_i32, %c0_i32_0 : i32, i32, i32
  }
}

</mosaic_0001>

<bundles_post_ra>
// kernel: tpu_custom_call.1
= control target key start
LH: loop header
LB: loop body
LE: loop exit
PB: predicated region body
PF: predicated region fallthrough
CT: control target
= control target key end

     0   :  { %10 = vsyncpa [#allocation5], 0  ;;  %s4856_s0 = inlined_call_operand.hbm [shape: f32[2,16,16,128], index: 0, kind: input, shape index: {}]   ;;  %s4857_s1 = inlined_call_operand.hbm [shape: f32[3,384,128], index: 1, kind: input, shape index: {}]   ;;  %s4858_s2 = inlined_call_operand.hbm [shape: f32[2,16,16,128], index: 2, kind: output, shape index: {0}]   ;;  %s4859_s3 = inlined_call_operand.hbm [shape: f32[2,1,128], index: 3, kind: output, shape index: {1}]   ;;  %s4860_s4 = inlined_call_operand.hbm [shape: f32[2,1,128], index: 4, kind: output, shape index: {2}]  }
   0x1   :  { %12 = vsyncpa [#allocation5 + $0x1], 0 }
   0x2   :  { %13 = vsyncpa [#allocation8], 0 }
   0x3   :  { %14 = vsyncpa [#allocation6], 0 }
   0x4   :  { %16 = vsyncpa [#allocation6 + $0x1], 0 }
   0x5   :  { %17 = vsyncpa [#allocation11], 0 }
   0x6   :  { %19 = vsyncpa [#allocation11 + $0x1], 0  ;;  %s3509_s15 = smov 0   ;;  %s3511_s16 = smov 0  }
   0x7   :  { %s3513_s17 = smov 0   ;;  %s3515_s18 = smov 0  }
   0x8 LB: > { %s3530_s19 = sadd.s32 4294967295, %s3476_s18   ;;  %s4861_s20 = sadd.s32 4294967294, %s3476_s18   ;;  %s3476_s18 = sphi %s3515_s18, %s5052_s18   ;;  %s3472_s17 = sphi %s3513_s17, %s5051_s17   ;;  %s3468_s16 = sphi %s3511_s16, %s5050_s16   ;;  %s3464_s15 = sphi %s3509_s15, %s5049_s15  }
   0x9   : > { %p45_p0 = scmp.ne.s32.totalorder %s3468_s16, %s3464_s15  ;;  %p46_p1 = scmp.eq.s32.totalorder %s3530_s19, 0 }
   0xa   : > { %p90_p2 = scmp.eq.s32.totalorder %s3530_s19, 1  ;;  %p96_p3 = scmp.eq.s32.totalorder %s4861_s20, 1 }
   0xb   : > { %p3541_p4 = por %p46_p1, %p45_p0  ;;  %p3101_p5 = scmp.ge.s32.totalorder %s3476_s18, 1 }
   0xc   : > { %p3546_p6 = por %p96_p3, %p45_p0  ;;  %p155_p7 = scmp.lt.s32.totalorder %s3476_s18, 3 }
   0xd   : > { %s166_s25 = sshll.u32 %s4857_s1, 4  ;;  %s3478_s27 = smov [#allocation7]   ;;  %s167_s25 = int_to_ptr.hbm [resolvable:$true] %s166_s25 }
   0xe   : > { %p3554_p8 = pnand %p3101_p5, %p155_p7  ;;  %s168_s28 = sshll.u32 %s3478_s27, 4  ;;  %s169_s28 = int_to_ptr.vmem [resolvable:$true] %s168_s28 }
   0xf   : > { %s3564_s29 = sadd.s32 1, %s3476_s18   ;;  %s3479_s30 = smov 128  }
  0x10   : > { %p3178_p9 = pneg %p3554_p8  ;;  %s3480_s5 = smov 8  }
  0x11   : > { %s29_s6 = ssub.s32 %s3476_s18, %s3564_s29  ;;  %s32_s7 = sadd.s32 1, %s3472_s17 }
  0x12   : > { %p3179_p10 = pnand %p3178_p9, %p46_p1  ;;  %p30_p12 = scmp.eq.s32.totalorder %s29_s6, 0 }
  0x13   : > { %p39_p13 = scmp.ne.s32.totalorder %s3472_s17, %s3468_s16  ;;  %p40_p0 = scmp.eq.s32.totalorder %s3476_s18, 0 }
  0x14   : > { %3181 = dma.hbm_to_vmem [thread:$0]  (!%p3179_p10), %s167_s25, 18432, %s169_s28, [#allocation8], %s3479_s30, %s3479_s30, %s3480_s5  }
  0x15   : > { %s3576_s8 = scalar_select %p30_p12, %s3472_s17, %s32_s7  }
  0x16   : > { %p3580_p3 = por %p90_p2, %p39_p13  ;;  %p3197_p5 = scmp.lt.s32.totalorder %s3476_s18, 2 }
  0x17   : > { %s182_s10 = sand.u32 1, %s3472_s17   ;;  %s3116_s11 = sshll.u32 %s3476_s18, 8 }
  0x18   : > { %p41_p7 = por %p40_p0, %p39_p13  ;;  %s3104_s12 = sshll.u32 %s182_s10, 8 }
  0x19   : > { %s191_s23 = scalar_lea.hbm %s4856_s0, %s3116_s11  ;;  %s186_s25 = scalar_lea.vmem [#allocation4], %s3104_s12 }
  0x1a   : > { %s192_s24 = sshll.u32 %s191_s23, 4  ;;  %s194_s27 = sshll.u32 %s186_s25, 4  ;;  %s193_s24 = int_to_ptr.hbm [resolvable:$true] %s192_s24  ;;  %s195_s27 = int_to_ptr.vmem [resolvable:$true] %s194_s27 }
  0x1b   : > { %p3590_p9 = pnand %p3197_p5, %p41_p7  ;;  %s183_s6 = scalar_lea.sflag [#allocation5], %s182_s10 }
  0x1c   : > { %s3316_s7 = sshra.s32 %s193_s24, 4  ;;  %s3323_s12 = scalar_lea.hbm %s4856_s0, 512  ;;  %s3317_s7 = int_to_ptr.hbm [resolvable:$true] %s3316_s7 }
  0x1d   : > { %s3318_s20 = scalar_lea.hbm %s3317_s7, 256  ;;  %p3320_p10 = pneg %p3590_p9 }
  0x1e   : > { %p3319_p2 = scmp.ne.s32.totalorder %s3317_s7, %s3318_s20  ;;  %p3324_p0 = scmp.lt.s32.totalorder %s3317_s7, %s4856_s0 }
  0x1f   : > { %p3325_p5 = scmp.lt.s32.totalorder %s3323_s12, %s3318_s20 }
  0x20   : > { %p3321_p12 = pnand %p3320_p10, %p3319_p2 }
  0x21   : > { %p3326_p7 = por %p3325_p5, %p3324_p0 }
  0x22   : > { %p3322_p13 = pneg %p3321_p12 }
  0x24   : > { %p3327_p11 = pnand %p3326_p7, %p3322_p13 }
  0x26   : > { %3330 = shalt.err (!%p3327_p11)
}
  0x27   : > { %3185 = dma.hbm_to_vmem [thread:$0]  (!%p3590_p9), %s193_s24, 4096, %s195_s27, %s183_s6, %s3479_s30, %s3479_s30, %s3480_s5  }
  0x28   : > { %206 = sbr.rel (%p3554_p8) target bundleno = 911 (0x38f), region = 28 }
  0x2d   : > { %s3610_s10 = sand.u32 1, %s3468_s16  }
  0x2e   : > { %s3108_s20 = sshll.u32 %s3610_s10, 8  ;;  %s209_s25 = scalar_lea.sflag [#allocation5], %s3610_s10 }
  0x2f   : > { %s3616_s7 = scalar_lea.vmem [#allocation4], %s3108_s20 }
  0x30   : > { %3447 = dma.done.wait (%p3541_p4), %s209_s25, 4096  }
  0x31   : > { %3449 = vsyncadd (%p3541_p4), %s209_s25, 4294963200 }
  0x32   : > { %3451 = dma.done.wait (%p46_p1), [#allocation8], 18432  }
  0x33   : > { %3453 = vsyncadd (%p46_p1), [#allocation8], 4294948864  ;;  %v3481_v0 = vmov 0.0   ;;  %v696_v1 = vld [vmem:[#allocation7 + $0x78] sm:$0xff]  ;;  %v695_v2 = vld [vmem:[#allocation7 + $0x70] sm:$0xff]  ;;  %vm455_vm0 = vcmask 1046528  }
  0x34   : > { %262 = vst [vmem:[#allocation2 + $0x60] sm:$0x1] %v3481_v0  ;;  %3118 = vmatpush.msra.mxu1 %v696_v1  ;;  %3119 = vmatpush.msra.mxu2 %v696_v1  ;;  %v694_v3 = vld [vmem:[#allocation7 + $0x68] sm:$0xff]  ;;  %v693_v4 = vld [vmem:[#allocation7 + $0x60] sm:$0xff]  ;;  %v300_v5 = vld [vmem:[%s3616_s7 + $0x30] sm:$0xff]  ;;  %vm568_vm1 = vcmask 1045504  }
  0x35   : > { %251 = vst [vmem:[#allocation2] sm:$0xff] %v3481_v0  ;;  %3120 = vmatpush.msra.mxu3 %v696_v1  ;;  %729 = vmatpush.msra.mxu0 %v696_v1  ;;  %v692_v6 = vld [vmem:[#allocation7 + $0x58] sm:$0xff]  ;;  %v691_v7 = vld [vmem:[#allocation7 + $0x50] sm:$0xff]  ;;  %v690_v8 = vld [vmem:[#allocation7 + $0x48] sm:$0xff]  ;;  %s4392_s21 = scalar_lea.vmem [#allocation9], %s3108_s20  ;;  %s3117_s26 = sshll.u32 %s3530_s19, 8 }
  0x36   : > { %252 = vst [vmem:[#allocation2 + $0x8] sm:$0xff] %v3481_v0  ;;  %3121 = vmatpush.msra.mxu1 %v695_v2  ;;  %3122 = vmatpush.msra.mxu2 %v695_v2  ;;  %v689_v9 = vld [vmem:[#allocation7 + $0x40] sm:$0xff]  ;;  %v688_v10 = vld [vmem:[#allocation7 + $0x38] sm:$0xff]  ;;  %v687_v11 = vld [vmem:[#allocation7 + $0x30] sm:$0xff]  ;;  %s2934_s24 = scalar_lea.hbm %s4858_s2, %s3117_s26  ;;  %s2935_s27 = sshll.u32 %s4392_s21, 4  ;;  %s2936_s27 = int_to_ptr.vmem [resolvable:$true] %s2935_s27 }
  0x37   : > { %253 = vst [vmem:[#allocation2 + $0x10] sm:$0x3] %v3481_v0  ;;  %3123 = vmatpush.msra.mxu3 %v695_v2  ;;  %730 = vmatpush.msra.mxu0 %v695_v2  ;;  %v686_v12 = vld [vmem:[#allocation7 + $0x28] sm:$0xff]  ;;  %v685_v13 = vld [vmem:[#allocation7 + $0x20] sm:$0xff]  ;;  %v684_v14 = vld [vmem:[#allocation7 + $0x18] sm:$0xff]  ;;  %s2937_s28 = sshll.u32 %s2934_s24, 4  ;;  %s2938_s28 = int_to_ptr.hbm [resolvable:$true] %s2937_s28 }
  0x38   : > { %255 = vst [vmem:[#allocation2 + $0x198] sm:$0xff] %v3481_v0  ;;  %3124 = vmatpush.msra.mxu1 %v694_v3  ;;  %3125 = vmatpush.msra.mxu2 %v694_v3  ;;  %v683_v15 = vld [vmem:[#allocation7 + $0x10] sm:$0xff]  ;;  %v682_v16 = vld [vmem:[#allocation7 + $0x8] sm:$0xff]  ;;  %v681_v17 = vld [vmem:[#allocation7] sm:$0xff]  ;;  %s2915_s6 = scalar_lea.sflag [#allocation6], %s3610_s10  ;;  %s3360_s11 = sshra.s32 %s2938_s28, 4  ;;  %s3361_s11 = int_to_ptr.hbm [resolvable:$true] %s3360_s11 }
  0x39   : > { %257 = vst [vmem:[#allocation2 + $0x1a8] sm:$0x3] %v3481_v0  ;;  %3126 = vmatpush.msra.mxu3 %v694_v3  ;;  %731 = vmatpush.msra.mxu0 %v694_v3  ;;  %v308_v19 = vld [vmem:[%s3616_s7 + $0x70] sm:$0xff]  ;;  %v728_v20 = vld [vmem:[#allocation7 + $0x178] sm:$0xff]  ;;  %v726_v27 = vld [vmem:[#allocation7 + $0x168] sm:$0xff]  ;;  %s3362_s13 = scalar_lea.hbm %s3361_s11, 256  ;;  %p3367_p11 = scmp.lt.s32.totalorder %s3361_s11, %s4858_s2 }
  0x3a   : > { %259 = vst [vmem:[#allocation2 + $0x18] sm:$0x1] %v3481_v0  ;;  %3127 = vmatpush.msra.mxu1 %v693_v4  ;;  %3128 = vmatpush.msra.mxu2 %v693_v4  ;;  %v1436_v21 = vld [vmem:[#allocation7 + $0x1f8] sm:$0xff]  ;;  %v727_v23 = vld [vmem:[#allocation7 + $0x170] sm:$0xff]  ;;  %v1434_v28 = vld [vmem:[#allocation7 + $0x1e8] sm:$0xff]  ;;  %p3363_p1 = scmp.ne.s32.totalorder %s3361_s11, %s3362_s13  ;;  %s3366_s23 = scalar_lea.hbm %s4858_s2, 512 }
  0x3b   : > { %260 = vst [vmem:[#allocation2 + $0x30] sm:$0x1] %v3481_v0  ;;  %3129 = vmatpush.msra.mxu3 %v693_v4  ;;  %732 = vmatpush.msra.mxu0 %v693_v4  ;;  %v712_v22 = vld [vmem:[#allocation7 + $0xf8] sm:$0xff]  ;;  %v1435_v24 = vld [vmem:[#allocation7 + $0x1f0] sm:$0xff]  ;;  %v710_v31 = vld [vmem:[#allocation7 + $0xe8] sm:$0xff]  ;;  %p3368_p9 = scmp.lt.s32.totalorder %s3366_s23, %s3362_s13 }
  0x3c   : > { %261 = vst [vmem:[#allocation2 + $0x48] sm:$0x1] %v3481_v0  ;;  %3130 = vmatpush.msra.mxu1 %v692_v6  ;;  %3131 = vmatpush.msra.mxu2 %v692_v6  ;;  %v1452_v25 = vld [vmem:[#allocation7 + $0x278] sm:$0xff]  ;;  %v711_v26 = vld [vmem:[#allocation7 + $0xf0] sm:$0xff]  ;;  %v725_v33 = vld [vmem:[#allocation7 + $0x160] sm:$0xff]  ;;  %p3364_p4 = pnand %p3363_p1, %p3580_p3 }
  0x3d   : > { %263 = vst [vmem:[#allocation2 + $0x78] sm:$0x1] %v3481_v0  ;;  %3132 = vmatpush.msra.mxu3 %v692_v6  ;;  %733 = vmatpush.msra.mxu0 %v692_v6  ;;  %v316_v29 = vld [vmem:[%s3616_s7 + $0xb0] sm:$0xff]  ;;  %v301_v32 = vld [vmem:[%s3616_s7 + $0x38] sm:$0xff]  ;;  %v1433_v34 = vld [vmem:[#allocation7 + $0x1e0] sm:$0xff]  ;;  %p3369_p2 = por %p3368_p9, %p3367_p11 }
  0x3e   : > { %264 = vst [vmem:[#allocation2 + $0x90] sm:$0x1] %v3481_v0  ;;  %3133 = vmatpush.msra.mxu1 %v691_v7  ;;  %3134 = vmatpush.msra.mxu2 %v691_v7  ;;  %v1451_v30 = vld [vmem:[#allocation7 + $0x270] sm:$0xff]  ;;  %v309_v35 = vld [vmem:[%s3616_s7 + $0x78] sm:$0xff]  ;;  %v1450_v36 = vld [vmem:[#allocation7 + $0x268] sm:$0xff]  ;;  %p3365_p8 = pneg %p3364_p4 }
  0x3f   : > { %333 = vst [vmem:[#allocation2 + $0x61] sm:$0xff] %v300_v5  ;;  %3135 = vmatpush.msra.mxu3 %v691_v7  ;;  %734 = vmatpush.msra.mxu0 %v691_v7  ;;  %v709_v37 = vld [vmem:[#allocation7 + $0xe0] sm:$0xff]  ;;  %v317_v38 = vld [vmem:[%s3616_s7 + $0xb8] sm:$0xff]  ;;  %v1431_v45 = vld [vmem:[#allocation7 + $0x1d0] sm:$0xff] }
  0x40   : > { %265 = vst [vmem:[#allocation2 + $0xa8] sm:$0x1] %v3481_v0  ;;  %3136 = vmatpush.msra.mxu1 %v690_v8  ;;  %3137 = vmatpush.msra.mxu2 %v690_v8  ;;  %v302_v39 = vld [vmem:[%s3616_s7 + $0x40] sm:$0xff]  ;;  %v1432_v40 = vld [vmem:[#allocation7 + $0x1d8] sm:$0xff]  ;;  %v723_v48 = vld [vmem:[#allocation7 + $0x150] sm:$0xff]  ;;  %p3370_p10 = pnand %p3369_p2, %p3365_p8 }
  0x41   : > { %266 = vst [vmem:[#allocation2 + $0xc0] sm:$0x1] %v3481_v0  ;;  %3138 = vmatpush.msra.mxu3 %v690_v8  ;;  %735 = vmatpush.msra.mxu0 %v690_v8  ;;  %v310_v41 = vld [vmem:[%s3616_s7 + $0x80] sm:$0xff]  ;;  %v724_v43 = vld [vmem:[#allocation7 + $0x158] sm:$0xff]  ;;  %v1430_v51 = vld [vmem:[#allocation7 + $0x1c8] sm:$0xff] }
  0x42   : > { %267 = vst [vmem:[#allocation2 + $0xd8] sm:$0x1] %v3481_v0  ;;  %3139 = vmatpush.msra.mxu1 %v689_v9  ;;  %3140 = vmatpush.msra.mxu2 %v689_v9  ;;  %v318_v42 = vld [vmem:[%s3616_s7 + $0xc0] sm:$0xff]  ;;  %v708_v49 = vld [vmem:[#allocation7 + $0xd8] sm:$0xff]  ;;  %v303_v53 = vld [vmem:[%s3616_s7 + $0x48] sm:$0xff] }
  0x43   : > { %268 = vst [vmem:[#allocation2 + $0xf0] sm:$0x1] %v3481_v0  ;;  %3141 = vmatpush.msra.mxu3 %v689_v9  ;;  %736 = vmatpush.msra.mxu0 %v689_v9  ;;  %v1449_v46 = vld [vmem:[#allocation7 + $0x260] sm:$0xff]  ;;  %v1448_v52 = vld [vmem:[#allocation7 + $0x258] sm:$0xff]  ;;  %v722_v54 = vld [vmem:[#allocation7 + $0x148] sm:$0xff] }
  0x44   : > { %269 = vst [vmem:[#allocation2 + $0x108] sm:$0x1] %v3481_v0  ;;  %3142 = vmatpush.msra.mxu1 %v688_v10  ;;  %3143 = vmatpush.msra.mxu2 %v688_v10  ;;  %v294_v50 = vld [vmem:[%s3616_s7] sm:$0xff]  ;;  %v311_v55 = vld [vmem:[%s3616_s7 + $0x88] sm:$0xff]  ;;  %v707_v59 = vld [vmem:[#allocation7 + $0xd0] sm:$0xff] }
  0x45   : > { %270 = vst [vmem:[#allocation2 + $0x120] sm:$0x1] %v3481_v0  ;;  %3144 = vmatpush.msra.mxu3 %v688_v10  ;;  %737 = vmatpush.msra.mxu0 %v688_v10  ;;  %v319_v56 = vld [vmem:[%s3616_s7 + $0xc8] sm:$0xff]  ;;  %v1429_v57 = vld [vmem:[#allocation7 + $0x1c0] sm:$0xff]  ;;  %v1447_v62 = vld [vmem:[#allocation7 + $0x250] sm:$0xff] }
  0x46   : > { %271 = vst [vmem:[#allocation2 + $0x138] sm:$0x1] %v3481_v0  ;;  %3145 = vmatpush.msra.mxu1 %v687_v11  ;;  %3146 = vmatpush.msra.mxu2 %v687_v11  ;;  %v3660_v18 = vld [vmem:[#allocation2 + $0x60] sm:$0xff]  ;;  %v721_v60 = vld [vmem:[#allocation7 + $0x140] sm:$0xff]  ;;  %v295_v63 = vld [vmem:[%s3616_s7 + $0x8] sm:$0xff] }
  0x47   : > { %272 = vst [vmem:[#allocation2 + $0x150] sm:$0x1] %v3481_v0  ;;  %3147 = vmatpush.msra.mxu3 %v687_v11  ;;  %738 = vmatpush.msra.mxu0 %v687_v11  ;;  %v706_v2 = vld [vmem:[#allocation7 + $0xc8] sm:$0xff]  ;;  %v304_v3 = vld [vmem:[%s3616_s7 + $0x50] sm:$0xff]  ;;  %v720_v5 = vld [vmem:[#allocation7 + $0x138] sm:$0xff] }
  0x48   : > { %273 = vst [vmem:[#allocation2 + $0x168] sm:$0x1] %v3481_v0  ;;  %3148 = vmatpush.msra.mxu1 %v686_v12  ;;  %3149 = vmatpush.msra.mxu2 %v686_v12  ;;  %v312_v4 = vld [vmem:[%s3616_s7 + $0x90] sm:$0xff]  ;;  %v1428_v6 = vld [vmem:[#allocation7 + $0x1b8] sm:$0xff]  ;;  %v1446_v8 = vld [vmem:[#allocation7 + $0x248] sm:$0xff] }
  0x49   : > { %274 = vst [vmem:[#allocation2 + $0x180] sm:$0x1] %v3481_v0  ;;  %3150 = vmatpush.msra.mxu3 %v686_v12  ;;  %739 = vmatpush.msra.mxu0 %v686_v12  ;;  %v320_v7 = vld [vmem:[%s3616_s7 + $0xd0] sm:$0xff]  ;;  %v705_v9 = vld [vmem:[#allocation7 + $0xc0] sm:$0xff] }
  0x4a   : > { %277 = vst [vmem:[#allocation2 + $0x29] sm:$0x1] %v3481_v0  ;;  %3151 = vmatpush.msra.mxu1 %v685_v13  ;;  %3152 = vmatpush.msra.mxu2 %v685_v13  ;;  %v719_v10 = vld [vmem:[#allocation7 + $0x130] sm:$0xff] }
  0x4b   : > { %278 = vst [vmem:[#allocation2 + $0x41] sm:$0x1] %v3481_v0  ;;  %3153 = vmatpush.msra.mxu3 %v685_v13  ;;  %740 = vmatpush.msra.mxu0 %v685_v13  ;;  %v1427_v11 = vld [vmem:[#allocation7 + $0x1b0] sm:$0xff] }
  0x4c   : > { %279 = vst [vmem:[#allocation2 + $0x59] sm:$0x1] %v3481_v0  ;;  %3154 = vmatpush.msra.mxu1 %v684_v14  ;;  %3155 = vmatpush.msra.mxu2 %v684_v14  ;;  %v296_v12 = vld [vmem:[%s3616_s7 + $0x10] sm:$0xff] }
  0x4d   : > { %280 = vst [vmem:[#allocation2 + $0x71] sm:$0x1] %v3481_v0  ;;  %3156 = vmatpush.msra.mxu3 %v684_v14  ;;  %741 = vmatpush.msra.mxu0 %v684_v14  ;;  %v1445_v14 = vld [vmem:[#allocation7 + $0x240] sm:$0xff] }
  0x4e   : > { %281 = vst [vmem:[#allocation2 + $0x89] sm:$0x1] %v3481_v0  ;;  %3157 = vmatpush.msra.mxu1 %v683_v15  ;;  %3158 = vmatpush.msra.mxu2 %v683_v15 }
  0x4f   : > { %282 = vst [vmem:[#allocation2 + $0xa1] sm:$0x1] %v3481_v0  ;;  %3159 = vmatpush.msra.mxu3 %v683_v15  ;;  %742 = vmatpush.msra.mxu0 %v683_v15  ;;  %v305_v15 = vld [vmem:[%s3616_s7 + $0x58] sm:$0xff] }
  0x50   : > { %283 = vst [vmem:[#allocation2 + $0xb9] sm:$0x1] %v3481_v0  ;;  %3160 = vmatpush.msra.mxu1 %v682_v16  ;;  %3161 = vmatpush.msra.mxu2 %v682_v16 }
  0x51   : > { %284 = vst [vmem:[#allocation2 + $0xd1] sm:$0x1] %v3481_v0  ;;  %3162 = vmatpush.msra.mxu3 %v682_v16  ;;  %743 = vmatpush.msra.mxu0 %v682_v16 }
  0x52   : > { %285 = vst [vmem:[#allocation2 + $0xe9] sm:$0x1] %v3481_v0  ;;  %3163 = vmatpush.msra.mxu1 %v681_v17  ;;  %3164 = vmatpush.msra.mxu2 %v681_v17 }
  0x53   : > { %286 = vst [vmem:[#allocation2 + $0x101] sm:$0x1] %v3481_v0  ;;  %3165 = vmatpush.msra.mxu3 %v681_v17  ;;  %769 = vmatmul.f32.vlgmr.msra.gmra.mxu1 %v3660_v18 }
  0x54   : > { %287 = vst [vmem:[#allocation2 + $0x119] sm:$0x1] %v3481_v0  ;;  %955 = vmatpush.msrb.mxu2 %v728_v20  ;;  %744 = vmatpush.msra.mxu0 %v681_v17  ;;  %v704_v17 = vld [vmem:[#allocation7 + $0xb8] sm:$0xff] }
  0x55   : > { %288 = vst [vmem:[#allocation2 + $0x131] sm:$0x1] %v3481_v0  ;;  %1469 = vmatpush.msrb.mxu3 %v1436_v21  ;;  %842 = vmatpush.msrb.mxu1 %v712_v22  ;;  %v321_v21 = vld [vmem:[%s3616_s7 + $0xd8] sm:$0xff] }
  0x56   : > { %289 = vst [vmem:[#allocation2 + $0x149] sm:$0x1] %v3481_v0  ;;  %956 = vmatpush.msrb.mxu2 %v727_v23  ;;  %1582 = vmatpush.msrb.mxu0 %v1452_v25  ;;  %v297_v22 = vld [vmem:[%s3616_s7 + $0x18] sm:$0xff]  ;;  %v1426_v25 = vld [vmem:[#allocation7 + $0x1a8] sm:$0xff] }
  0x57   : > { %290 = vst [vmem:[#allocation2 + $0x161] sm:$0x1] %v3481_v0  ;;  %1470 = vmatpush.msrb.mxu3 %v1435_v24  ;;  %843 = vmatpush.msrb.mxu1 %v711_v26  ;;  %v718_v24 = vld [vmem:[#allocation7 + $0x128] sm:$0xff]  ;;  %v1444_v26 = vld [vmem:[#allocation7 + $0x238] sm:$0xff] }
  0x58   : > { %291 = vst [vmem:[#allocation2 + $0x179] sm:$0x1] %v3481_v0  ;;  %957 = vmatpush.msrb.mxu2 %v726_v27  ;;  %1583 = vmatpush.msrb.mxu0 %v1451_v30  ;;  %v703_v27 = vld [vmem:[#allocation7 + $0xb0] sm:$0xff]  ;;  %v1425_v30 = vld [vmem:[#allocation7 + $0x1a0] sm:$0xff] }
  0x59   : > { %292 = vst [vmem:[#allocation2 + $0x191] sm:$0x1] %v3481_v0  ;;  %1471 = vmatpush.msrb.mxu3 %v1434_v28  ;;  %844 = vmatpush.msrb.mxu1 %v710_v31  ;;  %v306_v28 = vld [vmem:[%s3616_s7 + $0x60] sm:$0xff] }
  0x5a   : > { %341 = vst [vmem:[#allocation2 + $0xc1] sm:$0xff] %v308_v19  ;;  %958 = vmatpush.msrb.mxu2 %v725_v33  ;;  %1584 = vmatpush.msrb.mxu0 %v1450_v36  ;;  %v313_v19 = vld [vmem:[%s3616_s7 + $0x98] sm:$0xff]  ;;  %v314_v31 = vld [vmem:[%s3616_s7 + $0xa0] sm:$0xff]  ;;  %v702_v33 = vld [vmem:[#allocation7 + $0xa8] sm:$0xff] }
  0x5b   : > { %258 = vst [vmem:[#allocation2] sm:$0x1] %v3481_v0  ;;  %1472 = vmatpush.msrb.mxu3 %v1433_v34  ;;  %845 = vmatpush.msrb.mxu1 %v709_v37  ;;  %v322_v34 = vld [vmem:[%s3616_s7 + $0xe0] sm:$0xff] }
  0x5c   : > { %275 = vst [vmem:[#allocation2 + $0x198] sm:$0x1] %v3481_v0  ;;  %959 = vmatpush.msrb.mxu2 %v724_v43  ;;  %1585 = vmatpush.msrb.mxu0 %v1449_v46  ;;  %v298_v36 = vld [vmem:[%s3616_s7 + $0x20] sm:$0xff] }
  0x5d   : > { %276 = vst [vmem:[#allocation2 + $0x11] sm:$0x1] %v3481_v0  ;;  %1473 = vmatpush.msrb.mxu3 %v1432_v40  ;;  %846 = vmatpush.msrb.mxu1 %v708_v49  ;;  %v701_v46 = vld [vmem:[#allocation7 + $0xa0] sm:$0xff]  ;;  %v1423_v49 = vld [vmem:[#allocation7 + $0x190] sm:$0xff] }
  0x5e   : > { %293 = vst [vmem:[#allocation2 + $0x1a9] sm:$0x1] %v3481_v0  ;;  %960 = vmatpush.msrb.mxu2 %v723_v48  ;;  %1586 = vmatpush.msrb.mxu0 %v1448_v52  ;;  %v715_v48 = vld [vmem:[#allocation7 + $0x110] sm:$0xff]  ;;  %v323_v52 = vld [vmem:[%s3616_s7 + $0xe8] sm:$0xff] }
  0x5f   : > { %349 = vst [vmem:[#allocation2 + $0x121] sm:$0xff] %v316_v29  ;;  %1474 = vmatpush.msrb.mxu3 %v1431_v45  ;;  %847 = vmatpush.msrb.mxu1 %v707_v59  ;;  %v717_v29 = vld [vmem:[#allocation7 + $0x120] sm:$0xff]  ;;  %v1442_v45 = vld [vmem:[#allocation7 + $0x228] sm:$0xff] }
  0x60   : > { %334 = vst [vmem:[#allocation2 + $0x69] sm:$0xff] %v301_v32  ;;  %961 = vmatpush.msrb.mxu2 %v722_v54  ;;  %1587 = vmatpush.msrb.mxu0 %v1447_v62  ;;  %v1443_v32 = vld [vmem:[#allocation7 + $0x230] sm:$0xff]  ;;  %v299_v54 = vld [vmem:[%s3616_s7 + $0x28] sm:$0xff] }
  0x61   : > { %v3679_v44 = vld [vmem:[#allocation2 + $0xc0] sm:$0xff]  ;;  %342 = vst [vmem:[#allocation2 + $0xc9] sm:$0xff] %v309_v35  ;;  %1475 = vmatpush.msrb.mxu3 %v1430_v51  ;;  %848 = vmatpush.msrb.mxu1 %v706_v2  ;;  %v700_v51 = vld [vmem:[#allocation7 + $0x98] sm:$0xff]  ;;  %v1422_v59 = vld [vmem:[#allocation7 + $0x188] sm:$0xff] }
  0x62   : > { %793 = vmatmul.f32.vlgmr.msra.gmra.mxu2 %v3679_v44  ;;  %v3682_v47 = vld [vmem:[#allocation2] sm:$0xff]  ;;  %350 = vst [vmem:[#allocation2 + $0x129] sm:$0xff] %v317_v38  ;;  %1588 = vmatpush.msrb.mxu0 %v1446_v8  ;;  %v307_v38 = vld [vmem:[%s3616_s7 + $0x68] sm:$0xff]  ;;  %v1421_v2 = vld [vmem:[#allocation7 + $0x180] sm:$0xff] }
  0x63   : > { %745 = vmatmul.f32.vlgmr.msra.gmra.mxu0 %v3682_v47  ;;  %335 = vst [vmem:[#allocation2 + $0x79] sm:$0xff] %v302_v39  ;;  %1476 = vmatpush.msrb.mxu3 %v1429_v57  ;;  %v315_v39 = vld [vmem:[%s3616_s7 + $0xa8] sm:$0xff]  ;;  %v699_v62 = vld [vmem:[#allocation7 + $0x90] sm:$0xff] }
  0x64   : > { %343 = vst [vmem:[#allocation2 + $0xd9] sm:$0xff] %v310_v41  ;;  %962 = vmatpush.msrb.mxu2 %v721_v60  ;;  %849 = vmatpush.msrb.mxu1 %v705_v9  ;;  %v716_v41 = vld [vmem:[#allocation7 + $0x118] sm:$0xff]  ;;  %v1438_v9 = vld [vmem:[#allocation7 + $0x208] sm:$0xff] }
  0x65   : > { %351 = vst [vmem:[#allocation2 + $0x139] sm:$0xff] %v318_v42  ;;  %1477 = vmatpush.msrb.mxu3 %v1428_v6  ;;  %1589 = vmatpush.msrb.mxu0 %v1445_v14  ;;  %v1424_v42 = vld [vmem:[#allocation7 + $0x198] sm:$0xff]  ;;  %v697_v6 = vld [vmem:[#allocation7 + $0x80] sm:$0xff] }
  0x66   : > { %v395_v58 = vld [vmem:[#allocation2 + $0x120] sm:$0xff]  ;;  %327 = vst [vmem:[#allocation2 + $0x19] sm:$0xff] %v294_v50  ;;  %963 = vmatpush.msrb.mxu2 %v720_v5  ;;  %850 = vmatpush.msrb.mxu1 %v704_v17  ;;  %v1441_v50 = vld [vmem:[#allocation7 + $0x220] sm:$0xff]  ;;  %v1440_v60 = vld [vmem:[#allocation7 + $0x218] sm:$0xff] }
  0x67   : > { %817 = vmatmul.f32.vlgmr.msra.gmra.mxu3 %v395_v58  ;;  %v3689_v61 = vld [vmem:[#allocation2 + $0x68] sm:$0xff]  ;;  %336 = vst [vmem:[#allocation2 + $0x81] sm:$0xff] %v303_v53  ;;  %1590 = vmatpush.msrb.mxu0 %v1444_v26  ;;  %v714_v58 = vld [vmem:[#allocation7 + $0x108] sm:$0xff] }
  0x68   : > { %772 = vmatmul.f32.gmra.mxu1 %v3689_v61  ;;  %v3693_v1 = vld [vmem:[#allocation2 + $0xc8] sm:$0xff]  ;;  %344 = vst [vmem:[#allocation2 + $0xe1] sm:$0xff] %v311_v55  ;;  %964 = vmatpush.msrb.mxu2 %v719_v10 }
  0x69   : > { %352 = vst [vmem:[#allocation2 + $0x141] sm:$0xff] %v319_v56  ;;  %v396_v13 = vld [vmem:[#allocation2 + $0x128] sm:$0xff]  ;;  %1478 = vmatpush.msrb.mxu3 %v1427_v11  ;;  %851 = vmatpush.msrb.mxu1 %v703_v27  ;;  %v2240_v27 = vld [vmem:[#allocation7 + $0x370] sm:$0xff] }
  0x6a   : > { %796 = vmatmul.f32.gmra.mxu2 %v3693_v1  ;;  %328 = vst [vmem:[#allocation2 + $0x21] sm:$0xff] %v295_v63  ;;  %v3702_v16 = vld [vmem:[#allocation2 + $0x78] sm:$0xff]  ;;  %1591 = vmatpush.msrb.mxu0 %v1443_v32  ;;  %v713_v63 = vld [vmem:[#allocation7 + $0x100] sm:$0xff]  ;;  %v2241_v10 = vld [vmem:[#allocation7 + $0x378] sm:$0xff]  ;;  %v457_v32 = vrot.slane %v3481_v0, 1 }
  0x6b   : > { %748 = vmatmul.f32.gmra.mxu0 %v3481_v0  ;;  %337 = vst [vmem:[#allocation2 + $0x91] sm:$0xff] %v304_v3  ;;  %v3705_v20 = vld [vmem:[#allocation2 + $0xd8] sm:$0xff]  ;;  %965 = vmatpush.msrb.mxu2 %v718_v24  ;;  %v1439_v3 = vld [vmem:[#allocation7 + $0x210] sm:$0xff]  ;;  %v2257_v11 = vld [vmem:[#allocation7 + $0x3f8] sm:$0xff] }
  0x6c   : > { %345 = vst [vmem:[#allocation2 + $0xf1] sm:$0xff] %v312_v4  ;;  %1479 = vmatpush.msrb.mxu3 %v1426_v25  ;;  %v398_v35 = vld [vmem:[#allocation2 + $0x138] sm:$0xff]  ;;  %852 = vmatpush.msrb.mxu1 %v702_v33  ;;  %v1468_v14 = vld [vmem:[#allocation7 + $0x2f8] sm:$0xff]  ;;  %v569_v33 = vrot.slane %v3682_v47, 2 }
  0x6d   : > { %353 = vst [vmem:[#allocation2 + $0x151] sm:$0xff] %v320_v7  ;;  %v3709_v23 = vld [vmem:[#allocation2 + $0x18] sm:$0xff]  ;;  %966 = vmatpush.msrb.mxu2 %v717_v29  ;;  %1592 = vmatpush.msrb.mxu0 %v1442_v45  ;;  %v1467_v29 = vld [vmem:[#allocation7 + $0x2f0] sm:$0xff] }
  0x6e   : > { %329 = vst [vmem:[#allocation2 + $0x31] sm:$0xff] %v296_v12  ;;  %1480 = vmatpush.msrb.mxu3 %v1425_v30  ;;  %v3718_v37 = vld [vmem:[#allocation2 + $0x80] sm:$0xff]  ;;  %853 = vmatpush.msrb.mxu1 %v701_v46  ;;  %v698_v4 = vld [vmem:[#allocation7 + $0x88] sm:$0xff] }
  0x6f   : > { %820 = vmatmul.f32.gmra.mxu3 %v396_v13  ;;  %338 = vst [vmem:[#allocation2 + $0x99] sm:$0xff] %v305_v15  ;;  %v3722_v40 = vld [vmem:[#allocation2 + $0xe0] sm:$0xff]  ;;  %967 = vmatpush.msrb.mxu2 %v716_v41  ;;  %v1437_v13 = vld [vmem:[#allocation7 + $0x200] sm:$0xff] }
  0x70   : > { %775 = vmatmul.f32.gmra.mxu1 %v3702_v16  ;;  %346 = vst [vmem:[#allocation2 + $0xf9] sm:$0xff] %v313_v19  ;;  %1481 = vmatpush.msrb.mxu3 %v1424_v42  ;;  %v399_v53 = vld [vmem:[#allocation2 + $0x140] sm:$0xff]  ;;  %v361_v41 = vld [vmem:[#allocation2 + $0x10] sm:$0x3] }
  0x71   : > { %354 = vst [vmem:[#allocation2 + $0x159] sm:$0xff] %v321_v21  ;;  %v3725_v43 = vld [vmem:[#allocation2 + $0x20] sm:$0xff]  ;;  %968 = vmatpush.msrb.mxu2 %v715_v48  ;;  %1593 = vmatpush.msrb.mxu0 %v1441_v50  ;;  %v2273_v21 = vld [vmem:[#allocation7 + $0x478] sm:$0xff]  ;;  %v572_v48 = vrot.slane %v361_v41, 2 }
  0x72   : > { %799 = vmatmul.f32.gmra.mxu2 %v3705_v20  ;;  %330 = vst [vmem:[#allocation2 + $0x39] sm:$0xff] %v297_v22  ;;  %1482 = vmatpush.msrb.mxu3 %v1423_v49  ;;  %v3731_v55 = vld [vmem:[#allocation2 + $0x90] sm:$0xff]  ;;  %v2272_v45 = vld [vmem:[#allocation7 + $0x470] sm:$0xff]  ;;  %v1102_v46 = vld [vmem:[#allocation2 + $0x28] sm:$0x3] }
  0x73   : > { %751 = vmatmul.f32.gmra.mxu0 %v3709_v23  ;;  %339 = vst [vmem:[#allocation2 + $0xa9] sm:$0xff] %v306_v28  ;;  %854 = vmatpush.msrb.mxu1 %v700_v51  ;;  %v3733_v56 = vld [vmem:[#allocation2 + $0xf0] sm:$0xff]  ;;  %v2256_v28 = vld [vmem:[#allocation7 + $0x3f0] sm:$0xff]  ;;  %v1199_v49 = vrot.slane %v1102_v46, 1  ;;  %v1464_v46 = vld [vmem:[#allocation7 + $0x2d8] sm:$0xff] }
  0x74   : > { %347 = vst [vmem:[#allocation2 + $0x109] sm:$0xff] %v314_v31  ;;  %969 = vmatpush.msrb.mxu2 %v714_v58  ;;  %1483 = vmatpush.msrb.mxu3 %v1422_v59  ;;  %v401_v5 = vld [vmem:[#allocation2 + $0x150] sm:$0xff]  ;;  %v456_v31 = vrot.slane %v3682_v47, 1  ;;  %v4868_v59 = vrot.slane %v3709_v23, 2 }
  0x75   : > { %355 = vst [vmem:[#allocation2 + $0x169] sm:$0xff] %v322_v34  ;;  %v3735_v57 = vld [vmem:[#allocation2 + $0x30] sm:$0xff]  ;;  %1594 = vmatpush.msrb.mxu0 %v1440_v60  ;;  %855 = vmatpush.msrb.mxu1 %v699_v62  ;;  %v570_v34 = vrot.slane %v3481_v0, 2  ;;  %v459_v0 = vrot.slane %v361_v41, 1  ;;  %v575_v60 = vrot.slane %v3725_v43, 2 }
  0x76   : > { %331 = vst [vmem:[#allocation2 + $0x49] sm:$0xff] %v298_v36  ;;  %970 = vmatpush.msrb.mxu2 %v713_v63  ;;  %1484 = vmatpush.msrb.mxu3 %v1421_v2  ;;  %v3740_v7 = vld [vmem:[#allocation2 + $0x98] sm:$0xff]  ;;  %v462_v36 = vrot.slane %v3725_v43, 1  ;;  %v466_v62 = vrot.slane %v3735_v57, 1  ;;  %v364_v2 = vld [vmem:[#allocation2 + $0x28] sm:$0x3] }
  0x77   : > { %823 = vmatmul.f32.gmra.mxu3 %v398_v35  ;;  %340 = vst [vmem:[#allocation2 + $0xb1] sm:$0xff] %v307_v38  ;;  %1595 = vmatpush.msrb.mxu0 %v1439_v3  ;;  %v3742_v8 = vld [vmem:[#allocation2 + $0xf8] sm:$0xff]  ;;  %v461_v35 = vrot.slane %v3709_v23, 1  ;;  %v571_v42 = vsel %vm568_vm1, %v569_v33, %v570_v34  ;;  %v460_v50 = vsel %vm455_vm0, %v457_v32, %v459_v0 }
  0x78   : > { %778 = vmatmul.f32.gmra.mxu1 %v3718_v37  ;;  %348 = vst [vmem:[#allocation2 + $0x111] sm:$0xff] %v315_v39  ;;  %2274 = vmatpush.msra.mxu2 %v2241_v10  ;;  %v402_v15 = vld [vmem:[#allocation2 + $0x158] sm:$0xff]  ;;  %v458_v39 = vsel %vm455_vm0, %v456_v31, %v457_v32  ;;  %v573_v51 = vsel %vm568_vm1, %v570_v34, %v572_v48  ;;  %v577_v10 = vrot.slane %v364_v2, 2  ;;  %v2270_v34 = vld [vmem:[#allocation7 + $0x460] sm:$0xff] }
  0x79   : > { %356 = vst [vmem:[#allocation2 + $0x171] sm:$0xff] %v323_v52  ;;  %856 = vmatpush.msrb.mxu1 %v698_v4  ;;  %v3745_v12 = vld [vmem:[#allocation2 + $0x38] sm:$0xff]  ;;  %1596 = vmatpush.msrb.mxu0 %v1438_v9  ;;  %v1198_v47 = vsel %vm455_vm0, %v461_v35, %v462_v36  ;;  %v1200_v58 = vsel %vm455_vm0, %v462_v36, %v1199_v49  ;;  %v1105_v9 = vld [vmem:[#allocation2 + $0x40] sm:$0x3] }
  0x7a   : > { %802 = vmatmul.f32.gmra.mxu2 %v3722_v40  ;;  %332 = vst [vmem:[#allocation2 + $0x51] sm:$0xff] %v299_v54  ;;  %2387 = vmatpush.msra.mxu3 %v2257_v11  ;;  %v3749_v17 = vld [vmem:[#allocation2 + $0xa8] sm:$0xff]  ;;  %v2239_v52 = vld [vmem:[#allocation7 + $0x368] sm:$0xff]  ;;  %v467_v63 = vrot.slane %v3745_v12, 1  ;;  %v576_v3 = vsel %vm568_vm1, %v4868_v59, %v575_v60  ;;  %v1204_v11 = vrot.slane %v1105_v9, 1  ;;  %v1463_v9 = vld [vmem:[#allocation7 + $0x2d0] sm:$0xff] }
  0x7b   : > { %754 = vmatmul.f32.gmra.mxu0 %v3725_v43  ;;  %857 = vmatpush.msrb.mxu1 %v697_v6  ;;  %v3751_v19 = vld [vmem:[#allocation2 + $0x108] sm:$0xff]  ;;  %v1466_v54 = vld [vmem:[#allocation7 + $0x2e8] sm:$0xff]  ;;  %v464_v6 = vrot.slane %v364_v2, 1  ;;  %v367_v32 = vld [vmem:[#allocation2 + $0x40] sm:$0x3] }
  0x7c   : > { %1597 = vmatpush.msrb.mxu0 %v1437_v13  ;;  %v404_v24 = vld [vmem:[#allocation2 + $0x168] sm:$0xff]  ;;  %2275 = vmatpush.msra.mxu2 %v2240_v27  ;;  %v2271_v4 = vld [vmem:[#allocation7 + $0x468] sm:$0xff]  ;;  %v4867_v27 = vrot.slane %v3735_v57, 2 }
  0x7d   : > { %1695 = vmatpush.msra.mxu1 %v1468_v14  ;;  %v3754_v22 = vld [vmem:[#allocation2 + $0x48] sm:$0xff]  ;;  %2388 = vmatpush.msra.mxu3 %v2256_v28  ;;  %v465_v13 = vsel %vm455_vm0, %v462_v36, %v464_v6  ;;  %v2238_v14 = vld [vmem:[#allocation7 + $0x360] sm:$0xff]  ;;  %v580_v28 = vrot.slane %v3745_v12, 2  ;;  %v469_v36 = vrot.slane %v367_v32, 1 }
  0x7e   : > { %2500 = vmatpush.msra.mxu0 %v2273_v21  ;;  %v3758_v25 = vld [vmem:[#allocation2 + $0xb0] sm:$0xff]  ;;  %2276 = vmatpush.msra.mxu2 %v2239_v52  ;;  %v4865_v48 = vrot.slane %v3754_v22, 2 }
  0x7f   : > { %826 = vmatmul.f32.gmra.mxu3 %v399_v53  ;;  %v3760_v26 = vld [vmem:[#allocation2 + $0x110] sm:$0xff]  ;;  %1696 = vmatpush.msra.mxu1 %v1467_v29  ;;  %v2255_v53 = vld [vmem:[#allocation7 + $0x3e8] sm:$0xff]  ;;  %v471_v29 = vrot.slane %v3754_v22, 1  ;;  %v581_v33 = vsel %vm568_vm1, %v4867_v27, %v580_v28 }
  0x80   : > { %781 = vmatmul.f32.gmra.mxu1 %v3731_v55  ;;  %v405_v38 = vld [vmem:[#allocation2 + $0x170] sm:$0xff]  ;;  %2501 = vmatpush.msra.mxu0 %v2272_v45  ;;  %v2237_v45 = vld [vmem:[#allocation7 + $0x358] sm:$0xff] }
  0x81   : > { %v3763_v30 = vld [vmem:[#allocation2 + $0x50] sm:$0xff]  ;;  %2389 = vmatpush.msra.mxu3 %v2255_v53  ;;  %1697 = vmatpush.msra.mxu1 %v1466_v54  ;;  %v370_v52 = vld [vmem:[#allocation2 + $0x58] sm:$0x3]  ;;  %v2269_v54 = vld [vmem:[#allocation7 + $0x458] sm:$0xff] }
  0x82   : > { %805 = vmatmul.f32.gmra.mxu2 %v3733_v56  ;;  %2502 = vmatpush.msra.mxu0 %v2271_v4  ;;  %v1465_v21 = vld [vmem:[#allocation7 + $0x2e0] sm:$0xff]  ;;  %v472_v31 = vrot.slane %v3763_v30, 1  ;;  %v585_v49 = vrot.slane %v3763_v30, 2  ;;  %v2236_v4 = vld [vmem:[#allocation7 + $0x350] sm:$0xff] }
  0x83   : > { %757 = vmatmul.f32.gmra.mxu0 %v3735_v57  ;;  %2277 = vmatpush.msra.mxu2 %v2238_v14  ;;  %v482_v14 = vrot.slane %v3718_v37, 1 }
  0x84   : > { %1698 = vmatpush.msra.mxu1 %v1465_v21  ;;  %v1208_v35 = vsel %vm455_vm0, %v471_v29, %v472_v31  ;;  %2503 = vmatpush.msra.mxu0 %v2270_v34  ;;  %v586_v53 = vsel %vm568_vm1, %v4865_v48, %v585_v49 }
  0x85   : > { %2278 = vmatpush.msra.mxu2 %v2237_v45 }
  0x86   : > { %1699 = vmatpush.msra.mxu1 %v1464_v46  ;;  %2504 = vmatpush.msra.mxu0 %v2269_v54  ;;  %v595_v46 = vrot.slane %v3718_v37, 2 }
  0x87   : > { %829 = vmatmul.f32.gmra.mxu3 %v401_v5  ;;  %v1203_v5 = vsel %vm455_vm0, %v466_v62, %v467_v63  ;;  %v1111_v62 = vld [vmem:[#allocation2 + $0x70] sm:$0x3]  ;;  %2279 = vmatpush.msra.mxu2 %v2236_v4 }
  0x88   : > { %784 = vmatmul.f32.gmra.mxu1 %v3740_v7  ;;  %v1214_v2 = vrot.slane %v1111_v62, 1 }
  0x89   : > { %1700 = vmatpush.msra.mxu1 %v1463_v9 }
  0x8a   : > { %808 = vmatmul.f32.gmra.mxu2 %v3742_v8 }
  0x8b   : > { %760 = vmatmul.f32.gmra.mxu0 %v3745_v12 }
  0x8f   : > { %832 = vmatmul.f32.gmra.mxu3 %v402_v15  ;;  %v2254_v15 = vld [vmem:[#allocation7 + $0x3e0] sm:$0xff] }
  0x90   : > { %787 = vmatmul.f32.gmra.mxu1 %v3749_v17  ;;  %2390 = vmatpush.msra.mxu3 %v2254_v15  ;;  %v373_v15 = vld [vmem:[#allocation2 + $0x70] sm:$0x3] }
  0x92   : > { %811 = vmatmul.f32.gmra.mxu2 %v3751_v19 }
  0x93   : > { %763 = vmatmul.f32.gmra.mxu0 %v3754_v22 }
  0x97   : > { %835 = vmatmul.f32.gmra.mxu3 %v404_v24  ;;  %v1205_v24 = vsel %vm455_vm0, %v467_v63, %v1204_v11  ;;  %v590_v11 = vrot.slane %v3689_v61, 2 }
  0x98   : > { %790 = vmatmul.f32.gmra.mxu1 %v3758_v25 }
  0x9a   : > { %814 = vmatmul.f32.gmra.mxu2 %v3760_v26 }
  0x9b   : > { %766 = vmatmul.f32.gmra.mxu0 %v3763_v30 }
  0x9f   : > { %838 = vmatmul.f32.gmra.mxu3 %v405_v38  ;;  %v1108_v38 = vld [vmem:[#allocation2 + $0x58] sm:$0x3] }
  0xa0   : > { %858 = vmatmul.f32.vlgmr.msrb.gmra.mxu1 %v458_v39  ;;  %v582_v39 = vrot.slane %v367_v32, 2  ;;  %v1209_v41 = vrot.slane %v1108_v38, 1  ;;  %v1114_v32 = vld [vmem:[#allocation2 + $0x88] sm:$0x3] }
  0xa1   : > { %v1219_v34 = vrot.slane %v1114_v32, 1  ;;  %v491_v32 = vrot.slane %v3749_v17, 1 }
  0xa2   : > { %971 = vmatmul.f32.vlgmr.msrb.gmra.mxu2 %v571_v42  ;;  %v470_v42 = vsel %vm455_vm0, %v467_v63, %v469_v36  ;;  %v1210_v0 = vsel %vm455_vm0, %v472_v31, %v1209_v41  ;;  %v587_v63 = vrot.slane %v370_v52, 2  ;;  %v2251_v41 = vld [vmem:[#allocation7 + $0x3c8] sm:$0xff] }
  0xa3   : > { %1598 = vmatmul.f32.vlgmr.msrb.gmra.mxu0 %v1198_v47 }
  0xa7   : > { %1485 = vmatmul.f32.vlgmr.msrb.gmra.mxu3 %v3709_v23 }
  0xa8   : > { %861 = vmatmul.f32.gmra.mxu1 %v460_v50  ;;  %v476_v50 = vrot.slane %v3660_v18, 1 }
  0xaa   : > { %974 = vmatmul.f32.gmra.mxu2 %v573_v51  ;;  %v477_v51 = vrot.slane %v3689_v61, 1 }
  0xab   : > { %1601 = vmatmul.f32.gmra.mxu0 %v1200_v58 }
  0xac   : > { %v1213_v58 = vsel %vm455_vm0, %v476_v50, %v477_v51  ;;  %v1215_v6 = vsel %vm455_vm0, %v477_v51, %v1214_v2  ;;  %v3848_v50 = vrot.slane %v3740_v7, 1  ;;  %v1117_v2 = vld [vmem:[#allocation2 + $0xa0] sm:$0x3] }
  0xaf   : > { %1488 = vmatmul.f32.gmra.mxu3 %v3725_v43  ;;  %v578_v43 = vsel %vm568_vm1, %v575_v60, %v577_v10  ;;  %v474_v60 = vrot.slane %v370_v52, 1  ;;  %v4864_v10 = vrot.slane %v3660_v18, 2 }
  0xb0   : > { %864 = vmatmul.f32.gmra.mxu1 %v1198_v47  ;;  %v2253_v47 = vld [vmem:[#allocation7 + $0x3d8] sm:$0xff] }
  0xb1   : > { %2391 = vmatpush.msra.mxu3 %v2253_v47  ;;  %v591_v21 = vsel %vm568_vm1, %v4864_v10, %v590_v11  ;;  %v1462_v47 = vld [vmem:[#allocation7 + $0x2c8] sm:$0xff] }
  0xb2   : > { %977 = vmatmul.f32.gmra.mxu2 %v576_v3  ;;  %v475_v3 = vsel %vm455_vm0, %v472_v31, %v474_v60  ;;  %v479_v31 = vrot.slane %v373_v15, 1  ;;  %1701 = vmatpush.msra.mxu1 %v1462_v47  ;;  %v379_v47 = vld [vmem:[#allocation2 + $0xa0] sm:$0x3] }
  0xb3   : > { %1604 = vmatmul.f32.gmra.mxu0 %v1203_v5 }
  0xb4   : > { %v480_v36 = vsel %vm455_vm0, %v477_v51, %v479_v31  ;;  %v600_v31 = vrot.slane %v3740_v7, 2 }
  0xb7   : > { %1491 = vmatmul.f32.gmra.mxu3 %v3735_v57 }
  0xb8   : > { %867 = vmatmul.f32.gmra.mxu1 %v465_v13 }
  0xba   : > { %980 = vmatmul.f32.gmra.mxu2 %v578_v43  ;;  %v481_v43 = vrot.slane %v3702_v16, 1 }
  0xbb   : > { %1607 = vmatmul.f32.gmra.mxu0 %v1205_v24  ;;  %v2268_v24 = vld [vmem:[#allocation7 + $0x450] sm:$0xff] }
  0xbc   : > { %v1218_v29 = vsel %vm455_vm0, %v481_v43, %v482_v14  ;;  %2505 = vmatpush.msra.mxu0 %v2268_v24  ;;  %v2250_v43 = vld [vmem:[#allocation7 + $0x3c0] sm:$0xff] }
  0xbf   : > { %1494 = vmatmul.f32.gmra.mxu3 %v3745_v12  ;;  %v583_v12 = vsel %vm568_vm1, %v580_v28, %v582_v39  ;;  %v2235_v39 = vld [vmem:[#allocation7 + $0x348] sm:$0xff] }
  0xc0   : > { %870 = vmatmul.f32.gmra.mxu1 %v1203_v5  ;;  %v2252_v5 = vld [vmem:[#allocation7 + $0x3d0] sm:$0xff]  ;;  %2280 = vmatpush.msra.mxu2 %v2235_v39  ;;  %v609_v39 = vrot.slane %v3679_v44, 2 }
  0xc1   : > { %2392 = vmatpush.msra.mxu3 %v2252_v5 }
  0xc2   : > { %983 = vmatmul.f32.gmra.mxu2 %v581_v33  ;;  %v592_v33 = vrot.slane %v373_v15, 2 }
  0xc3   : > { %1610 = vmatmul.f32.gmra.mxu0 %v1208_v35  ;;  %2393 = vmatpush.msra.mxu3 %v2251_v41  ;;  %v497_v41 = vrot.slane %v3693_v1, 1 }
  0xc4   : > { %v593_v38 = vsel %vm568_vm1, %v590_v11, %v592_v33  ;;  %v2234_v11 = vld [vmem:[#allocation7 + $0x340] sm:$0xff]  ;;  %v3881_v33 = vrot.slane %v3758_v25, 1 }
  0xc5   : > { %2281 = vmatpush.msra.mxu2 %v2234_v11  ;;  %2394 = vmatpush.msra.mxu3 %v2250_v43  ;;  %v2233_v43 = vld [vmem:[#allocation7 + $0x338] sm:$0xff] }
  0xc7   : > { %1497 = vmatmul.f32.gmra.mxu3 %v3754_v22  ;;  %2282 = vmatpush.msra.mxu2 %v2233_v43 }
  0xc8   : > { %873 = vmatmul.f32.gmra.mxu1 %v470_v42 }
  0xca   : > { %986 = vmatmul.f32.gmra.mxu2 %v583_v12  ;;  %v1220_v12 = vsel %vm455_vm0, %v482_v14, %v1219_v34 }
  0xcb   : > { %1613 = vmatmul.f32.gmra.mxu0 %v1210_v0  ;;  %v4863_v0 = vrot.slane %v3702_v16, 2 }
  0xcd   : > { %v596_v54 = vsel %vm568_vm1, %v4863_v0, %v595_v46 }
  0xcf   : > { %1500 = vmatmul.f32.gmra.mxu3 %v3763_v30  ;;  %v588_v30 = vsel %vm568_vm1, %v585_v49, %v587_v63  ;;  %v486_v49 = vrot.slane %v3731_v55, 1 }
  0xd0   : > { %876 = vmatmul.f32.gmra.mxu1 %v1208_v35  ;;  %v3821_v13 = vpop.f32.mrf.mxu1 }
  0xd1   : > { %v1223_v62 = vsel %vm455_vm0, %v486_v49, %v3848_v50  ;;  %v2266_v49 = vld [vmem:[#allocation7 + $0x440] sm:$0xff] }
  0xd2   : > { %989 = vmatmul.f32.gmra.mxu2 %v586_v53  ;;  %v376_v53 = vld [vmem:[#allocation2 + $0x88] sm:$0x3] }
  0xd3   : > { %1616 = vmatmul.f32.gmra.mxu0 %v1213_v58  ;;  %v484_v63 = vrot.slane %v376_v53, 1 }
  0xd7   : > { %1503 = vmatmul.f32.gmra.mxu3 %v3660_v18 }
  0xd8   : > { %879 = vmatmul.f32.gmra.mxu1 %v475_v3 }
  0xda   : > { %992 = vmatmul.f32.gmra.mxu2 %v588_v30  ;;  %v597_v30 = vrot.slane %v376_v53, 2 }
  0xdb   : > { %1619 = vmatmul.f32.gmra.mxu0 %v1215_v6  ;;  %v485_v6 = vsel %vm455_vm0, %v482_v14, %v484_v63  ;;  %v4862_v14 = vrot.slane %v3731_v55, 2 }
  0xdc   : > { %v598_v9 = vsel %vm568_vm1, %v595_v46, %v597_v30 }
  0xdd   : > { %v601_v46 = vsel %vm568_vm1, %v4862_v14, %v600_v31 }
  0xdf   : > { %1506 = vmatmul.f32.gmra.mxu3 %v3689_v61 }
  0xe0   : > { %882 = vmatmul.f32.gmra.mxu1 %v1213_v58  ;;  %v3829_v28 = vpop.f32.mrf.mxu0  ;;  %v2267_v58 = vld [vmem:[#allocation7 + $0x448] sm:$0xff] }
  0xe1   : > { %2506 = vmatpush.msra.mxu0 %v2267_v58  ;;  %v1120_v58 = vld [vmem:[#allocation2 + $0xb8] sm:$0x3] }
  0xe2   : > { %995 = vmatmul.f32.gmra.mxu2 %v591_v21  ;;  %v1229_v30 = vrot.slane %v1120_v58, 1 }
  0xe3   : > { %1622 = vmatmul.f32.gmra.mxu0 %v1218_v29 }
  0xe4   : > { %2507 = vmatpush.msra.mxu0 %v2266_v49 }
  0xe5   : > { %v3832_v35 = vpop.f32.mrf.mxu2  ;;  %v3834_v61 = vpop.f32.mrf.mxu1 }
  0xe6   : > { %4879 = vst [vmem:[#allocation17_spill] sm:$0xff] %v3832_v35  ;;  %v1141_v35 = vld [vmem:[#allocation2 + $0x160] sm:$0x3] }
  0xe7   : > { %1509 = vmatmul.f32.gmra.mxu3 %v3702_v16 }
  0xe8   : > { %885 = vmatmul.f32.gmra.mxu1 %v480_v36  ;;  %v3839_v42 = vpop.f32.mrf.mxu0 }
  0xea   : > { %v3842_v45 = vpop.f32.mrf.mxu3  ;;  %998 = vmatmul.f32.gmra.mxu2 %v593_v38  ;;  %v496_v38 = vrot.slane %v3679_v44, 1  ;;  %v489_v44 = vrot.slane %v379_v47, 1 }
  0xeb   : > { %4880 = vst [vmem:[#allocation18_spill] sm:$0xff] %v3842_v45  ;;  %1625 = vmatmul.f32.gmra.mxu0 %v1220_v12  ;;  %v4869_v12 = vrot.slane %v3693_v1, 2  ;;  %v4055_v45 = vld [vmem:[#allocation2 + $0x140] sm:$0xff] }
  0xed   : > { %v3850_v51 = vpop.f32.mrf.mxu2  ;;  %v3852_v52 = vpop.f32.mrf.mxu1 }
  0xee   : > { %4881 = vst [vmem:[#allocation19_spill] sm:$0xff] %v3850_v51 }
  0xef   : > { %1512 = vmatmul.f32.gmra.mxu3 %v3718_v37  ;;  %v1224_v37 = vrot.slane %v1117_v2, 1  ;;  %v602_v2 = vrot.slane %v379_v47, 2  ;;  %v605_v47 = vrot.slane %v3758_v25, 2 }
  0xf0   : > { %888 = vmatmul.f32.gmra.mxu1 %v1218_v29  ;;  %v3858_v60 = vpop.f32.mrf.mxu0  ;;  %v1461_v29 = vld [vmem:[#allocation7 + $0x2c0] sm:$0xff] }
  0xf1   : > { %v1225_v21 = vsel %vm455_vm0, %v3848_v50, %v1224_v37  ;;  %1702 = vmatpush.msra.mxu1 %v1461_v29  ;;  %v603_v11 = vsel %vm568_vm1, %v600_v31, %v602_v2  ;;  %v1121_v31 = vld [vmem:[#allocation2 + $0xc0] sm:$0xff] }
  0xf2   : > { %v3862_v3 = vpop.f32.mrf.mxu3  ;;  %1001 = vmatmul.f32.gmra.mxu2 %v596_v54  ;;  %v1228_v54 = vsel %vm455_vm0, %v491_v32, %v3881_v33  ;;  %v1230_v32 = vsel %vm455_vm0, %v3881_v33, %v1229_v30  ;;  %v1231_v49 = vrot.slane %v1121_v31, 1  ;;  %v382_v30 = vld [vmem:[#allocation2 + $0xb8] sm:$0x3] }
  0xf3   : > { %4882 = vst [vmem:[#allocation20_spill] sm:$0xff] %v3862_v3  ;;  %1628 = vmatmul.f32.gmra.mxu0 %v1223_v62  ;;  %v607_v0 = vrot.slane %v382_v30, 2 }
  0xf5   : > { %v3864_v4 = vpop.f32.mrf.mxu2  ;;  %v3866_v5 = vpop.f32.mrf.mxu1 }
  0xf6   : > { %4883 = vst [vmem:[#allocation21_spill] sm:$0xff] %v3864_v4 }
  0xf7   : > { %1515 = vmatmul.f32.gmra.mxu3 %v3731_v55 }
  0xf8   : > { %891 = vmatmul.f32.gmra.mxu1 %v485_v6  ;;  %v3871_v15 = vpop.f32.mrf.mxu0 }
  0xfa   : > { %v3875_v24 = vpop.f32.mrf.mxu3  ;;  %1004 = vmatmul.f32.gmra.mxu2 %v598_v9  ;;  %v490_v9 = vsel %vm455_vm0, %v3848_v50, %v489_v44  ;;  %v4866_v50 = vrot.slane %v3749_v17, 2 }
  0xfb   : > { %4884 = vst [vmem:[#allocation22_spill] sm:$0xff] %v3875_v24  ;;  %1631 = vmatmul.f32.gmra.mxu0 %v1225_v21  ;;  %v2249_v21 = vld [vmem:[#allocation7 + $0x3b8] sm:$0xff] }
  0xfc   : > { %2395 = vmatpush.msra.mxu3 %v2249_v21 }
  0xfd   : > { %v3883_v34 = vpop.f32.mrf.mxu2  ;;  %v3885_v36 = vpop.f32.mrf.mxu1 }
  0xfe   : > { %4885 = vst [vmem:[#allocation23_spill] sm:$0xff] %v3883_v34 }
  0xff   : > { %4886 = vst [vmem:[#allocation24_spill] sm:$0xff] %v3885_v36  ;;  %1518 = vmatmul.f32.gmra.mxu3 %v3740_v7  ;;  %v3904_v7 = vsel %vm455_vm0, %v496_v38, %v497_v41  ;;  %v1122_v38 = vld [vmem:[#allocation2 + $0xc8] sm:$0xff] }
 0x100   : > { %894 = vmatmul.f32.gmra.mxu1 %v1223_v62  ;;  %v3895_v53 = vpop.f32.mrf.mxu0  ;;  %v3909_v62 = vsel %vm568_vm1, %v609_v39, %v4869_v12  ;;  %v1232_v44 = vrot.slane %v1122_v38, 1 }
 0x102   : > { %v3899_v63 = vpop.f32.mrf.mxu3  ;;  %1007 = vmatmul.f32.gmra.mxu2 %v601_v46  ;;  %v1460_v46 = vld [vmem:[#allocation7 + $0x2b8] sm:$0xff]  ;;  %v1233_v21 = vsel %vm455_vm0, %v1231_v49, %v1232_v44  ;;  %v2232_v49 = vld [vmem:[#allocation7 + $0x330] sm:$0xff] }
 0x103   : > { %4887 = vst [vmem:[#allocation25_spill] sm:$0xff] %v3899_v63  ;;  %1634 = vmatmul.f32.gmra.mxu0 %v1228_v54  ;;  %1703 = vmatpush.msra.mxu1 %v1460_v46  ;;  %v1123_v46 = vld [vmem:[#allocation2 + $0xd0] sm:$0x3] }
 0x104   : > { %v1234_v10 = vrot.slane %v1123_v46, 1  ;;  %2283 = vmatpush.msra.mxu2 %v2232_v49  ;;  %v1459_v46 = vld [vmem:[#allocation7 + $0x2b0] sm:$0xff]  ;;  %v1126_v49 = vld [vmem:[#allocation2 + $0xe8] sm:$0x3] }
 0x105   : > { %v3911_v37 = vpop.f32.mrf.mxu2  ;;  %v3913_v6 = vpop.f32.mrf.mxu1  ;;  %1704 = vmatpush.msra.mxu1 %v1459_v46  ;;  %v1239_v59 = vrot.slane %v1126_v49, 1  ;;  %v506_v49 = vrot.slane %v3733_v56, 1 }
 0x106   : > { %4888 = vst [vmem:[#allocation26_spill] sm:$0xff] %v3911_v37 }
 0x107   : > { %4889 = vst [vmem:[#allocation27_spill] sm:$0xff] %v3913_v6  ;;  %1521 = vmatmul.f32.gmra.mxu3 %v3749_v17 }
 0x108   : > { %897 = vmatmul.f32.gmra.mxu1 %v490_v9  ;;  %v3919_v29 = vpop.f32.mrf.mxu0  ;;  %v606_v9 = vsel %vm568_vm1, %v4866_v50, %v605_v47  ;;  %v608_v50 = vsel %vm568_vm1, %v605_v47, %v607_v0 }
 0x10a   : > { %v3923_v39 = vpop.f32.mrf.mxu3  ;;  %1010 = vmatmul.f32.gmra.mxu2 %v603_v11  ;;  %v2265_v11 = vld [vmem:[#allocation7 + $0x438] sm:$0xff] }
 0x10b   : > { %4890 = vst [vmem:[#allocation28_spill] sm:$0xff] %v3923_v39  ;;  %1637 = vmatmul.f32.gmra.mxu0 %v1230_v32  ;;  %v494_v32 = vrot.slane %v382_v30, 1 }
 0x10c   : > { %2508 = vmatpush.msra.mxu0 %v2265_v11  ;;  %v2248_v11 = vld [vmem:[#allocation7 + $0x3b0] sm:$0xff] }
 0x10d   : > { %v3927_v58 = vpop.f32.mrf.mxu2  ;;  %v3929_v2 = vpop.f32.mrf.mxu1  ;;  %2396 = vmatpush.msra.mxu3 %v2248_v11 }
 0x10e   : > { %4891 = vst [vmem:[#allocation29_spill] sm:$0xff] %v3927_v58 }
 0x10f   : > { %4892 = vst [vmem:[#allocation30_spill] sm:$0xff] %v3929_v2  ;;  %1524 = vmatmul.f32.gmra.mxu3 %v3758_v25 }
 0x110   : > { %900 = vmatmul.f32.gmra.mxu1 %v1228_v54  ;;  %v3935_v43 = vpop.f32.mrf.mxu0  ;;  %v495_v54 = vsel %vm455_vm0, %v3881_v33, %v494_v32  ;;  %v3953_v33 = vrot.slane %v3722_v40, 1  ;;  %v385_v32 = vld [vmem:[#allocation2 + $0xd0] sm:$0x3] }
 0x112   : > { %v3938_v14 = vpop.f32.mrf.mxu3  ;;  %1013 = vmatmul.f32.gmra.mxu2 %v606_v9  ;;  %v1235_v9 = vsel %vm455_vm0, %v1232_v44, %v1234_v10  ;;  %v499_v44 = vrot.slane %v385_v32, 1 }
 0x113   : > { %4893 = vst [vmem:[#allocation31_spill] sm:$0xff] %v3938_v14  ;;  %1640 = vmatmul.f32.gmra.mxu0 %v1233_v21  ;;  %v1124_v21 = vld [vmem:[#allocation2 + $0xd8] sm:$0xff] }
 0x115   : > { %v3940_v25 = vpop.f32.mrf.mxu2  ;;  %v3942_v48 = vpop.f32.mrf.mxu1 }
 0x116   : > { %4894 = vst [vmem:[#allocation32_spill] sm:$0xff] %v3940_v25 }
 0x117   : > { %4895 = vst [vmem:[#allocation33_spill] sm:$0xff] %v3942_v48  ;;  %1527 = vmatmul.f32.gmra.mxu3 %v1121_v31  ;;  %v1236_v31 = vrot.slane %v1124_v21, 1  ;;  %v325_v48 = vld [vmem:[%s3616_s7 + $0xf8] sm:$0xff] }
 0x118   : > { %903 = vmatmul.f32.gmra.mxu1 %v495_v54  ;;  %v3947_v27 = vpop.f32.mrf.mxu0  ;;  %v2264_v54 = vld [vmem:[#allocation7 + $0x430] sm:$0xff]  ;;  %358 = vst [vmem:[#allocation2 + $0x189] sm:$0xff] %v325_v48  ;;  %v4908_v48 = vrot.slane %v4055_v45, 1 }
 0x119   : > { %2509 = vmatpush.msra.mxu0 %v2264_v54 }
 0x11a   : > { %v3950_v30 = vpop.f32.mrf.mxu3  ;;  %1016 = vmatmul.f32.gmra.mxu2 %v608_v50  ;;  %v1238_v50 = vsel %vm455_vm0, %v1236_v31, %v3953_v33  ;;  %v4899_v31 = vrot.slane %v3693_v1, 2 }
 0x11b   : > { %4896 = vst [vmem:[#allocation34_spill] sm:$0xff] %v3950_v30  ;;  %1643 = vmatmul.f32.gmra.mxu0 %v1235_v9  ;;  %v612_v9 = vrot.slane %v385_v32, 2 }
 0x11d   : > { %v3955_v0 = vpop.f32.mrf.mxu2  ;;  %v859_v47 = vpop.f32.mrf.mxu1  ;;  %v613_v54 = vsel %vm568_vm1, %v4899_v31, %v612_v9  ;;  %v3981_v9 = vrot.slane %v3742_v8, 1  ;;  %v2263_v31 = vld [vmem:[#allocation7 + $0x428] sm:$0xff] }
 0x11e   : > { %4897 = vst [vmem:[#allocation35_spill] sm:$0xff] %v3955_v0  ;;  %v860_v46 = vadd.f32 %v859_v47, %v3829_v28  ;;  %v1240_v28 = vsel %vm455_vm0, %v3953_v33, %v1239_v59  ;;  %v501_v47 = vrot.slane %v3705_v20, 1  ;;  %2510 = vmatpush.msra.mxu0 %v2263_v31  ;;  %v2230_v31 = vld [vmem:[#allocation7 + $0x320] sm:$0xff] }
 0x11f   : > { %1530 = vmatmul.f32.gmra.mxu3 %v1122_v38 }
 0x120   : > { %906 = vmatmul.f32.gmra.mxu1 %v3904_v7  ;;  %v1599_v10 = vpop.f32.mrf.mxu0  ;;  %v500_v7 = vsel %vm455_vm0, %v497_v41, %v499_v44  ;;  %v614_v41 = vrot.slane %v3705_v20, 2  ;;  %v1458_v44 = vld [vmem:[#allocation7 + $0x2a8] sm:$0xff] }
 0x121   : > { %1705 = vmatpush.msra.mxu1 %v1458_v44 }
 0x122   : > { %v3960_v11 = vpop.f32.mrf.mxu3  ;;  %1019 = vmatmul.f32.gmra.mxu2 %v3909_v62  ;;  %v2247_v62 = vld [vmem:[#allocation7 + $0x3a8] sm:$0xff] }
 0x123   : > { %4898 = vst [vmem:[#allocation36_spill] sm:$0xff] %v3960_v11  ;;  %1646 = vmatmul.f32.gmra.mxu0 %v1238_v50  ;;  %v2231_v11 = vld [vmem:[#allocation7 + $0x328] sm:$0xff]  ;;  %2397 = vmatpush.msra.mxu3 %v2247_v62  ;;  %v1243_v62 = vsel %vm455_vm0, %v506_v49, %v3981_v9 }
 0x124   : > { %2284 = vmatpush.msra.mxu2 %v2231_v11 }
 0x125   : > { %v972_v38 = vpop.f32.mrf.mxu2  ;;  %v862_v12 = vpop.f32.mrf.mxu1 }
 0x126   : > { %v3967_v30 = vadd.f32 %v972_v38, %v860_v46  ;;  %v863_v59 = vadd.f32 %v862_v12, %v3839_v42  ;;  %v503_v38 = vsel %vm455_vm0, %v501_v47, %v3953_v33  ;;  %v1129_v12 = vld [vmem:[#allocation2 + $0x100] sm:$0x3]  ;;  %2285 = vmatpush.msra.mxu2 %v2230_v31 }
 0x127   : > { %1533 = vmatmul.f32.gmra.mxu3 %v1124_v21  ;;  %v615_v21 = vrot.slane %v3722_v40, 2  ;;  %v391_v31 = vld [vmem:[#allocation2 + $0x100] sm:$0x3] }
 0x128   : > { %909 = vmatmul.f32.gmra.mxu1 %v500_v7  ;;  %v1602_v32 = vpop.f32.mrf.mxu0  ;;  %v388_v7 = vld [vmem:[#allocation2 + $0xe8] sm:$0x3] }
 0x129   : > { %v504_v42 = vrot.slane %v388_v7, 1  ;;  %v617_v47 = vrot.slane %v388_v7, 2 }
 0x12a   : > { %v1486_v50 = vpop.f32.mrf.mxu3  ;;  %1022 = vmatmul.f32.gmra.mxu2 %v613_v54 }
 0x12b   : > { %v3977_v1 = vadd.f32 %v1599_v10, %v1486_v50  ;;  %1649 = vmatmul.f32.gmra.mxu0 %v1240_v28  ;;  %v616_v10 = vsel %vm568_vm1, %v614_v41, %v615_v21  ;;  %v618_v49 = vsel %vm568_vm1, %v615_v21, %v617_v47  ;;  %v511_v21 = vrot.slane %v3751_v19, 1 }
 0x12d   : > { %v975_v11 = vpop.f32.mrf.mxu2  ;;  %v865_v46 = vpop.f32.mrf.mxu1 }
 0x12e   : > { %v3986_v20 = vadd.f32 %v975_v11, %v863_v59  ;;  %v866_v44 = vadd.f32 %v865_v46, %v3858_v60  ;;  %v505_v11 = vsel %vm455_vm0, %v3953_v33, %v504_v42  ;;  %v4870_v46 = vrot.slane %v3733_v56, 2 }
 0x12f   : > { %1536 = vmatmul.f32.gmra.mxu3 %v3722_v40  ;;  %v1244_v40 = vrot.slane %v1129_v12, 1  ;;  %v620_v33 = vrot.slane %v3742_v8, 2  ;;  %v1457_v12 = vld [vmem:[#allocation7 + $0x2a0] sm:$0xff] }
 0x130   : > { %912 = vmatmul.f32.gmra.mxu1 %v503_v38  ;;  %v1605_v54 = vpop.f32.mrf.mxu0 }
 0x131   : > { %v1245_v7 = vsel %vm455_vm0, %v3981_v9, %v1244_v40  ;;  %1706 = vmatpush.msra.mxu1 %v1457_v12 }
 0x132   : > { %v1489_v28 = vpop.f32.mrf.mxu3  ;;  %1025 = vmatmul.f32.gmra.mxu2 %v616_v10  ;;  %v2246_v10 = vld [vmem:[#allocation7 + $0x3a0] sm:$0xff] }
 0x133   : > { %v3992_v50 = vadd.f32 %v1602_v32, %v1489_v28  ;;  %1652 = vmatmul.f32.gmra.mxu0 %v1243_v62  ;;  %2398 = vmatpush.msra.mxu3 %v2246_v10  ;;  %v4009_v28 = vrot.slane %v3760_v26, 1 }
 0x135   : > { %v978_v59 = vpop.f32.mrf.mxu2  ;;  %v868_v41 = vpop.f32.mrf.mxu1 }
 0x136   : > { %v3997_v38 = vadd.f32 %v978_v59, %v866_v44  ;;  %v869_v47 = vadd.f32 %v868_v41, %v3871_v15  ;;  %v3238_v59 = vld [vmem:[#allocation2 + $0x120] sm:$0xff]  ;;  %v621_v15 = vsel %vm568_vm1, %v4870_v46, %v620_v33  ;;  %v2262_v41 = vld [vmem:[#allocation7 + $0x420] sm:$0xff] }
 0x137   : > { %1539 = vmatmul.f32.gmra.mxu3 %v3733_v56  ;;  %v629_v10 = vrot.slane %v3238_v59, 2  ;;  %2511 = vmatpush.msra.mxu0 %v2262_v41 }
 0x138   : > { %915 = vmatmul.f32.gmra.mxu1 %v505_v11  ;;  %v1608_v32 = vpop.f32.mrf.mxu0  ;;  %v516_v11 = vrot.slane %v3238_v59, 1  ;;  %v1132_v59 = vld [vmem:[#allocation2 + $0x118] sm:$0x3] }
 0x139   : > { %v1249_v41 = vrot.slane %v1132_v59, 1 }
 0x13a   : > { %v1492_v60 = vpop.f32.mrf.mxu3  ;;  %1028 = vmatmul.f32.gmra.mxu2 %v618_v49 }
 0x13b   : > { %v4005_v42 = vadd.f32 %v1605_v54, %v1492_v60  ;;  %1655 = vmatmul.f32.gmra.mxu0 %v1245_v7  ;;  %v4014_v54 = vld [vmem:[#allocation2 + $0x128] sm:$0xff]  ;;  %v622_v60 = vrot.slane %v391_v31, 2 }
 0x13d   : > { %v981_v44 = vpop.f32.mrf.mxu2  ;;  %v871_v40 = vpop.f32.mrf.mxu1 }
 0x13e   : > { %v4012_v49 = vadd.f32 %v981_v44, %v869_v47  ;;  %v1248_v47 = vsel %vm455_vm0, %v511_v21, %v4009_v28  ;;  %v509_v44 = vrot.slane %v391_v31, 1  ;;  %v872_v21 = vadd.f32 %v871_v40, %v3895_v53  ;;  %v2229_v31 = vld [vmem:[#allocation7 + $0x318] sm:$0xff] }
 0x13f   : > { %1542 = vmatmul.f32.gmra.mxu3 %v3742_v8  ;;  %v4900_v8 = vrot.slane %v4014_v54, 1  ;;  %2286 = vmatpush.msra.mxu2 %v2229_v31  ;;  %v4045_v53 = vld [vmem:[#allocation2 + $0x128] sm:$0xff]  ;;  %v3240_v31 = vld [vmem:[#allocation2 + $0x138] sm:$0xff] }
 0x140   : > { %918 = vmatmul.f32.gmra.mxu1 %v1243_v62  ;;  %v1611_v12 = vpop.f32.mrf.mxu0  ;;  %v4901_v62 = vrot.slane %v4014_v54, 2  ;;  %v634_v3 = vrot.slane %v3240_v31, 2 }
 0x141   : > { %v4029_v39 = vsel %vm455_vm0, %v516_v11, %v4900_v8  ;;  %v623_v11 = vsel %vm568_vm1, %v620_v33, %v622_v60  ;;  %v1133_v33 = vld [vmem:[#allocation2 + $0x120] sm:$0xff]  ;;  %v1456_v60 = vld [vmem:[#allocation7 + $0x298] sm:$0xff] }
 0x142   : > { %v1495_v14 = vpop.f32.mrf.mxu3  ;;  %1031 = vmatmul.f32.gmra.mxu2 %v621_v15  ;;  %v4034_v46 = vsel %vm568_vm1, %v629_v10, %v4901_v62  ;;  %v2245_v15 = vld [vmem:[#allocation7 + $0x398] sm:$0xff]  ;;  %v1250_v10 = vsel %vm455_vm0, %v4009_v28, %v1249_v41  ;;  %v1251_v62 = vrot.slane %v1133_v33, 1  ;;  %1707 = vmatpush.msra.mxu1 %v1456_v60 }
 0x143   : > { %v4024_v7 = vadd.f32 %v1608_v32, %v1495_v14  ;;  %1658 = vmatmul.f32.gmra.mxu0 %v1248_v47  ;;  %v510_v14 = vsel %vm455_vm0, %v3981_v9, %v509_v44  ;;  %2399 = vmatpush.msra.mxu3 %v2245_v15  ;;  %v625_v9 = vrot.slane %v3760_v26, 2  ;;  %v521_v15 = vrot.slane %v3240_v31, 1  ;;  %v1135_v31 = vld [vmem:[#allocation2 + $0x130] sm:$0x3] }
 0x145   : > { %v984_v63 = vpop.f32.mrf.mxu2  ;;  %v874_v24 = vpop.f32.mrf.mxu1 }
 0x146   : > { %v4039_v32 = vadd.f32 %v984_v63, %v872_v21  ;;  %v875_v59 = vadd.f32 %v874_v24, %v3919_v29  ;;  %v1252_v21 = vrot.slane %v4045_v53, 1  ;;  %v394_v63 = vld [vmem:[#allocation2 + $0x118] sm:$0x3]  ;;  %v4902_v24 = vrot.slane %v3751_v19, 2 }
 0x147   : > { %1545 = vmatmul.f32.gmra.mxu3 %v3751_v19 }
 0x148   : > { %921 = vmatmul.f32.gmra.mxu1 %v510_v14  ;;  %v1614_v8 = vpop.f32.mrf.mxu0  ;;  %v626_v29 = vsel %vm568_vm1, %v4902_v24, %v625_v9  ;;  %v4903_v24 = vrot.slane %v4055_v45, 2 }
 0x14a   : > { %v1498_v40 = vpop.f32.mrf.mxu3  ;;  %1034 = vmatmul.f32.gmra.mxu2 %v623_v11 }
 0x14b   : > { %v4049_v44 = vadd.f32 %v1611_v12, %v1498_v40  ;;  %1661 = vmatmul.f32.gmra.mxu0 %v1250_v10  ;;  %v4871_v12 = vrot.slane %v4055_v45, 1  ;;  %v2261_v40 = vld [vmem:[#allocation7 + $0x418] sm:$0xff]  ;;  %v627_v10 = vrot.slane %v394_v63, 2 }
 0x14c   : > { %2512 = vmatpush.msra.mxu0 %v2261_v40  ;;  %v1254_v40 = vrot.slane %v1135_v31, 1 }
 0x14d   : > { %v987_v41 = vpop.f32.mrf.mxu2  ;;  %v877_v14 = vpop.f32.mrf.mxu1 }
 0x14e   : > { %v4053_v11 = vadd.f32 %v987_v41, %v875_v59  ;;  %v1253_v59 = vsel %vm455_vm0, %v1251_v62, %v1252_v21  ;;  %v514_v41 = vrot.slane %v394_v63, 1  ;;  %v878_v62 = vadd.f32 %v877_v14, %v3935_v43 }
 0x14f   : > { %1548 = vmatmul.f32.gmra.mxu3 %v3760_v26  ;;  %v4069_v26 = vsel %vm455_vm0, %v521_v15, %v4871_v12  ;;  %v628_v63 = vsel %vm568_vm1, %v625_v9, %v627_v10  ;;  %v2228_v15 = vld [vmem:[#allocation7 + $0x310] sm:$0xff] }
 0x150   : > { %924 = vmatmul.f32.gmra.mxu1 %v1248_v47  ;;  %v1617_v60 = vpop.f32.mrf.mxu0  ;;  %v4074_v47 = vsel %vm568_vm1, %v634_v3, %v4903_v24  ;;  %v1255_v3 = vsel %vm455_vm0, %v1252_v21, %v1254_v40  ;;  %2287 = vmatpush.msra.mxu2 %v2228_v15  ;;  %v4083_v24 = vld [vmem:[#allocation2 + $0x140] sm:$0xff]  ;;  %v3242_v40 = vld [vmem:[#allocation2 + $0x150] sm:$0xff] }
 0x151   : > { %v1257_v10 = vrot.slane %v4083_v24, 1 }
 0x152   : > { %v1501_v0 = vpop.f32.mrf.mxu3  ;;  %1037 = vmatmul.f32.gmra.mxu2 %v626_v29  ;;  %v2244_v29 = vld [vmem:[#allocation7 + $0x390] sm:$0xff] }
 0x153   : > { %v4064_v25 = vadd.f32 %v1614_v8, %v1501_v0  ;;  %1664 = vmatmul.f32.gmra.mxu0 %v1253_v59  ;;  %v515_v0 = vsel %vm455_vm0, %v4009_v28, %v514_v41  ;;  %2400 = vmatpush.msra.mxu3 %v2244_v29  ;;  %v1455_v28 = vld [vmem:[#allocation7 + $0x290] sm:$0xff] }
 0x154   : > { %1708 = vmatpush.msra.mxu1 %v1455_v28  ;;  %v1138_v28 = vld [vmem:[#allocation2 + $0x148] sm:$0x3] }
 0x155   : > { %v990_v58 = vpop.f32.mrf.mxu2  ;;  %v880_v37 = vpop.f32.mrf.mxu1 }
 0x156   : > { %v4079_v8 = vadd.f32 %v990_v58, %v878_v62  ;;  %v1136_v58 = vld [vmem:[#allocation2 + $0x138] sm:$0xff]  ;;  %v397_v62 = vld [vmem:[#allocation2 + $0x130] sm:$0x3] }
 0x157   : > { %1551 = vmatmul.f32.gmra.mxu3 %v1133_v33  ;;  %v881_v33 = vadd.f32 %v880_v37, %v3947_v27  ;;  %v1256_v9 = vrot.slane %v1136_v58, 1  ;;  %v2260_v27 = vld [vmem:[#allocation7 + $0x410] sm:$0xff] }
 0x158   : > { %927 = vmatmul.f32.gmra.mxu1 %v515_v0  ;;  %v1620_v59 = vpop.f32.mrf.mxu0  ;;  %v526_v0 = vrot.slane %v3242_v40, 1  ;;  %2513 = vmatpush.msra.mxu0 %v2260_v27 }
 0x15a   : > { %v1504_v43 = vpop.f32.mrf.mxu3  ;;  %1040 = vmatmul.f32.gmra.mxu2 %v628_v63  ;;  %v639_v63 = vrot.slane %v3242_v40, 2  ;;  %v632_v40 = vrot.slane %v397_v62, 2 }
 0x15b   : > { %v4085_v14 = vadd.f32 %v1617_v60, %v1504_v43  ;;  %1667 = vmatmul.f32.gmra.mxu0 %v1255_v3  ;;  %v4093_v60 = vld [vmem:[#allocation2 + $0x158] sm:$0xff]  ;;  %v1258_v3 = vsel %vm455_vm0, %v1256_v9, %v1257_v10  ;;  %v519_v43 = vrot.slane %v397_v62, 1  ;;  %v1259_v9 = vrot.slane %v1138_v28, 1 }
 0x15c   : > { %v4872_v15 = vrot.slane %v4093_v60, 1  ;;  %v4873_v29 = vrot.slane %v4093_v60, 2  ;;  %v4905_v62 = vrot.slane %v4014_v54, 2  ;;  %v4124_v28 = vld [vmem:[#allocation2 + $0x158] sm:$0xff] }
 0x15d   : > { %v993_v41 = vpop.f32.mrf.mxu2  ;;  %v4089_v31 = vpop.f32.mrf.mxu1 }
 0x15e   : > { %v4091_v21 = vadd.f32 %v993_v41, %v881_v33 }
 0x15f   : > { %1554 = vmatmul.f32.gmra.mxu3 %v4045_v53  ;;  %v4106_v53 = vsel %vm455_vm0, %v526_v0, %v4872_v15  ;;  %v633_v0 = vsel %vm568_vm1, %v4905_v62, %v632_v40  ;;  %v1262_v40 = vrot.slane %v4124_v28, 1  ;;  %v3244_v62 = vld [vmem:[#allocation2 + $0x168] sm:$0xff] }
 0x160   : > { %930 = vmatmul.f32.gmra.mxu1 %v4029_v39  ;;  %v1623_v37 = vpop.f32.mrf.mxu0  ;;  %v4111_v39 = vsel %vm568_vm1, %v639_v63, %v4873_v29  ;;  %v1260_v63 = vsel %vm455_vm0, %v1257_v10, %v1259_v9  ;;  %v400_v10 = vld [vmem:[#allocation2 + $0x148] sm:$0x3]  ;;  %v324_v9 = vld [vmem:[%s3616_s7 + $0xf0] sm:$0xff] }
 0x161   : > { %357 = vst [vmem:[#allocation2 + $0x181] sm:$0xff] %v324_v9  ;;  %v524_v51 = vrot.slane %v400_v10, 1 }
 0x162   : > { %v1507_v33 = vpop.f32.mrf.mxu3  ;;  %1043 = vmatmul.f32.gmra.mxu2 %v4034_v46  ;;  %v4904_v46 = vrot.slane %v4014_v54, 1  ;;  %v1454_v54 = vld [vmem:[#allocation7 + $0x288] sm:$0xff] }
 0x163   : > { %v4101_v41 = vadd.f32 %v1620_v59, %v1507_v33  ;;  %1670 = vmatmul.f32.gmra.mxu0 %v1258_v3  ;;  %v2227_v3 = vld [vmem:[#allocation7 + $0x308] sm:$0xff]  ;;  %1709 = vmatpush.msra.mxu1 %v1454_v54 }
 0x164   : > { %v520_v59 = vsel %vm455_vm0, %v4904_v46, %v519_v43  ;;  %v2243_v33 = vld [vmem:[#allocation7 + $0x388] sm:$0xff]  ;;  %2288 = vmatpush.msra.mxu2 %v2227_v3  ;;  %v531_v3 = vrot.slane %v3244_v62, 1 }
 0x165   : > { %v4113_v27 = vpop.f32.mrf.mxu2  ;;  %v4115_v12 = vpop.f32.mrf.mxu1  ;;  %2401 = vmatpush.msra.mxu3 %v2243_v33  ;;  %v644_v33 = vrot.slane %v3244_v62, 2 }
 0x167   : > { %1557 = vmatmul.f32.gmra.mxu3 %v1136_v58  ;;  %v1139_v58 = vld [vmem:[#allocation2 + $0x150] sm:$0xff] }
 0x168   : > { %933 = vmatmul.f32.gmra.mxu1 %v520_v59  ;;  %v1626_v15 = vpop.f32.mrf.mxu0  ;;  %v1261_v43 = vrot.slane %v1139_v58, 1 }
 0x16a   : > { %v1510_v29 = vpop.f32.mrf.mxu3  ;;  %1046 = vmatmul.f32.gmra.mxu2 %v633_v0  ;;  %v4134_v0 = vld [vmem:[#allocation2 + $0x170] sm:$0xff]  ;;  %v1263_v4 = vsel %vm455_vm0, %v1261_v43, %v1262_v40 }
 0x16b   : > { %v4126_v34 = vadd.f32 %v1623_v37, %v1510_v29  ;;  %1673 = vmatmul.f32.gmra.mxu0 %v1260_v63  ;;  %v2259_v63 = vld [vmem:[#allocation7 + $0x408] sm:$0xff]  ;;  %v637_v37 = vrot.slane %v400_v10, 2  ;;  %v2226_v10 = vld [vmem:[#allocation7 + $0x300] sm:$0xff] }
 0x16c   : > { %2514 = vmatpush.msra.mxu0 %v2259_v63  ;;  %v1264_v63 = vrot.slane %v1141_v35, 1  ;;  %2289 = vmatpush.msra.mxu2 %v2226_v10  ;;  %v1143_v35 = vld [vmem:[#allocation2 + $0x170] sm:$0xff]  ;;  %v1144_v10 = vld [vmem:[#allocation2 + $0x178] sm:$0x3] }
 0x16d   : > { %v4129_v46 = vpop.f32.mrf.mxu2  ;;  %v4131_v59 = vpop.f32.mrf.mxu1 }
 0x16f   : > { %1560 = vmatmul.f32.gmra.mxu3 %v4083_v24  ;;  %v4906_v24 = vrot.slane %v4134_v0, 1 }
 0x170   : > { %936 = vmatmul.f32.gmra.mxu1 %v4069_v26  ;;  %v1629_v54 = vpop.f32.mrf.mxu0  ;;  %v4907_v26 = vrot.slane %v4134_v0, 2 }
 0x171   : > { %v533_v9 = vsel %vm455_vm0, %v531_v3, %v4906_v24  ;;  %v2242_v3 = vld [vmem:[#allocation7 + $0x380] sm:$0xff] }
 0x172   : > { %v1513_v62 = vpop.f32.mrf.mxu3  ;;  %1049 = vmatmul.f32.gmra.mxu2 %v4074_v47  ;;  %v4151_v43 = vsel %vm568_vm1, %v644_v33, %v4907_v26  ;;  %v525_v47 = vsel %vm455_vm0, %v4908_v48, %v524_v51  ;;  %v1265_v33 = vsel %vm455_vm0, %v1262_v40, %v1264_v63  ;;  %2402 = vmatpush.msra.mxu3 %v2242_v3  ;;  %v1142_v51 = vld [vmem:[#allocation2 + $0x168] sm:$0xff]  ;;  %v2258_v40 = vld [vmem:[#allocation7 + $0x400] sm:$0xff] }
 0x173   : > { %v4143_v29 = vadd.f32 %v1626_v15, %v1513_v62  ;;  %1676 = vmatmul.f32.gmra.mxu0 %v1263_v4  ;;  %v4909_v4 = vrot.slane %v4055_v45, 2  ;;  %v1266_v48 = vrot.slane %v1142_v51, 1  ;;  %v1267_v45 = vrot.slane %v1143_v35, 1 }
 0x174   : > { %2515 = vmatpush.msra.mxu0 %v2258_v40 }
 0x175   : > { %v4153_v2 = vpop.f32.mrf.mxu2  ;;  %v4155_v6 = vpop.f32.mrf.mxu1  ;;  %v638_v15 = vsel %vm568_vm1, %v4909_v4, %v637_v37 }
 0x177   : > { %1563 = vmatmul.f32.gmra.mxu3 %v1139_v58  ;;  %v1453_v58 = vld [vmem:[#allocation7 + $0x280] sm:$0xff] }
 0x178   : > { %939 = vmatmul.f32.gmra.mxu1 %v525_v47  ;;  %v1632_v62 = vpop.f32.mrf.mxu0  ;;  %v403_v47 = vld [vmem:[#allocation2 + $0x160] sm:$0x3] }
 0x179   : > { %1710 = vmatpush.msra.mxu1 %v1453_v58  ;;  %v1269_v58 = vrot.slane %v1144_v10, 1 }
 0x17a   : > { %v1516_v24 = vpop.f32.mrf.mxu3  ;;  %1052 = vmatmul.f32.gmra.mxu2 %v638_v15  ;;  %v529_v15 = vrot.slane %v403_v47, 1 }
 0x17b   : > { %v4164_v26 = vadd.f32 %v1629_v54, %v1516_v24  ;;  %1679 = vmatmul.f32.gmra.mxu0 %v1265_v33  ;;  %v1268_v54 = vsel %vm455_vm0, %v1266_v48, %v1267_v45  ;;  %v642_v24 = vrot.slane %v403_v47, 2  ;;  %v4915_v48 = vrot.slane %v4093_v60, 2 }
 0x17d   : > { %v4166_v37 = vpop.f32.mrf.mxu2  ;;  %v4168_v4 = vpop.f32.mrf.mxu1  ;;  %v643_v40 = vsel %vm568_vm1, %v4915_v48, %v642_v24  ;;  %v1147_v24 = vld [vmem:[#allocation2 + $0x190] sm:$0x3] }
 0x17e   : > { %4910 = vst [vmem:[#allocation37_spill] sm:$0xff] %v4168_v4  ;;  %v1274_v48 = vrot.slane %v1147_v24, 1 }
 0x17f   : > { %1566 = vmatmul.f32.gmra.mxu3 %v4124_v28 }
 0x180   : > { %942 = vmatmul.f32.gmra.mxu1 %v4106_v53  ;;  %v1635_v63 = vpop.f32.mrf.mxu0  ;;  %v4914_v53 = vrot.slane %v4093_v60, 1  ;;  %v406_v60 = vld [vmem:[#allocation2 + $0x178] sm:$0x3] }
 0x182   : > { %v1519_v3 = vpop.f32.mrf.mxu3  ;;  %1055 = vmatmul.f32.gmra.mxu2 %v4111_v39  ;;  %v530_v36 = vsel %vm455_vm0, %v4914_v53, %v529_v15  ;;  %v647_v53 = vrot.slane %v406_v60, 2 }
 0x183   : > { %v4174_v33 = vadd.f32 %v1632_v62, %v1519_v3  ;;  %1682 = vmatmul.f32.gmra.mxu0 %v1268_v54  ;;  %v1270_v62 = vsel %vm455_vm0, %v1267_v45, %v1269_v58  ;;  %v1146_v54 = vld [vmem:[#allocation2 + $0x188] sm:$0xff]  ;;  %v1145_v3 = vld [vmem:[#allocation2 + $0x180] sm:$0xff]  ;;  %v534_v45 = vrot.slane %v406_v60, 1 }
 0x185   : > { %4911 = vst [vmem:[#allocation38_spill] sm:$0xff] %v4174_v33  ;;  %v4176_v4 = vpop.f32.mrf.mxu2  ;;  %v4178_v28 = vpop.f32.mrf.mxu1 }
 0x186   : > { %4912 = vst [vmem:[#allocation39_spill] sm:$0xff] %v4176_v4  ;;  %v1272_v4 = vrot.slane %v1146_v54, 1 }
 0x187   : > { %4913 = vst [vmem:[#allocation40_spill] sm:$0xff] %v4178_v28  ;;  %1569 = vmatmul.f32.gmra.mxu3 %v1142_v51  ;;  %v1271_v28 = vrot.slane %v1145_v3, 1 }
 0x188   : > { %945 = vmatmul.f32.gmra.mxu1 %v530_v36  ;;  %v1638_v39 = vpop.f32.mrf.mxu0 }
 0x189   : > { %v1273_v15 = vsel %vm455_vm0, %v1271_v28, %v1272_v4  ;;  %v4920_v28 = vrot.slane %v4134_v0, 2 }
 0x18a   : > { %v1522_v47 = vpop.f32.mrf.mxu3  ;;  %1058 = vmatmul.f32.gmra.mxu2 %v643_v40 }
 0x18b   : > { %v4187_v10 = vadd.f32 %v1635_v63, %v1522_v47  ;;  %1685 = vmatmul.f32.gmra.mxu0 %v1270_v62  ;;  %v648_v47 = vsel %vm568_vm1, %v4920_v28, %v647_v53  ;;  %v4924_v53 = vrot.slane %v3709_v23, 2  ;;  %v3247_v28 = vld [vmem:[#allocation2 + $0x28] sm:$0x3] }
 0x18d   : > { %v4189_v33 = vpop.f32.mrf.mxu2  ;;  %v4191_v51 = vpop.f32.mrf.mxu1 }
 0x18e   : > { %4916 = vst [vmem:[#allocation41_spill] sm:$0xff] %v4191_v51 }
 0x18f   : > { %1572 = vmatmul.f32.gmra.mxu3 %v1143_v35  ;;  %v4919_v35 = vrot.slane %v4134_v0, 1 }
 0x190   : > { %948 = vmatmul.f32.gmra.mxu1 %v533_v9  ;;  %v1641_v36 = vpop.f32.mrf.mxu0 }
 0x191   : > { %v535_v9 = vsel %vm455_vm0, %v4919_v35, %v534_v45 }
 0x192   : > { %v1525_v58 = vpop.f32.mrf.mxu3  ;;  %1061 = vmatmul.f32.gmra.mxu2 %v4151_v43 }
 0x193   : > { %v4195_v63 = vadd.f32 %v1638_v39, %v1525_v58  ;;  %1688 = vmatmul.f32.gmra.mxu0 %v1273_v15  ;;  %v1275_v39 = vsel %vm455_vm0, %v1272_v4, %v1274_v48  ;;  %v3246_v15 = vld [vmem:[#allocation2 + $0x20] sm:$0xff] }
 0x194   : > { %v1309_v60 = vrot.slane %v3246_v15, 2 }
 0x195   : > { %v4197_v40 = vpop.f32.mrf.mxu2  ;;  %v4199_v62 = vpop.f32.mrf.mxu1 }
 0x196   : > { %4917 = vst [vmem:[#allocation42_spill] sm:$0xff] %v4197_v40  ;;  %v1906_v40 = vld [vmem:[#allocation2 + $0x38] sm:$0xff]  ;;  %v1310_v35 = vsel %vm568_vm1, %v4924_v53, %v1309_v60 }
 0x197   : > { %4918 = vst [vmem:[#allocation43_spill] sm:$0xff] %v4199_v62  ;;  %1575 = vmatmul.f32.gmra.mxu3 %v1145_v3  ;;  %v1905_v62 = vld [vmem:[#allocation2 + $0x30] sm:$0xff]  ;;  %v2114_v45 = vrot.slane %v1906_v40, 2  ;;  %v2002_v48 = vrot.slane %v1906_v40, 1 }
 0x198   : > { %951 = vmatmul.f32.gmra.mxu1 %v535_v9  ;;  %v1644_v43 = vpop.f32.mrf.mxu0  ;;  %v2113_v51 = vrot.slane %v1905_v62, 2  ;;  %v2001_v4 = vrot.slane %v1905_v62, 1 }
 0x19a   : > { %v1528_v24 = vpop.f32.mrf.mxu3  ;;  %1064 = vmatmul.f32.gmra.mxu2 %v648_v47  ;;  %v1311_v47 = vrot.slane %v3247_v28, 2 }
 0x19b   : > { %v4208_v58 = vadd.f32 %v1641_v36, %v1528_v24  ;;  %1691 = vmatmul.f32.gmra.mxu0 %v1275_v39  ;;  %v2115_v36 = vsel %vm568_vm1, %v2113_v51, %v2114_v45  ;;  %v1907_v24 = vld [vmem:[#allocation2 + $0x40] sm:$0x3] }
 0x19c   : > { %v2116_v23 = vrot.slane %v1907_v24, 2  ;;  %v1312_v53 = vsel %vm568_vm1, %v1309_v60, %v1311_v47  ;;  %v2004_v51 = vrot.slane %v1907_v24, 1  ;;  %v4930_v47 = vrot.slane %v3735_v57, 2 }
 0x19d   : > { %4921 = vst [vmem:[#allocation44_spill] sm:$0xff] %v4208_v58  ;;  %v4210_v3 = vpop.f32.mrf.mxu2  ;;  %v4212_v0 = vpop.f32.mrf.mxu1 }
 0x19e   : > { %4922 = vst [vmem:[#allocation45_spill] sm:$0xff] %v4210_v3  ;;  %v2117_v28 = vsel %vm568_vm1, %v2114_v45, %v2116_v23 }
 0x19f   : > { %4923 = vst [vmem:[#allocation46_spill] sm:$0xff] %v4212_v0  ;;  %1578 = vmatmul.f32.gmra.mxu3 %v1146_v54  ;;  %v2003_v0 = vsel %vm455_vm0, %v2001_v4, %v2002_v48  ;;  %v1908_v4 = vld [vmem:[#allocation2 + $0x48] sm:$0xff] }
 0x1a0   : > { %1711 = vmatmul.f32.vlgmr.msra.gmra.mxu1 %v1310_v35  ;;  %v1647_v9 = vpop.f32.mrf.mxu0 }
 0x1a2   : > { %v1531_v39 = vpop.f32.mrf.mxu3  ;;  %2290 = vmatmul.f32.vlgmr.msra.gmra.mxu2 %v1905_v62  ;;  %v3248_v62 = vld [vmem:[#allocation2 + $0x38] sm:$0xff] }
 0x1a3   : > { %v4218_v15 = vadd.f32 %v1644_v43, %v1531_v39  ;;  %2516 = vmatmul.f32.vlgmr.msra.gmra.mxu0 %v2115_v36  ;;  %v1314_v43 = vrot.slane %v3248_v62, 2  ;;  %v1910_v62 = vld [vmem:[#allocation2 + $0x58] sm:$0x3] }
 0x1a4   : > { %v2121_v57 = vrot.slane %v1910_v62, 2 }
 0x1a5   : > { %4925 = vst [vmem:[#allocation47_spill] sm:$0xff] %v4218_v15  ;;  %v4221_v3 = vpop.f32.mrf.mxu2  ;;  %v4223_v54 = vpop.f32.mrf.mxu1  ;;  %v1909_v15 = vld [vmem:[#allocation2 + $0x50] sm:$0xff]  ;;  %v1315_v45 = vsel %vm568_vm1, %v4930_v47, %v1314_v43 }
 0x1a6   : > { %4926 = vst [vmem:[#allocation48_spill] sm:$0xff] %v4221_v3  ;;  %v2005_v3 = vsel %vm455_vm0, %v2002_v48, %v2004_v51  ;;  %v2119_v58 = vrot.slane %v1909_v15, 2 }
 0x1a7   : > { %4927 = vst [vmem:[#allocation49_spill] sm:$0xff] %v4223_v54  ;;  %2403 = vmatmul.f32.vlgmr.msra.gmra.mxu3 %v2003_v0  ;;  %v2118_v54 = vrot.slane %v1908_v4, 2 }
 0x1a8   : > { %1714 = vmatmul.f32.gmra.mxu1 %v1312_v53  ;;  %v1650_v35 = vpop.f32.mrf.mxu0  ;;  %v3249_v53 = vld [vmem:[#allocation2 + $0x40] sm:$0x3] }
 0x1a9   : > { %v2120_v23 = vsel %vm568_vm1, %v2118_v54, %v2119_v58  ;;  %v2009_v54 = vrot.slane %v1910_v62, 1  ;;  %v4936_v62 = vrot.slane %v3754_v22, 2 }
 0x1aa   : > { %v1534_v39 = vpop.f32.mrf.mxu3  ;;  %2293 = vmatmul.f32.gmra.mxu2 %v1906_v40  ;;  %v2006_v40 = vrot.slane %v1908_v4, 1 }
 0x1ab   : > { %v4227_v36 = vadd.f32 %v1647_v9, %v1534_v39  ;;  %2519 = vmatmul.f32.gmra.mxu0 %v2117_v28  ;;  %v2007_v9 = vrot.slane %v1909_v15, 1  ;;  %v1316_v28 = vrot.slane %v3249_v53, 2  ;;  %v2122_v53 = vsel %vm568_vm1, %v2119_v58, %v2121_v57 }
 0x1ad   : > { %v4230_v60 = vpop.f32.mrf.mxu2  ;;  %v4232_v0 = vpop.f32.mrf.mxu1  ;;  %v2008_v39 = vsel %vm455_vm0, %v2006_v40, %v2007_v9  ;;  %v1317_v47 = vsel %vm568_vm1, %v1314_v43, %v1316_v28  ;;  %v1911_v40 = vld [vmem:[#allocation2 + $0x60] sm:$0xff] }
 0x1ae   : > { %4928 = vst [vmem:[#allocation50_spill] sm:$0xff] %v4230_v60 }
 0x1af   : > { %4929 = vst [vmem:[#allocation51_spill] sm:$0xff] %v4232_v0  ;;  %2406 = vmatmul.f32.gmra.mxu3 %v2005_v3 }
 0x1b0   : > { %1717 = vmatmul.f32.gmra.mxu1 %v1315_v45  ;;  %v1653_v24 = vpop.f32.mrf.mxu0 }
 0x1b2   : > { %v1537_v48 = vpop.f32.mrf.mxu3  ;;  %2296 = vmatmul.f32.gmra.mxu2 %v1908_v4  ;;  %v3250_v4 = vld [vmem:[#allocation2 + $0x50] sm:$0xff] }
 0x1b3   : > { %v4238_v51 = vadd.f32 %v1650_v35, %v1537_v48  ;;  %2522 = vmatmul.f32.gmra.mxu0 %v2120_v23  ;;  %v1319_v35 = vrot.slane %v3250_v4, 2  ;;  %v1913_v4 = vld [vmem:[#allocation2 + $0x70] sm:$0x3] }
 0x1b4   : > { %v2126_v22 = vrot.slane %v1913_v4, 2 }
 0x1b5   : > { %4931 = vst [vmem:[#allocation52_spill] sm:$0xff] %v4238_v51  ;;  %v4241_v0 = vpop.f32.mrf.mxu2  ;;  %v4243_v3 = vpop.f32.mrf.mxu1  ;;  %v1912_v51 = vld [vmem:[#allocation2 + $0x68] sm:$0xff]  ;;  %v1320_v58 = vsel %vm568_vm1, %v4936_v62, %v1319_v35 }
 0x1b6   : > { %4932 = vst [vmem:[#allocation53_spill] sm:$0xff] %v4241_v0  ;;  %v2010_v0 = vsel %vm455_vm0, %v2007_v9, %v2009_v54  ;;  %v2124_v60 = vrot.slane %v1912_v51, 2 }
 0x1b7   : > { %4933 = vst [vmem:[#allocation54_spill] sm:$0xff] %v4243_v3  ;;  %2409 = vmatmul.f32.gmra.mxu3 %v2008_v39  ;;  %v2123_v3 = vrot.slane %v1911_v40, 2 }
 0x1b8   : > { %1720 = vmatmul.f32.gmra.mxu1 %v1317_v47  ;;  %v1656_v45 = vpop.f32.mrf.mxu0  ;;  %v3251_v47 = vld [vmem:[#allocation2 + $0x58] sm:$0x3] }
 0x1b9   : > { %v2125_v57 = vsel %vm568_vm1, %v2123_v3, %v2124_v60  ;;  %v2014_v3 = vrot.slane %v1913_v4, 1  ;;  %v4942_v4 = vrot.slane %v3660_v18, 2 }
 0x1ba   : > { %v1540_v48 = vpop.f32.mrf.mxu3  ;;  %2299 = vmatmul.f32.gmra.mxu2 %v1909_v15  ;;  %v2011_v15 = vrot.slane %v1911_v40, 1 }
 0x1bb   : > { %v4247_v23 = vadd.f32 %v1653_v24, %v1540_v48  ;;  %2525 = vmatmul.f32.gmra.mxu0 %v2122_v53  ;;  %v2012_v24 = vrot.slane %v1912_v51, 1  ;;  %v1321_v53 = vrot.slane %v3251_v47, 2  ;;  %v2127_v47 = vsel %vm568_vm1, %v2124_v60, %v2126_v22 }
 0x1bd   : > { %v4250_v43 = vpop.f32.mrf.mxu2  ;;  %v4252_v28 = vpop.f32.mrf.mxu1  ;;  %v2013_v48 = vsel %vm455_vm0, %v2011_v15, %v2012_v24  ;;  %v1322_v62 = vsel %vm568_vm1, %v1319_v35, %v1321_v53  ;;  %v1914_v15 = vld [vmem:[#allocation2 + $0x78] sm:$0xff] }
 0x1be   : > { %4934 = vst [vmem:[#allocation55_spill] sm:$0xff] %v4250_v43 }
 0x1bf   : > { %4935 = vst [vmem:[#allocation56_spill] sm:$0xff] %v4252_v28  ;;  %2412 = vmatmul.f32.gmra.mxu3 %v2010_v0 }
 0x1c0   : > { %1723 = vmatmul.f32.gmra.mxu1 %v1320_v58  ;;  %v1659_v39 = vpop.f32.mrf.mxu0 }
 0x1c2   : > { %v1543_v9 = vpop.f32.mrf.mxu3  ;;  %2302 = vmatmul.f32.gmra.mxu2 %v1911_v40  ;;  %v3252_v40 = vld [vmem:[#allocation2 + $0x68] sm:$0xff] }
 0x1c3   : > { %v4258_v54 = vadd.f32 %v1656_v45, %v1543_v9  ;;  %2528 = vmatmul.f32.gmra.mxu0 %v2125_v57  ;;  %v1324_v45 = vrot.slane %v3252_v40, 2  ;;  %v1916_v40 = vld [vmem:[#allocation2 + $0x88] sm:$0x3] }
 0x1c4   : > { %v2131_v18 = vrot.slane %v1916_v40, 2 }
 0x1c5   : > { %4937 = vst [vmem:[#allocation57_spill] sm:$0xff] %v4258_v54  ;;  %v4261_v28 = vpop.f32.mrf.mxu2  ;;  %v4263_v0 = vpop.f32.mrf.mxu1  ;;  %v1915_v54 = vld [vmem:[#allocation2 + $0x80] sm:$0xff]  ;;  %v1325_v60 = vsel %vm568_vm1, %v4942_v4, %v1324_v45 }
 0x1c6   : > { %4938 = vst [vmem:[#allocation58_spill] sm:$0xff] %v4261_v28  ;;  %v2015_v28 = vsel %vm455_vm0, %v2012_v24, %v2014_v3  ;;  %v2129_v43 = vrot.slane %v1915_v54, 2 }
 0x1c7   : > { %4939 = vst [vmem:[#allocation59_spill] sm:$0xff] %v4263_v0  ;;  %2415 = vmatmul.f32.gmra.mxu3 %v2013_v48  ;;  %v2128_v0 = vrot.slane %v1914_v15, 2 }
 0x1c8   : > { %1726 = vmatmul.f32.gmra.mxu1 %v1322_v62  ;;  %v1662_v58 = vpop.f32.mrf.mxu0  ;;  %v3253_v62 = vld [vmem:[#allocation2 + $0x70] sm:$0x3] }
 0x1c9   : > { %v2130_v22 = vsel %vm568_vm1, %v2128_v0, %v2129_v43  ;;  %v2019_v0 = vrot.slane %v1916_v40, 1  ;;  %v4948_v40 = vrot.slane %v3702_v16, 2 }
 0x1ca   : > { %v1546_v9 = vpop.f32.mrf.mxu3  ;;  %2305 = vmatmul.f32.gmra.mxu2 %v1912_v51  ;;  %v2016_v51 = vrot.slane %v1914_v15, 1 }
 0x1cb   : > { %v4267_v57 = vadd.f32 %v1659_v39, %v1546_v9  ;;  %2531 = vmatmul.f32.gmra.mxu0 %v2127_v47  ;;  %v2017_v39 = vrot.slane %v1915_v54, 1  ;;  %v1326_v47 = vrot.slane %v3253_v62, 2  ;;  %v2132_v62 = vsel %vm568_vm1, %v2129_v43, %v2131_v18 }
 0x1cd   : > { %v4270_v35 = vpop.f32.mrf.mxu2  ;;  %v4272_v53 = vpop.f32.mrf.mxu1  ;;  %v2018_v9 = vsel %vm455_vm0, %v2016_v51, %v2017_v39  ;;  %v1327_v4 = vsel %vm568_vm1, %v1324_v45, %v1326_v47  ;;  %v1917_v51 = vld [vmem:[#allocation2 + $0x90] sm:$0xff] }
 0x1ce   : > { %4940 = vst [vmem:[#allocation60_spill] sm:$0xff] %v4270_v35 }
 0x1cf   : > { %4941 = vst [vmem:[#allocation61_spill] sm:$0xff] %v4272_v53  ;;  %2418 = vmatmul.f32.gmra.mxu3 %v2015_v28 }
 0x1d0   : > { %1729 = vmatmul.f32.gmra.mxu1 %v1325_v60  ;;  %v1665_v48 = vpop.f32.mrf.mxu0 }
 0x1d2   : > { %v1549_v24 = vpop.f32.mrf.mxu3  ;;  %2308 = vmatmul.f32.gmra.mxu2 %v1914_v15  ;;  %v3254_v15 = vld [vmem:[#allocation2 + $0x80] sm:$0xff] }
 0x1d3   : > { %v4278_v3 = vadd.f32 %v1662_v58, %v1549_v24  ;;  %2534 = vmatmul.f32.gmra.mxu0 %v2130_v22  ;;  %v1329_v58 = vrot.slane %v3254_v15, 2  ;;  %v1919_v15 = vld [vmem:[#allocation2 + $0xa0] sm:$0x3] }
 0x1d4   : > { %v2136_v16 = vrot.slane %v1919_v15, 2 }
 0x1d5   : > { %4943 = vst [vmem:[#allocation62_spill] sm:$0xff] %v4278_v3  ;;  %v4281_v53 = vpop.f32.mrf.mxu2  ;;  %v4283_v28 = vpop.f32.mrf.mxu1  ;;  %v1918_v3 = vld [vmem:[#allocation2 + $0x98] sm:$0xff]  ;;  %v1330_v43 = vsel %vm568_vm1, %v4948_v40, %v1329_v58 }
 0x1d6   : > { %4944 = vst [vmem:[#allocation63_spill] sm:$0xff] %v4281_v53  ;;  %v2020_v53 = vsel %vm455_vm0, %v2017_v39, %v2019_v0  ;;  %v2134_v35 = vrot.slane %v1918_v3, 2 }
 0x1d7   : > { %4945 = vst [vmem:[#allocation64_spill] sm:$0xff] %v4283_v28  ;;  %2421 = vmatmul.f32.gmra.mxu3 %v2018_v9  ;;  %v2133_v28 = vrot.slane %v1917_v51, 2 }
 0x1d8   : > { %1732 = vmatmul.f32.gmra.mxu1 %v1327_v4  ;;  %v1668_v60 = vpop.f32.mrf.mxu0  ;;  %v3255_v4 = vld [vmem:[#allocation2 + $0x88] sm:$0x3] }
 0x1d9   : > { %v2135_v18 = vsel %vm568_vm1, %v2133_v28, %v2134_v35  ;;  %v2024_v28 = vrot.slane %v1919_v15, 1  ;;  %v4954_v15 = vrot.slane %v3731_v55, 2 }
 0x1da   : > { %v1552_v24 = vpop.f32.mrf.mxu3  ;;  %2311 = vmatmul.f32.gmra.mxu2 %v1915_v54  ;;  %v2021_v54 = vrot.slane %v1917_v51, 1 }
 0x1db   : > { %v4287_v22 = vadd.f32 %v1665_v48, %v1552_v24  ;;  %2537 = vmatmul.f32.gmra.mxu0 %v2132_v62  ;;  %v2022_v48 = vrot.slane %v1918_v3, 1  ;;  %v1331_v62 = vrot.slane %v3255_v4, 2  ;;  %v2137_v4 = vsel %vm568_vm1, %v2134_v35, %v2136_v16 }
 0x1dd   : > { %v4290_v45 = vpop.f32.mrf.mxu2  ;;  %v4292_v47 = vpop.f32.mrf.mxu1  ;;  %v2023_v24 = vsel %vm455_vm0, %v2021_v54, %v2022_v48  ;;  %v1332_v40 = vsel %vm568_vm1, %v1329_v58, %v1331_v62  ;;  %v1920_v54 = vld [vmem:[#allocation2 + $0xa8] sm:$0xff] }
 0x1de   : > { %4946 = vst [vmem:[#allocation65_spill] sm:$0xff] %v4290_v45 }
 0x1df   : > { %4947 = vst [vmem:[#allocation66_spill] sm:$0xff] %v4292_v47  ;;  %2424 = vmatmul.f32.gmra.mxu3 %v2020_v53 }
 0x1e0   : > { %1735 = vmatmul.f32.gmra.mxu1 %v1330_v43  ;;  %v1671_v9 = vpop.f32.mrf.mxu0 }
 0x1e2   : > { %v1555_v39 = vpop.f32.mrf.mxu3  ;;  %2314 = vmatmul.f32.gmra.mxu2 %v1917_v51  ;;  %v3256_v51 = vld [vmem:[#allocation2 + $0x98] sm:$0xff] }
 0x1e3   : > { %v4298_v0 = vadd.f32 %v1668_v60, %v1555_v39  ;;  %2540 = vmatmul.f32.gmra.mxu0 %v2135_v18  ;;  %v1334_v60 = vrot.slane %v3256_v51, 2  ;;  %v1922_v51 = vld [vmem:[#allocation2 + $0xb8] sm:$0x3] }
 0x1e4   : > { %v2141_v55 = vrot.slane %v1922_v51, 2 }
 0x1e5   : > { %4949 = vst [vmem:[#allocation67_spill] sm:$0xff] %v4298_v0  ;;  %v4301_v47 = vpop.f32.mrf.mxu2  ;;  %v4303_v53 = vpop.f32.mrf.mxu1  ;;  %v1921_v0 = vld [vmem:[#allocation2 + $0xb0] sm:$0xff]  ;;  %v1335_v35 = vsel %vm568_vm1, %v4954_v15, %v1334_v60 }
 0x1e6   : > { %4950 = vst [vmem:[#allocation68_spill] sm:$0xff] %v4301_v47  ;;  %v2025_v47 = vsel %vm455_vm0, %v2022_v48, %v2024_v28  ;;  %v2139_v45 = vrot.slane %v1921_v0, 2 }
 0x1e7   : > { %4951 = vst [vmem:[#allocation69_spill] sm:$0xff] %v4303_v53  ;;  %2427 = vmatmul.f32.gmra.mxu3 %v2023_v24  ;;  %v2138_v53 = vrot.slane %v1920_v54, 2 }
 0x1e8   : > { %1738 = vmatmul.f32.gmra.mxu1 %v1332_v40  ;;  %v1674_v43 = vpop.f32.mrf.mxu0  ;;  %v3257_v40 = vld [vmem:[#allocation2 + $0xa0] sm:$0x3] }
 0x1e9   : > { %v2140_v16 = vsel %vm568_vm1, %v2138_v53, %v2139_v45  ;;  %v2029_v53 = vrot.slane %v1922_v51, 1  ;;  %v4960_v51 = vrot.slane %v3749_v17, 2 }
 0x1ea   : > { %v1558_v39 = vpop.f32.mrf.mxu3  ;;  %2317 = vmatmul.f32.gmra.mxu2 %v1918_v3  ;;  %v2026_v3 = vrot.slane %v1920_v54, 1 }
 0x1eb   : > { %v4307_v18 = vadd.f32 %v1671_v9, %v1558_v39  ;;  %2543 = vmatmul.f32.gmra.mxu0 %v2137_v4  ;;  %v2027_v9 = vrot.slane %v1921_v0, 1  ;;  %v1336_v4 = vrot.slane %v3257_v40, 2  ;;  %v2142_v40 = vsel %vm568_vm1, %v2139_v45, %v2141_v55 }
 0x1ed   : > { %v4310_v58 = vpop.f32.mrf.mxu2  ;;  %v4312_v62 = vpop.f32.mrf.mxu1  ;;  %v2028_v39 = vsel %vm455_vm0, %v2026_v3, %v2027_v9  ;;  %v1337_v15 = vsel %vm568_vm1, %v1334_v60, %v1336_v4  ;;  %v1923_v3 = vld [vmem:[#allocation2 + $0xc0] sm:$0xff] }
 0x1ee   : > { %4952 = vst [vmem:[#allocation70_spill] sm:$0xff] %v4310_v58 }
 0x1ef   : > { %4953 = vst [vmem:[#allocation71_spill] sm:$0xff] %v4312_v62  ;;  %2430 = vmatmul.f32.gmra.mxu3 %v2025_v47 }
 0x1f0   : > { %1741 = vmatmul.f32.gmra.mxu1 %v1335_v35  ;;  %v1677_v24 = vpop.f32.mrf.mxu0 }
 0x1f2   : > { %v1561_v48 = vpop.f32.mrf.mxu3  ;;  %2320 = vmatmul.f32.gmra.mxu2 %v1920_v54  ;;  %v3258_v54 = vld [vmem:[#allocation2 + $0xb0] sm:$0xff] }
 0x1f3   : > { %v4318_v28 = vadd.f32 %v1674_v43, %v1561_v48  ;;  %2546 = vmatmul.f32.gmra.mxu0 %v2140_v16  ;;  %v1339_v43 = vrot.slane %v3258_v54, 2  ;;  %v1925_v54 = vld [vmem:[#allocation2 + $0xd0] sm:$0x3] }
 0x1f4   : > { %v2146_v17 = vrot.slane %v1925_v54, 2 }
 0x1f5   : > { %4955 = vst [vmem:[#allocation72_spill] sm:$0xff] %v4318_v28  ;;  %v4321_v62 = vpop.f32.mrf.mxu2  ;;  %v4323_v47 = vpop.f32.mrf.mxu1  ;;  %v1924_v28 = vld [vmem:[#allocation2 + $0xc8] sm:$0xff]  ;;  %v1340_v45 = vsel %vm568_vm1, %v4960_v51, %v1339_v43 }
 0x1f6   : > { %4956 = vst [vmem:[#allocation73_spill] sm:$0xff] %v4321_v62  ;;  %v2030_v62 = vsel %vm455_vm0, %v2027_v9, %v2029_v53  ;;  %v2144_v58 = vrot.slane %v1924_v28, 2 }
 0x1f7   : > { %4957 = vst [vmem:[#allocation74_spill] sm:$0xff] %v4323_v47  ;;  %2433 = vmatmul.f32.gmra.mxu3 %v2028_v39  ;;  %v2143_v47 = vrot.slane %v1923_v3, 2 }
 0x1f8   : > { %1744 = vmatmul.f32.gmra.mxu1 %v1337_v15  ;;  %v1680_v35 = vpop.f32.mrf.mxu0  ;;  %v3259_v15 = vld [vmem:[#allocation2 + $0xb8] sm:$0x3] }
 0x1f9   : > { %v2145_v55 = vsel %vm568_vm1, %v2143_v47, %v2144_v58  ;;  %v2034_v47 = vrot.slane %v1925_v54, 1 }
 0x1fa   : > { %v1564_v48 = vpop.f32.mrf.mxu3  ;;  %2323 = vmatmul.f32.gmra.mxu2 %v1921_v0  ;;  %v2031_v0 = vrot.slane %v1923_v3, 1 }
 0x1fb   : > { %v4327_v16 = vadd.f32 %v1677_v24, %v1564_v48  ;;  %2549 = vmatmul.f32.gmra.mxu0 %v2142_v40  ;;  %v2032_v24 = vrot.slane %v1924_v28, 1  ;;  %v1341_v40 = vrot.slane %v3259_v15, 2  ;;  %v2147_v15 = vsel %vm568_vm1, %v2144_v58, %v2146_v17 }
 0x1fd   : > { %v4330_v60 = vpop.f32.mrf.mxu2  ;;  %v4332_v4 = vpop.f32.mrf.mxu1  ;;  %v2033_v48 = vsel %vm455_vm0, %v2031_v0, %v2032_v24  ;;  %v1342_v51 = vsel %vm568_vm1, %v1339_v43, %v1341_v40 }
 0x1fe   : > { %4958 = vst [vmem:[#allocation75_spill] sm:$0xff] %v4330_v60  ;;  %v1926_v60 = vld [vmem:[#allocation2 + $0xd8] sm:$0xff] }
 0x1ff   : > { %4959 = vst [vmem:[#allocation76_spill] sm:$0xff] %v4332_v4  ;;  %2436 = vmatmul.f32.gmra.mxu3 %v2030_v62  ;;  %v2148_v43 = vrot.slane %v1926_v60, 2  ;;  %v2036_v17 = vrot.slane %v1926_v60, 1 }
 0x200   : > { %1747 = vmatmul.f32.gmra.mxu1 %v1340_v45  ;;  %v1683_v39 = vpop.f32.mrf.mxu0 }
 0x202   : > { %v1567_v9 = vpop.f32.mrf.mxu3  ;;  %2326 = vmatmul.f32.gmra.mxu2 %v1923_v3  ;;  %v3260_v3 = vld [vmem:[#allocation2 + $0xc0] sm:$0xff] }
 0x203   : > { %v4338_v53 = vadd.f32 %v1680_v35, %v1567_v9  ;;  %2552 = vmatmul.f32.gmra.mxu0 %v2145_v55  ;;  %v1343_v35 = vrot.slane %v3260_v3, 2  ;;  %v3261_v9 = vld [vmem:[#allocation2 + $0xc8] sm:$0xff]  ;;  %v3262_v3 = vld [vmem:[#allocation2 + $0xd0] sm:$0x3] }
 0x205   : > { %4961 = vst [vmem:[#allocation77_spill] sm:$0xff] %v4338_v53  ;;  %v4341_v4 = vpop.f32.mrf.mxu2  ;;  %v4343_v62 = vpop.f32.mrf.mxu1  ;;  %v1344_v53 = vrot.slane %v3261_v9, 2  ;;  %v1346_v9 = vrot.slane %v3262_v3, 2 }
 0x206   : > { %4962 = vst [vmem:[#allocation78_spill] sm:$0xff] %v4341_v4  ;;  %v1927_v4 = vld [vmem:[#allocation2 + $0xe0] sm:$0xff] }
 0x207   : > { %4963 = vst [vmem:[#allocation79_spill] sm:$0xff] %v4343_v62  ;;  %2439 = vmatmul.f32.gmra.mxu3 %v2033_v48  ;;  %v2035_v62 = vsel %vm455_vm0, %v2032_v24, %v2034_v47  ;;  %v2149_v40 = vrot.slane %v1927_v4, 2  ;;  %v1345_v58 = vsel %vm568_vm1, %v1343_v35, %v1344_v53  ;;  %v1928_v47 = vld [vmem:[#allocation2 + $0xe8] sm:$0x3]  ;;  %v1347_v35 = vsel %vm568_vm1, %v1344_v53, %v1346_v9 }
 0x208   : > { %1750 = vmatmul.f32.gmra.mxu1 %v1342_v51  ;;  %v1686_v45 = vpop.f32.mrf.mxu0  ;;  %v2037_v51 = vrot.slane %v1927_v4, 1 }
 0x20a   : > { %v1570_v55 = vpop.f32.mrf.mxu3  ;;  %2329 = vmatmul.f32.gmra.mxu2 %v1924_v28 }
 0x20b   : > { %v4347_v0 = vadd.f32 %v1683_v39, %v1570_v55  ;;  %2555 = vmatmul.f32.gmra.mxu0 %v2147_v15  ;;  %v2150_v39 = vsel %vm568_vm1, %v2148_v43, %v2149_v40  ;;  %v2038_v55 = vsel %vm455_vm0, %v2036_v17, %v2037_v51  ;;  %v2039_v43 = vrot.slane %v1928_v47, 1 }
 0x20d   : > { %4964 = vst [vmem:[#allocation80_spill] sm:$0xff] %v4347_v0  ;;  %v4350_v48 = vpop.f32.mrf.mxu2  ;;  %v4352_v54 = vpop.f32.mrf.mxu1  ;;  %v1929_v0 = vld [vmem:[#allocation2 + $0xf0] sm:$0xff] }
 0x20e   : > { %4965 = vst [vmem:[#allocation81_spill] sm:$0xff] %v4350_v48  ;;  %v2153_v53 = vrot.slane %v1929_v0, 2 }
 0x20f   : > { %4966 = vst [vmem:[#allocation82_spill] sm:$0xff] %v4352_v54  ;;  %2442 = vmatmul.f32.gmra.mxu3 %v2035_v62  ;;  %v2151_v54 = vrot.slane %v1928_v47, 2 }
 0x210   : > { %1753 = vmatmul.f32.gmra.mxu1 %v1345_v58  ;;  %v1689_v28 = vpop.f32.mrf.mxu0 }
 0x211   : > { %v2152_v3 = vsel %vm568_vm1, %v2149_v40, %v2151_v54 }
 0x212   : > { %v1573_v15 = vpop.f32.mrf.mxu3  ;;  %2332 = vmatmul.f32.gmra.mxu2 %v1926_v60  ;;  %v3263_v60 = vld [vmem:[#allocation2 + $0xd8] sm:$0xff] }
 0x213   : > { %v4356_v24 = vadd.f32 %v1686_v45, %v1573_v15  ;;  %2558 = vmatmul.f32.gmra.mxu0 %v2150_v39  ;;  %v1348_v45 = vrot.slane %v3263_v60, 2  ;;  %v3264_v15 = vld [vmem:[#allocation2 + $0xe0] sm:$0xff] }
 0x215   : > { %4967 = vst [vmem:[#allocation83_spill] sm:$0xff] %v4356_v24  ;;  %v4359_v48 = vpop.f32.mrf.mxu2  ;;  %v4361_v62 = vpop.f32.mrf.mxu1  ;;  %v1349_v24 = vrot.slane %v3264_v15, 2  ;;  %v3265_v15 = vld [vmem:[#allocation2 + $0xe8] sm:$0x3] }
 0x216   : > { %4968 = vst [vmem:[#allocation84_spill] sm:$0xff] %v4359_v48  ;;  %v1930_v48 = vld [vmem:[#allocation2 + $0xf8] sm:$0xff] }
 0x217   : > { %4969 = vst [vmem:[#allocation85_spill] sm:$0xff] %v4361_v62  ;;  %2445 = vmatmul.f32.gmra.mxu3 %v2038_v55  ;;  %v2040_v62 = vsel %vm455_vm0, %v2037_v51, %v2039_v43  ;;  %v2154_v9 = vrot.slane %v1930_v48, 2  ;;  %v1350_v40 = vsel %vm568_vm1, %v1348_v45, %v1349_v24  ;;  %v1351_v51 = vrot.slane %v3265_v15, 2 }
 0x218   : > { %1756 = vmatmul.f32.gmra.mxu1 %v1347_v35  ;;  %v1692_v58 = vpop.f32.mrf.mxu0 }
 0x21a   : > { %v1576_v39 = vpop.f32.mrf.mxu3  ;;  %2335 = vmatmul.f32.gmra.mxu2 %v1927_v4  ;;  %v2041_v4 = vrot.slane %v1929_v0, 1 }
 0x21b   : > { %v4365_v17 = vadd.f32 %v1689_v28, %v1576_v39  ;;  %2561 = vmatmul.f32.gmra.mxu0 %v2152_v3  ;;  %v2042_v28 = vrot.slane %v1930_v48, 1  ;;  %v2155_v3 = vsel %vm568_vm1, %v2153_v53, %v2154_v9 }
 0x21d   : > { %4970 = vst [vmem:[#allocation86_spill] sm:$0xff] %v4365_v17  ;;  %v4368_v55 = vpop.f32.mrf.mxu2  ;;  %v1712_v47 = vpop.f32.mrf.mxu1  ;;  %v2043_v45 = vsel %vm455_vm0, %v2041_v4, %v2042_v28  ;;  %v1933_v17 = vld [vmem:[#allocation2 + $0x110] sm:$0xff] }
 0x21e   : > { %4971 = vst [vmem:[#allocation87_spill] sm:$0xff] %v4368_v55  ;;  %v1713_v54 = vadd.f32 %v1712_v47, %v3977_v1  ;;  %v1931_v55 = vld [vmem:[#allocation2 + $0x100] sm:$0x3] }
 0x21f   : > { %2448 = vmatmul.f32.gmra.mxu3 %v2040_v62  ;;  %v2156_v1 = vrot.slane %v1931_v55, 2 }
 0x220   : > { %v1840_v35 = vadd.f32 %v1713_v54, %v3967_v30  ;;  %1759 = vmatmul.f32.gmra.mxu1 %v1350_v40  ;;  %v2517_v60 = vpop.f32.mrf.mxu0  ;;  %v1352_v30 = vsel %vm568_vm1, %v1349_v24, %v1351_v51  ;;  %v2044_v54 = vrot.slane %v1931_v55, 1  ;;  %v2159_v51 = vrot.slane %v1933_v17, 2 }
 0x221   : > { %v4973_v55 = vrot.slane %v3733_v56, 2  ;;  %v3267_v56 = vld [vmem:[#allocation2 + $0x100] sm:$0x3] }
 0x222   : > { %v1579_v43 = vpop.f32.mrf.mxu3  ;;  %2338 = vmatmul.f32.gmra.mxu2 %v1929_v0  ;;  %v2157_v0 = vsel %vm568_vm1, %v2154_v9, %v2156_v1  ;;  %v2045_v24 = vsel %vm455_vm0, %v2042_v28, %v2044_v54  ;;  %v2047_v28 = vrot.slane %v1933_v17, 1 }
 0x223   : > { %v4374_v39 = vadd.f32 %v1692_v58, %v1579_v43  ;;  %2564 = vmatmul.f32.gmra.mxu0 %v2155_v3  ;;  %v3266_v58 = vld [vmem:[#allocation2 + $0xf8] sm:$0xff] }
 0x224   : > { %v1354_v43 = vrot.slane %v3266_v58, 2 }
 0x225   : > { %4972 = vst [vmem:[#allocation88_spill] sm:$0xff] %v4374_v39  ;;  %v2291_v62 = vpop.f32.mrf.mxu2  ;;  %v1715_v47 = vpop.f32.mrf.mxu1  ;;  %v1932_v39 = vld [vmem:[#allocation2 + $0x108] sm:$0xff] }
 0x226   : > { %v1716_v40 = vadd.f32 %v1715_v47, %v3992_v50  ;;  %v2158_v50 = vrot.slane %v1932_v39, 2  ;;  %v1355_v9 = vsel %vm568_vm1, %v4973_v55, %v1354_v43 }
 0x227   : > { %2451 = vmatmul.f32.gmra.mxu3 %v2043_v45 }
 0x228   : > { %v1841_v53 = vadd.f32 %v1716_v40, %v3986_v20  ;;  %1762 = vmatmul.f32.gmra.mxu1 %v1352_v30  ;;  %v2520_v15 = vpop.f32.mrf.mxu0  ;;  %v2160_v54 = vsel %vm568_vm1, %v2158_v50, %v2159_v51 }
 0x22a   : > { %v2404_v3 = vpop.f32.mrf.mxu3  ;;  %2341 = vmatmul.f32.gmra.mxu2 %v1930_v48 }
 0x22b   : > { %v2405_v4 = vadd.f32 %v2404_v3, %v2291_v62  ;;  %2567 = vmatmul.f32.gmra.mxu0 %v2157_v0  ;;  %v2046_v62 = vrot.slane %v1932_v39, 1  ;;  %v1934_v0 = vld [vmem:[#allocation2 + $0x118] sm:$0x3] }
 0x22c   : > { %v2161_v58 = vrot.slane %v1934_v0, 2 }
 0x22d   : > { %v2518_v45 = vadd.f32 %v2517_v60, %v2405_v4  ;;  %v2294_v20 = vpop.f32.mrf.mxu2  ;;  %v1718_v47 = vpop.f32.mrf.mxu1  ;;  %v1356_v60 = vrot.slane %v3267_v56, 2  ;;  %v1936_v56 = vld [vmem:[#allocation2 + $0x128] sm:$0xff] }
 0x22e   : > { %v1719_v1 = vadd.f32 %v1718_v47, %v4005_v42 }
 0x22f   : > { %v4386_v30 = vadd.f32 %v2518_v45, %v1840_v35  ;;  %2454 = vmatmul.f32.gmra.mxu3 %v2045_v24  ;;  %v1357_v50 = vsel %vm568_vm1, %v1354_v43, %v1356_v60  ;;  %v1935_v43 = vld [vmem:[#allocation2 + $0x120] sm:$0xff] }
 0x230   : > { %v1842_v48 = vadd.f32 %v1719_v1, %v3997_v38  ;;  %1765 = vmatmul.f32.gmra.mxu1 %v1355_v9  ;;  %v2523_v40 = vpop.f32.mrf.mxu0  ;;  %v2048_v38 = vsel %vm455_vm0, %v2046_v62, %v2047_v28  ;;  %v2162_v9 = vsel %vm568_vm1, %v2159_v51, %v2161_v58  ;;  %v3268_v1 = vld [vmem:[#allocation2 + $0x110] sm:$0xff]  ;;  %v4974_v51 = vrot.slane %v3751_v19, 2 }
 0x231   : > { %2741 = vst [vmem:[%s4392_s21] sm:$0xff] %v4386_v30 }
 0x232   : > { %v2407_v42 = vpop.f32.mrf.mxu3  ;;  %2344 = vmatmul.f32.gmra.mxu2 %v1932_v39  ;;  %v2049_v39 = vrot.slane %v1934_v0, 1 }
 0x233   : > { %v2408_v35 = vadd.f32 %v2407_v42, %v2294_v20  ;;  %2570 = vmatmul.f32.gmra.mxu0 %v2160_v54 }
 0x235   : > { %v2521_v3 = vadd.f32 %v2520_v15, %v2408_v35  ;;  %v2297_v4 = vpop.f32.mrf.mxu2  ;;  %v1721_v24 = vpop.f32.mrf.mxu1  ;;  %v1359_v15 = vrot.slane %v3268_v1, 2 }
 0x236   : > { %v1722_v45 = vadd.f32 %v1721_v24, %v4024_v7  ;;  %v2050_v7 = vsel %vm455_vm0, %v2047_v28, %v2049_v39  ;;  %v2052_v28 = vrot.slane %v1936_v56, 1  ;;  %v1937_v39 = vld [vmem:[#allocation2 + $0x130] sm:$0x3] }
 0x237   : > { %v4399_v47 = vadd.f32 %v2521_v3, %v1841_v53  ;;  %2457 = vmatmul.f32.gmra.mxu3 %v2048_v38  ;;  %v2163_v53 = vrot.slane %v1935_v43, 2  ;;  %v1360_v0 = vsel %vm568_vm1, %v4974_v51, %v1359_v15  ;;  %v2051_v3 = vrot.slane %v1935_v43, 1 }
 0x238   : > { %v1843_v55 = vadd.f32 %v1722_v45, %v4012_v49  ;;  %1768 = vmatmul.f32.gmra.mxu1 %v1357_v50  ;;  %v2526_v20 = vpop.f32.mrf.mxu0  ;;  %v2164_v49 = vrot.slane %v1936_v56, 2 }
 0x239   : > { %2742 = vst [vmem:[%s4392_s21 + $0x8] sm:$0xff] %v4399_v47 }
 0x23a   : > { %v2410_v62 = vpop.f32.mrf.mxu3  ;;  %2347 = vmatmul.f32.gmra.mxu2 %v1933_v17  ;;  %v2165_v24 = vsel %vm568_vm1, %v2163_v53, %v2164_v49 }
 0x23b   : > { %v2411_v54 = vadd.f32 %v2410_v62, %v2297_v4  ;;  %2573 = vmatmul.f32.gmra.mxu0 %v2162_v9 }
 0x23d   : > { %v2524_v60 = vadd.f32 %v2523_v40, %v2411_v54  ;;  %v2300_v42 = vpop.f32.mrf.mxu2  ;;  %v1724_v35 = vpop.f32.mrf.mxu1  ;;  %v3269_v40 = vld [vmem:[#allocation2 + $0x118] sm:$0x3] }
 0x23e   : > { %v1725_v38 = vadd.f32 %v1724_v35, %v4049_v44  ;;  %v1361_v50 = vrot.slane %v3269_v40, 2  ;;  %v2053_v44 = vsel %vm455_vm0, %v2051_v3, %v2052_v28  ;;  %v3270_v35 = vld [vmem:[#allocation2 + $0x120] sm:$0xff] }
 0x23f   : > { %v4410_v58 = vadd.f32 %v2524_v60, %v1842_v48  ;;  %2460 = vmatmul.f32.gmra.mxu3 %v2050_v7  ;;  %v2166_v48 = vrot.slane %v1937_v39, 2  ;;  %v1363_v51 = vrot.slane %v3270_v35, 2 }
 0x240   : > { %v1844_v17 = vadd.f32 %v1725_v38, %v4039_v32  ;;  %1771 = vmatmul.f32.gmra.mxu1 %v1360_v0  ;;  %v2529_v4 = vpop.f32.mrf.mxu0  ;;  %v1362_v62 = vsel %vm568_vm1, %v1359_v15, %v1361_v50 }
 0x241   : > { %2743 = vst [vmem:[%s4392_s21 + $0x10] sm:$0xff] %v4410_v58 }
 0x242   : > { %v2413_v19 = vpop.f32.mrf.mxu3  ;;  %2350 = vmatmul.f32.gmra.mxu2 %v1935_v43  ;;  %v2054_v43 = vrot.slane %v1937_v39, 1 }
 0x243   : > { %v2414_v45 = vadd.f32 %v2413_v19, %v2300_v42  ;;  %2576 = vmatmul.f32.gmra.mxu0 %v2165_v24  ;;  %v2167_v42 = vsel %vm568_vm1, %v2164_v49, %v2166_v48 }
 0x244   : > { %v2055_v3 = vsel %vm455_vm0, %v2052_v28, %v2054_v43 }
 0x245   : > { %v2527_v32 = vadd.f32 %v2526_v20, %v2414_v45  ;;  %v2303_v9 = vpop.f32.mrf.mxu2  ;;  %v1727_v1 = vpop.f32.mrf.mxu1  ;;  %v3271_v20 = vld [vmem:[#allocation2 + $0x128] sm:$0xff] }
 0x246   : > { %v1728_v54 = vadd.f32 %v1727_v1, %v4064_v25  ;;  %v1364_v0 = vrot.slane %v3271_v20, 2  ;;  %v1938_v25 = vld [vmem:[#allocation2 + $0x138] sm:$0xff] }
 0x247   : > { %v4419_v7 = vadd.f32 %v2527_v32, %v1843_v55  ;;  %2463 = vmatmul.f32.gmra.mxu3 %v2053_v44  ;;  %v1939_v55 = vld [vmem:[#allocation2 + $0x140] sm:$0xff]  ;;  %v2056_v44 = vrot.slane %v1938_v25, 1 }
 0x248   : > { %v1845_v53 = vadd.f32 %v1728_v54, %v4053_v11  ;;  %1774 = vmatmul.f32.gmra.mxu1 %v1362_v62  ;;  %v2532_v60 = vpop.f32.mrf.mxu0  ;;  %v2168_v11 = vrot.slane %v1938_v25, 2  ;;  %v2169_v24 = vrot.slane %v1939_v55, 2  ;;  %v1365_v19 = vsel %vm568_vm1, %v1363_v51, %v1364_v0  ;;  %v1940_v54 = vld [vmem:[#allocation2 + $0x148] sm:$0x3] }
 0x249   : > { %2744 = vst [vmem:[%s4392_s21 + $0x18] sm:$0xff] %v4419_v7  ;;  %v2057_v48 = vrot.slane %v1939_v55, 1 }
 0x24a   : > { %v2416_v38 = vpop.f32.mrf.mxu3  ;;  %2353 = vmatmul.f32.gmra.mxu2 %v1936_v56  ;;  %v2170_v28 = vsel %vm568_vm1, %v2168_v11, %v2169_v24  ;;  %v3273_v11 = vld [vmem:[#allocation2 + $0x138] sm:$0xff] }
 0x24b   : > { %v2417_v15 = vadd.f32 %v2416_v38, %v2303_v9  ;;  %2579 = vmatmul.f32.gmra.mxu0 %v2167_v42 }
 0x24d   : > { %v2530_v40 = vadd.f32 %v2529_v4, %v2417_v15  ;;  %v2306_v50 = vpop.f32.mrf.mxu2  ;;  %v1730_v49 = vpop.f32.mrf.mxu1  ;;  %v3272_v4 = vld [vmem:[#allocation2 + $0x130] sm:$0x3]  ;;  %v2059_v15 = vrot.slane %v1940_v54, 1 }
 0x24e   : > { %v1731_v45 = vadd.f32 %v1730_v49, %v4085_v14  ;;  %v1366_v9 = vrot.slane %v3272_v4, 2  ;;  %v2058_v14 = vsel %vm455_vm0, %v2056_v44, %v2057_v48 }
 0x24f   : > { %v4428_v39 = vadd.f32 %v2530_v40, %v1844_v17  ;;  %2466 = vmatmul.f32.gmra.mxu3 %v2055_v3  ;;  %v2171_v17 = vrot.slane %v1940_v54, 2  ;;  %v1368_v40 = vrot.slane %v3273_v11, 2 }
 0x250   : > { %v1846_v56 = vadd.f32 %v1731_v45, %v4079_v8  ;;  %1777 = vmatmul.f32.gmra.mxu1 %v1365_v19  ;;  %v2535_v32 = vpop.f32.mrf.mxu0  ;;  %v1367_v35 = vsel %vm568_vm1, %v1364_v0, %v1366_v9  ;;  %v2060_v19 = vsel %vm455_vm0, %v2057_v48, %v2059_v15 }
 0x251   : > { %2745 = vst [vmem:[%s4392_s21 + $0x20] sm:$0xff] %v4428_v39  ;;  %v2172_v3 = vsel %vm568_vm1, %v2169_v24, %v2171_v17 }
 0x252   : > { %v2419_v1 = vpop.f32.mrf.mxu3  ;;  %2356 = vmatmul.f32.gmra.mxu2 %v1938_v25 }
 0x253   : > { %v2420_v62 = vadd.f32 %v2419_v1, %v2306_v50  ;;  %2582 = vmatmul.f32.gmra.mxu0 %v2170_v28 }
 0x255   : > { %v2533_v8 = vadd.f32 %v2532_v60, %v2420_v62  ;;  %v2309_v43 = vpop.f32.mrf.mxu2  ;;  %v1733_v42 = vpop.f32.mrf.mxu1  ;;  %v3274_v60 = vld [vmem:[#allocation2 + $0x140] sm:$0xff] }
 0x256   : > { %v1734_v51 = vadd.f32 %v1733_v42, %v4101_v41  ;;  %v1369_v50 = vrot.slane %v3274_v60, 2  ;;  %v1941_v41 = vld [vmem:[#allocation2 + $0x150] sm:$0xff] }
 0x257   : > { %v4437_v20 = vadd.f32 %v2533_v8, %v1845_v53  ;;  %2469 = vmatmul.f32.gmra.mxu3 %v2058_v14  ;;  %v1942_v53 = vld [vmem:[#allocation2 + $0x158] sm:$0xff]  ;;  %v2173_v45 = vrot.slane %v1941_v41, 2 }
 0x258   : > { %v1847_v38 = vadd.f32 %v1734_v51, %v4091_v21  ;;  %1780 = vmatmul.f32.gmra.mxu1 %v1367_v35  ;;  %v2538_v25 = vpop.f32.mrf.mxu0  ;;  %v884_v21 = vadd.f32 %v4089_v31, %v3821_v13  ;;  %v2174_v24 = vrot.slane %v1942_v53, 2  ;;  %v1370_v9 = vsel %vm568_vm1, %v1368_v40, %v1369_v50 }
 0x259   : > { %2746 = vst [vmem:[%s4392_s21 + $0x28] sm:$0xff] %v4437_v20  ;;  %v2061_v13 = vrot.slane %v1941_v41, 1  ;;  %v2062_v31 = vrot.slane %v1942_v53, 1 }
 0x25a   : > { %v2422_v49 = vpop.f32.mrf.mxu3  ;;  %2359 = vmatmul.f32.gmra.mxu2 %v1939_v55  ;;  %v997_v1 = vadd.f32 %v4113_v27, %v884_v21  ;;  %v2175_v14 = vsel %vm568_vm1, %v2173_v45, %v2174_v24  ;;  %v1943_v27 = vld [vmem:[#allocation2 + $0x160] sm:$0x3]  ;;  %v1944_v45 = vld [vmem:[#allocation2 + $0x168] sm:$0xff] }
 0x25b   : > { %v2423_v0 = vadd.f32 %v2422_v49, %v2309_v43  ;;  %2585 = vmatmul.f32.gmra.mxu0 %v2172_v3  ;;  %v2176_v42 = vrot.slane %v1943_v27, 2 }
 0x25d   : > { %v2536_v44 = vadd.f32 %v2535_v32, %v2423_v0  ;;  %v2312_v28 = vpop.f32.mrf.mxu2  ;;  %v1736_v4 = vpop.f32.mrf.mxu1  ;;  %v3275_v32 = vld [vmem:[#allocation2 + $0x148] sm:$0x3]  ;;  %v2064_v0 = vrot.slane %v1943_v27, 1 }
 0x25e   : > { %v1737_v55 = vadd.f32 %v1736_v4, %v4126_v34  ;;  %v1371_v17 = vrot.slane %v3275_v32, 2  ;;  %v887_v34 = vadd.f32 %v4115_v12, %v3834_v61  ;;  %v2177_v12 = vsel %vm568_vm1, %v2174_v24, %v2176_v42 }
 0x25f   : > { %v4449_v62 = vadd.f32 %v2536_v44, %v1846_v56  ;;  %2472 = vmatmul.f32.gmra.mxu3 %v2060_v19  ;;  %v2063_v56 = vsel %vm455_vm0, %v2061_v13, %v2062_v31  ;;  %v2065_v44 = vsel %vm455_vm0, %v2062_v31, %v2064_v0 }
 0x260   : > { %v1848_v54 = vadd.f32 %v1737_v55, %v997_v1  ;;  %1783 = vmatmul.f32.gmra.mxu1 %v1370_v9  ;;  %v2541_v48 = vpop.f32.mrf.mxu0  ;;  %v1372_v3 = vsel %vm568_vm1, %v1369_v50, %v1371_v17  ;;  %v1000_v11 = vadd.f32 %v4129_v46, %v887_v34 }
 0x261   : > { %2747 = vst [vmem:[%s4392_s21 + $0x30] sm:$0xff] %v4449_v62 }
 0x262   : > { %v2425_v8 = vpop.f32.mrf.mxu3  ;;  %2362 = vmatmul.f32.gmra.mxu2 %v1941_v41  ;;  %v3276_v41 = vld [vmem:[#allocation2 + $0x150] sm:$0xff] }
 0x263   : > { %v2426_v43 = vadd.f32 %v2425_v8, %v2312_v28  ;;  %2588 = vmatmul.f32.gmra.mxu0 %v2175_v14  ;;  %v1373_v21 = vrot.slane %v3276_v41, 2  ;;  %v2178_v28 = vrot.slane %v1944_v45, 2  ;;  %v3279_v41 = vld [vmem:[#allocation2 + $0x168] sm:$0xff] }
 0x265   : > { %v2539_v35 = vadd.f32 %v2538_v25, %v2426_v43  ;;  %v2315_v51 = vpop.f32.mrf.mxu2  ;;  %v1739_v15 = vpop.f32.mrf.mxu1  ;;  %v3277_v25 = vld [vmem:[#allocation2 + $0x158] sm:$0xff] }
 0x266   : > { %v1740_v40 = vadd.f32 %v1739_v15, %v4143_v29  ;;  %v1374_v19 = vrot.slane %v3277_v25, 2  ;;  %v1945_v29 = vld [vmem:[#allocation2 + $0x170] sm:$0xff] }
 0x267   : > { %v4460_v60 = vadd.f32 %v2539_v35, %v1847_v38  ;;  %2475 = vmatmul.f32.gmra.mxu3 %v2063_v56  ;;  %v890_v38 = vadd.f32 %v4131_v59, %v3852_v52  ;;  %v2179_v24 = vrot.slane %v1945_v29, 2  ;;  %v2066_v52 = vrot.slane %v1944_v45, 1 }
 0x268   : > { %v1849_v49 = vadd.f32 %v1740_v40, %v1000_v11  ;;  %1786 = vmatmul.f32.gmra.mxu1 %v1372_v3  ;;  %v2544_v61 = vpop.f32.mrf.mxu0  ;;  %v1375_v55 = vsel %vm568_vm1, %v1373_v21, %v1374_v19  ;;  %v2067_v59 = vrot.slane %v1945_v29, 1  ;;  %v4975_v3 = vld [vmem:[#allocation38_spill] sm:$0xff]  ;;  %v1378_v21 = vrot.slane %v3279_v41, 2 }
 0x269   : > { %2748 = vst [vmem:[%s4392_s21 + $0x38] sm:$0xff] %v4460_v60  ;;  %v1003_v13 = vadd.f32 %v4153_v2, %v890_v38  ;;  %v2180_v17 = vsel %vm568_vm1, %v2178_v28, %v2179_v24  ;;  %v1946_v2 = vld [vmem:[#allocation2 + $0x178] sm:$0x3] }
 0x26a   : > { %v2428_v50 = vpop.f32.mrf.mxu3  ;;  %2365 = vmatmul.f32.gmra.mxu2 %v1942_v53  ;;  %v2181_v34 = vrot.slane %v1946_v2, 2 }
 0x26b   : > { %v2429_v46 = vadd.f32 %v2428_v50, %v2315_v51  ;;  %2591 = vmatmul.f32.gmra.mxu0 %v2177_v12  ;;  %v2069_v12 = vrot.slane %v1946_v2, 1  ;;  %v1947_v50 = vld [vmem:[#allocation2 + $0x180] sm:$0xff] }
 0x26c   : > { %v2183_v28 = vrot.slane %v1947_v50, 2 }
 0x26d   : > { %v2542_v4 = vadd.f32 %v2541_v48, %v2429_v46  ;;  %v2318_v9 = vpop.f32.mrf.mxu2  ;;  %v1742_v1 = vpop.f32.mrf.mxu1  ;;  %v3278_v48 = vld [vmem:[#allocation2 + $0x160] sm:$0x3]  ;;  %v1948_v46 = vld [vmem:[#allocation2 + $0x188] sm:$0xff] }
 0x26e   : > { %v1743_v53 = vadd.f32 %v1742_v1, %v4164_v26  ;;  %v1376_v8 = vrot.slane %v3278_v48, 2  ;;  %v893_v26 = vadd.f32 %v4155_v6, %v3866_v5  ;;  %v2182_v6 = vsel %vm568_vm1, %v2179_v24, %v2181_v34 }
 0x26f   : > { %v4471_v14 = vadd.f32 %v2542_v4, %v1848_v54  ;;  %2478 = vmatmul.f32.gmra.mxu3 %v2065_v44  ;;  %v2068_v54 = vsel %vm455_vm0, %v2066_v52, %v2067_v59  ;;  %v2070_v44 = vsel %vm455_vm0, %v2067_v59, %v2069_v12  ;;  %v2184_v24 = vrot.slane %v1948_v46, 2 }
 0x270   : > { %v1850_v32 = vadd.f32 %v1743_v53, %v1003_v13  ;;  %1789 = vmatmul.f32.gmra.mxu1 %v1375_v55  ;;  %v2547_v31 = vpop.f32.mrf.mxu0  ;;  %v1377_v51 = vsel %vm568_vm1, %v1374_v19, %v1376_v8  ;;  %v1006_v15 = vadd.f32 %v4166_v37, %v893_v26  ;;  %v4978_v13 = vld [vmem:[#allocation39_spill] sm:$0xff]  ;;  %v2071_v48 = vrot.slane %v1947_v50, 1 }
 0x271   : > { %2749 = vst [vmem:[%s4392_s21 + $0x40] sm:$0xff] %v4471_v14  ;;  %v2072_v8 = vrot.slane %v1948_v46, 1 }
 0x272   : > { %v2431_v43 = vpop.f32.mrf.mxu3  ;;  %2368 = vmatmul.f32.gmra.mxu2 %v1944_v45  ;;  %v4977_v45 = vld [vmem:[#allocation37_spill] sm:$0xff] }
 0x273   : > { %v2432_v27 = vadd.f32 %v2431_v43, %v2318_v9  ;;  %2594 = vmatmul.f32.gmra.mxu0 %v2180_v17  ;;  %v2185_v43 = vsel %vm568_vm1, %v2183_v28, %v2184_v24 }
 0x275   : > { %v2545_v56 = vadd.f32 %v2544_v61, %v2432_v27  ;;  %v2321_v42 = vpop.f32.mrf.mxu2  ;;  %v1745_v35 = vpop.f32.mrf.mxu1  ;;  %v3280_v61 = vld [vmem:[#allocation2 + $0x170] sm:$0xff] }
 0x276   : > { %v1746_v11 = vadd.f32 %v1745_v35, %v4975_v3  ;;  %v1379_v25 = vrot.slane %v3280_v61, 2 }
 0x277   : > { %v4482_v40 = vadd.f32 %v2545_v56, %v1849_v49  ;;  %2481 = vmatmul.f32.gmra.mxu3 %v2068_v54  ;;  %v4976_v49 = vld [vmem:[#allocation24_spill] sm:$0xff]  ;;  %v2073_v56 = vsel %vm455_vm0, %v2071_v48, %v2072_v8 }
 0x278   : > { %v1851_v0 = vadd.f32 %v1746_v11, %v1006_v15  ;;  %1792 = vmatmul.f32.gmra.mxu1 %v1377_v51  ;;  %v2550_v5 = vpop.f32.mrf.mxu0  ;;  %v896_v38 = vadd.f32 %v4977_v45, %v4976_v49  ;;  %v1380_v55 = vsel %vm568_vm1, %v1378_v21, %v1379_v25  ;;  %v1949_v54 = vld [vmem:[#allocation2 + $0x190] sm:$0x3]  ;;  %v1950_v45 = vld [vmem:[#allocation2 + $0x198] sm:$0xff] }
 0x279   : > { %2750 = vst [vmem:[%s4392_s21 + $0x48] sm:$0xff] %v4482_v40  ;;  %v2074_v21 = vrot.slane %v1949_v54, 1  ;;  %v2188_v28 = vrot.slane %v1950_v45, 2 }
 0x27a   : > { %v2434_v19 = vpop.f32.mrf.mxu3  ;;  %2371 = vmatmul.f32.gmra.mxu2 %v1945_v29  ;;  %v1009_v53 = vadd.f32 %v4978_v13, %v896_v38 }
 0x27b   : > { %v2435_v37 = vadd.f32 %v2434_v19, %v2321_v42  ;;  %2597 = vmatmul.f32.gmra.mxu0 %v2182_v6  ;;  %v2186_v42 = vrot.slane %v1949_v54, 2 }
 0x27d   : > { %v2548_v4 = vadd.f32 %v2547_v31, %v2435_v37  ;;  %v2324_v9 = vpop.f32.mrf.mxu2  ;;  %v1748_v1 = vpop.f32.mrf.mxu1  ;;  %v3281_v31 = vld [vmem:[#allocation2 + $0x178] sm:$0x3]  ;;  %v2187_v19 = vsel %vm568_vm1, %v2184_v24, %v2186_v42  ;;  %v3282_v37 = vld [vmem:[#allocation2 + $0x180] sm:$0xff] }
 0x27e   : > { %v1749_v29 = vadd.f32 %v1748_v1, %v4187_v10  ;;  %v1381_v27 = vrot.slane %v3281_v31, 2  ;;  %v4979_v10 = vld [vmem:[#allocation27_spill] sm:$0xff] }
 0x27f   : > { %v4493_v52 = vadd.f32 %v2548_v4, %v1850_v32  ;;  %2484 = vmatmul.f32.gmra.mxu3 %v2070_v44  ;;  %v4980_v32 = vld [vmem:[#allocation40_spill] sm:$0xff]  ;;  %v2075_v44 = vsel %vm455_vm0, %v2072_v8, %v2074_v21  ;;  %v4987_v21 = vld [vmem:[#allocation45_spill] sm:$0xff] }
 0x280   : > { %v1852_v17 = vadd.f32 %v1749_v29, %v1009_v53  ;;  %1795 = vmatmul.f32.gmra.mxu1 %v1380_v55  ;;  %v2553_v59 = vpop.f32.mrf.mxu0  ;;  %v899_v34 = vadd.f32 %v4980_v32, %v4979_v10  ;;  %v1382_v3 = vsel %vm568_vm1, %v1379_v25, %v1381_v27  ;;  %v3284_v4 = vld [vmem:[#allocation2 + $0x8] sm:$0xff]  ;;  %v4983_v53 = vld [vmem:[#allocation42_spill] sm:$0xff]  ;;  %v2076_v27 = vrot.slane %v1950_v45, 1 }
 0x281   : > { %2751 = vst [vmem:[%s4392_s21 + $0x50] sm:$0xff] %v4493_v52  ;;  %v2189_v24 = vrot.slane %v3284_v4, 2  ;;  %v2077_v8 = vrot.slane %v3284_v4, 1 }
 0x282   : > { %v2437_v2 = vpop.f32.mrf.mxu3  ;;  %2374 = vmatmul.f32.gmra.mxu2 %v1947_v50  ;;  %v1012_v11 = vadd.f32 %v4189_v33, %v899_v34  ;;  %v1383_v50 = vrot.slane %v3282_v37, 2  ;;  %v1952_v34 = vld [vmem:[#allocation2 + $0x1a8] sm:$0x3] }
 0x283   : > { %v2438_v26 = vadd.f32 %v2437_v2, %v2324_v9  ;;  %2600 = vmatmul.f32.gmra.mxu0 %v2185_v43  ;;  %v4988_v37 = vld [vmem:[#allocation47_spill] sm:$0xff] }
 0x285   : > { %v2551_v35 = vadd.f32 %v2550_v5, %v2438_v26  ;;  %v2327_v51 = vpop.f32.mrf.mxu2  ;;  %v1751_v15 = vpop.f32.mrf.mxu1  ;;  %v3283_v5 = vld [vmem:[#allocation2 + $0x188] sm:$0xff]  ;;  %v2190_v26 = vsel %vm568_vm1, %v2188_v28, %v2189_v24 }
 0x286   : > { %v1752_v12 = vadd.f32 %v1751_v15, %v4195_v63  ;;  %v1384_v49 = vrot.slane %v3283_v5, 2  ;;  %v4981_v63 = vld [vmem:[#allocation30_spill] sm:$0xff] }
 0x287   : > { %v4504_v6 = vadd.f32 %v2551_v35, %v1851_v0  ;;  %2487 = vmatmul.f32.gmra.mxu3 %v2073_v56  ;;  %v4982_v0 = vld [vmem:[#allocation41_spill] sm:$0xff]  ;;  %v2078_v35 = vsel %vm455_vm0, %v2076_v27, %v2077_v8  ;;  %v4992_v27 = vld [vmem:[#allocation19_spill] sm:$0xff] }
 0x288   : > { %v1853_v41 = vadd.f32 %v1752_v12, %v1012_v11  ;;  %1798 = vmatmul.f32.gmra.mxu1 %v1382_v3  ;;  %v2556_v61 = vpop.f32.mrf.mxu0  ;;  %v902_v38 = vadd.f32 %v4982_v0, %v4981_v63  ;;  %v1385_v13 = vsel %vm568_vm1, %v1383_v50, %v1384_v49  ;;  %v4985_v56 = vld [vmem:[#allocation33_spill] sm:$0xff] }
 0x289   : > { %2752 = vst [vmem:[%s4392_s21 + $0x58] sm:$0xff] %v4504_v6 }
 0x28a   : > { %v2440_v25 = vpop.f32.mrf.mxu3  ;;  %2377 = vmatmul.f32.gmra.mxu2 %v1948_v46  ;;  %v1015_v29 = vadd.f32 %v4983_v53, %v902_v38  ;;  %v4984_v46 = vld [vmem:[#allocation44_spill] sm:$0xff]  ;;  %v4990_v38 = vld [vmem:[#allocation46_spill] sm:$0xff] }
 0x28b   : > { %v2441_v33 = vadd.f32 %v2440_v25, %v2327_v51  ;;  %2603 = vmatmul.f32.gmra.mxu0 %v2187_v19  ;;  %v2191_v51 = vrot.slane %v1952_v34, 2 }
 0x28d   : > { %v2554_v9 = vadd.f32 %v2553_v59, %v2441_v33  ;;  %v2330_v1 = vpop.f32.mrf.mxu2  ;;  %v1754_v55 = vpop.f32.mrf.mxu1  ;;  %v3285_v59 = vld [vmem:[#allocation2 + $0x190] sm:$0x3]  ;;  %v2079_v33 = vrot.slane %v1952_v34, 1  ;;  %v2192_v63 = vsel %vm568_vm1, %v2189_v24, %v2191_v51  ;;  %v4996_v51 = vld [vmem:[#allocation21_spill] sm:$0xff] }
 0x28e   : > { %v1755_v48 = vadd.f32 %v1754_v55, %v4984_v46  ;;  %v1386_v54 = vrot.slane %v3285_v59, 2  ;;  %v4991_v55 = vld [vmem:[#allocation48_spill] sm:$0xff] }
 0x28f   : > { %v4515_v43 = vadd.f32 %v2554_v9, %v1852_v17  ;;  %2490 = vmatmul.f32.gmra.mxu3 %v2075_v44  ;;  %v4986_v17 = vld [vmem:[#allocation43_spill] sm:$0xff]  ;;  %v4995_v34 = vld [vmem:[#allocation52_spill] sm:$0xff] }
 0x290   : > { %v1854_v31 = vadd.f32 %v1755_v48, %v1015_v29  ;;  %1801 = vmatmul.f32.gmra.mxu1 %v1385_v13  ;;  %v2559_v2 = vpop.f32.mrf.mxu0  ;;  %v905_v42 = vadd.f32 %v4986_v17, %v4985_v56  ;;  %v1387_v12 = vsel %vm568_vm1, %v1384_v49, %v1386_v54  ;;  %v4989_v49 = vld [vmem:[#allocation17_spill] sm:$0xff] }
 0x291   : > { %2753 = vst [vmem:[%s4392_s21 + $0x60] sm:$0xff] %v4515_v43  ;;  %v908_v44 = vadd.f32 %v4990_v38, %v4989_v49  ;;  %v5000_v49 = vld [vmem:[#allocation54_spill] sm:$0xff] }
 0x292   : > { %v2443_v10 = vpop.f32.mrf.mxu3  ;;  %2380 = vmatmul.f32.gmra.mxu2 %v1950_v45  ;;  %v1018_v19 = vadd.f32 %v4987_v21, %v905_v42 }
 0x293   : > { %v2444_v32 = vadd.f32 %v2443_v10, %v2330_v1  ;;  %2606 = vmatmul.f32.gmra.mxu0 %v2190_v26  ;;  %v1021_v13 = vadd.f32 %v4991_v55, %v908_v44  ;;  %v4993_v26 = vld [vmem:[#allocation49_spill] sm:$0xff]  ;;  %v4994_v10 = vld [vmem:[#allocation50_spill] sm:$0xff] }
 0x294   : > { %v5002_v55 = vld [vmem:[#allocation57_spill] sm:$0xff] }
 0x295   : > { %v2557_v15 = vadd.f32 %v2556_v61, %v2444_v32  ;;  %v2333_v3 = vpop.f32.mrf.mxu2  ;;  %v1757_v11 = vpop.f32.mrf.mxu1 }
 0x296   : > { %v1758_v50 = vadd.f32 %v1757_v11, %v4988_v37 }
 0x297   : > { %v4526_v5 = vadd.f32 %v2557_v15, %v1853_v41  ;;  %2493 = vmatmul.f32.gmra.mxu3 %v2078_v35  ;;  %v2080_v41 = vsel %vm455_vm0, %v2077_v8, %v2079_v33  ;;  %v911_v8 = vadd.f32 %v4993_v26, %v4992_v27  ;;  %v4997_v15 = vld [vmem:[#allocation51_spill] sm:$0xff]  ;;  %v5004_v27 = vld [vmem:[#allocation56_spill] sm:$0xff] }
 0x298   : > { %v1855_v25 = vadd.f32 %v1758_v50, %v1018_v19  ;;  %1804 = vmatmul.f32.gmra.mxu1 %v1387_v12  ;;  %v2562_v45 = vpop.f32.mrf.mxu0  ;;  %v4998_v19 = vld [vmem:[#allocation53_spill] sm:$0xff] }
 0x299   : > { %2754 = vst [vmem:[%s4392_s21 + $0x68] sm:$0xff] %v4526_v5  ;;  %v1024_v32 = vadd.f32 %v4994_v10, %v911_v8 }
 0x29a   : > { %v2446_v61 = vpop.f32.mrf.mxu3  ;;  %2383 = vmatmul.f32.gmra.mxu2 %v3284_v4 }
 0x29b   : > { %v2447_v0 = vadd.f32 %v2446_v61, %v2333_v3  ;;  %2609 = vmatmul.f32.gmra.mxu0 %v2192_v63  ;;  %v914_v3 = vadd.f32 %v4997_v15, %v4996_v51  ;;  %v5007_v51 = vld [vmem:[#allocation59_spill] sm:$0xff] }
 0x29d   : > { %v2560_v28 = vadd.f32 %v2559_v2, %v2447_v0  ;;  %v2336_v9 = vpop.f32.mrf.mxu2  ;;  %v1760_v1 = vpop.f32.mrf.mxu1  ;;  %v1027_v37 = vadd.f32 %v4998_v19, %v914_v3  ;;  %v4999_v0 = vld [vmem:[#allocation23_spill] sm:$0xff] }
 0x29e   : > { %v1761_v53 = vadd.f32 %v1760_v1, %v4227_v36  ;;  %v917_v38 = vadd.f32 %v5000_v49, %v4999_v0  ;;  %v5010_v0 = vld [vmem:[#allocation32_spill] sm:$0xff]  ;;  %v5011_v49 = vld [vmem:[#allocation61_spill] sm:$0xff] }
 0x29f   : > { %v4536_v24 = vadd.f32 %v2560_v28, %v1854_v31  ;;  %2496 = vmatmul.f32.gmra.mxu3 %v2080_v41 }
 0x2a0   : > { %v1856_v29 = vadd.f32 %v1761_v53, %v1021_v13  ;;  %v2565_v4 = vpop.f32.mrf.mxu0 }
 0x2a1   : > { %2755 = vst [vmem:[%s4392_s21 + $0x70] sm:$0xff] %v4536_v24 }
 0x2a2   : > { %v2449_v46 = vpop.f32.mrf.mxu3 }
 0x2a3   : > { %v2450_v48 = vadd.f32 %v2449_v46, %v2336_v9  ;;  %v5001_v9 = vld [vmem:[#allocation55_spill] sm:$0xff] }
 0x2a4   : > { %v1030_v1 = vadd.f32 %v5001_v9, %v917_v38  ;;  %v926_v38 = vadd.f32 %v5011_v49, %v5010_v0  ;;  %v5012_v9 = vld [vmem:[#allocation63_spill] sm:$0xff] }
 0x2a5   : > { %v2563_v2 = vadd.f32 %v2562_v45, %v2450_v48  ;;  %v2339_v59 = vpop.f32.mrf.mxu2  ;;  %v1763_v54 = vpop.f32.mrf.mxu1  ;;  %v5003_v48 = vld [vmem:[#allocation26_spill] sm:$0xff] }
 0x2a6   : > { %v1764_v36 = vadd.f32 %v1763_v54, %v4995_v34  ;;  %v920_v26 = vadd.f32 %v5004_v27, %v5003_v48  ;;  %v5005_v54 = vld [vmem:[#allocation58_spill] sm:$0xff]  ;;  %v5013_v48 = vld [vmem:[#allocation35_spill] sm:$0xff]  ;;  %v5014_v27 = vld [vmem:[#allocation64_spill] sm:$0xff] }
 0x2a7   : > { %v4544_v31 = vadd.f32 %v2563_v2, %v1855_v25 }
 0x2a8   : > { %v1857_v56 = vadd.f32 %v1764_v36, %v1024_v32  ;;  %v2568_v17 = vpop.f32.mrf.mxu0  ;;  %v1033_v10 = vadd.f32 %v5005_v54, %v920_v26  ;;  %v929_v26 = vadd.f32 %v5014_v27, %v5013_v48 }
 0x2a9   : > { %2756 = vst [vmem:[%s4392_s21 + $0x78] sm:$0xff] %v4544_v31 }
 0x2aa   : > { %v2452_v42 = vpop.f32.mrf.mxu3 }
 0x2ab   : > { %v2453_v35 = vadd.f32 %v2452_v42, %v2339_v59 }
 0x2ad   : > { %v2566_v11 = vadd.f32 %v2565_v4, %v2453_v35  ;;  %v2342_v12 = vpop.f32.mrf.mxu2  ;;  %v1766_v21 = vpop.f32.mrf.mxu1  ;;  %v5006_v35 = vld [vmem:[#allocation29_spill] sm:$0xff] }
 0x2ae   : > { %v1767_v50 = vadd.f32 %v1766_v21, %v4247_v23  ;;  %v923_v15 = vadd.f32 %v5007_v51, %v5006_v35  ;;  %v5008_v21 = vld [vmem:[#allocation60_spill] sm:$0xff] }
 0x2af   : > { %v4552_v33 = vadd.f32 %v2566_v11, %v1856_v29 }
 0x2b0   : > { %v1858_v25 = vadd.f32 %v1767_v50, %v1027_v37  ;;  %v2571_v45 = vpop.f32.mrf.mxu0  ;;  %v1036_v19 = vadd.f32 %v5008_v21, %v923_v15  ;;  %v5009_v37 = vld [vmem:[#allocation62_spill] sm:$0xff] }
 0x2b1   : > { %2757 = vst [vmem:[%s4392_s21 + $0x80] sm:$0xff] %v4552_v33  ;;  %v5018_v21 = vld [vmem:[#allocation66_spill] sm:$0xff] }
 0x2b2   : > { %v2455_v63 = vpop.f32.mrf.mxu3 }
 0x2b3   : > { %v2456_v61 = vadd.f32 %v2455_v63, %v2342_v12 }
 0x2b5   : > { %v2569_v44 = vadd.f32 %v2568_v17, %v2456_v61  ;;  %v2345_v41 = vpop.f32.mrf.mxu2  ;;  %v1769_v28 = vpop.f32.mrf.mxu1 }
 0x2b6   : > { %v1770_v13 = vadd.f32 %v1769_v28, %v5002_v55 }
 0x2b7   : > { %v4560_v23 = vadd.f32 %v2569_v44, %v1857_v56 }
 0x2b8   : > { %v1859_v53 = vadd.f32 %v1770_v13, %v1030_v1  ;;  %v2574_v29 = vpop.f32.mrf.mxu0  ;;  %v1039_v1 = vadd.f32 %v5012_v9, %v926_v38 }
 0x2b9   : > { %2758 = vst [vmem:[%s4392_s21 + $0x88] sm:$0xff] %v4560_v23 }
 0x2ba   : > { %v2458_v4 = vpop.f32.mrf.mxu3 }
 0x2bb   : > { %v2459_v46 = vadd.f32 %v2458_v4, %v2345_v41 }
 0x2bd   : > { %v2572_v8 = vadd.f32 %v2571_v45, %v2459_v46  ;;  %v2348_v2 = vpop.f32.mrf.mxu2  ;;  %v1772_v59 = vpop.f32.mrf.mxu1 }
 0x2be   : > { %v1773_v32 = vadd.f32 %v1772_v59, %v4267_v57 }
 0x2bf   : > { %v4568_v34 = vadd.f32 %v2572_v8, %v1858_v25  ;;  %v2773_v8 = vadd.f32 %v4399_v47, %v4386_v30 }
 0x2c0   : > { %v1860_v36 = vadd.f32 %v1773_v32, %v1033_v10  ;;  %v2577_v56 = vpop.f32.mrf.mxu0  ;;  %v5015_v10 = vld [vmem:[#allocation65_spill] sm:$0xff]  ;;  %v5016_v32 = vld [vmem:[#allocation67_spill] sm:$0xff] }
 0x2c1   : > { %2759 = vst [vmem:[%s4392_s21 + $0x90] sm:$0xff] %v4568_v34 }
 0x2c2   : > { %v2461_v17 = vpop.f32.mrf.mxu3 }
 0x2c3   : > { %v2462_v42 = vadd.f32 %v2461_v17, %v2348_v2 }
 0x2c5   : > { %v2575_v3 = vadd.f32 %v2574_v29, %v2462_v42  ;;  %v2351_v11 = vpop.f32.mrf.mxu2  ;;  %v1775_v12 = vpop.f32.mrf.mxu1 }
 0x2c6   : > { %v1776_v50 = vadd.f32 %v1775_v12, %v5009_v37  ;;  %v5017_v12 = vld [vmem:[#allocation18_spill] sm:$0xff] }
 0x2c7   : > { %v4576_v57 = vadd.f32 %v2575_v3, %v1859_v53 }
 0x2c8   : > { %v1861_v25 = vadd.f32 %v1776_v50, %v1036_v19  ;;  %v2580_v45 = vpop.f32.mrf.mxu0  ;;  %v932_v19 = vadd.f32 %v5018_v21, %v5017_v12 }
 0x2c9   : > { %2760 = vst [vmem:[%s4392_s21 + $0x98] sm:$0xff] %v4576_v57 }
 0x2ca   : > { %v2464_v63 = vpop.f32.mrf.mxu3 }
 0x2cb   : > { %v2465_v61 = vadd.f32 %v2464_v63, %v2351_v11  ;;  %v5019_v63 = vld [vmem:[#allocation68_spill] sm:$0xff] }
 0x2cd   : > { %v2578_v44 = vadd.f32 %v2577_v56, %v2465_v61  ;;  %v2354_v41 = vpop.f32.mrf.mxu2  ;;  %v1778_v28 = vpop.f32.mrf.mxu1  ;;  %v2774_v56 = vadd.f32 %v2773_v8, %v4410_v58  ;;  %v1045_v61 = vadd.f32 %v5019_v63, %v932_v19 }
 0x2ce   : > { %v1779_v55 = vadd.f32 %v1778_v28, %v4287_v22  ;;  %v1042_v22 = vadd.f32 %v5015_v10, %v929_v26  ;;  %v5022_v26 = vld [vmem:[#allocation70_spill] sm:$0xff] }
 0x2cf   : > { %v4584_v13 = vadd.f32 %v2578_v44, %v1860_v36  ;;  %v2775_v51 = vadd.f32 %v2774_v56, %v4419_v7 }
 0x2d0   : > { %v1862_v53 = vadd.f32 %v1779_v55, %v1039_v1  ;;  %v2583_v29 = vpop.f32.mrf.mxu0 }
 0x2d1   : > { %2761 = vst [vmem:[%s4392_s21 + $0xa0] sm:$0xff] %v4584_v13  ;;  %v2776_v3 = vadd.f32 %v2775_v51, %v4428_v39 }
 0x2d2   : > { %v2467_v4 = vpop.f32.mrf.mxu3 }
 0x2d3   : > { %v2468_v46 = vadd.f32 %v2467_v4, %v2354_v41  ;;  %v2777_v37 = vadd.f32 %v2776_v3, %v4437_v20  ;;  %v5021_v4 = vld [vmem:[#allocation69_spill] sm:$0xff]  ;;  %v5025_v3 = vld [vmem:[#allocation71_spill] sm:$0xff] }
 0x2d5   : > { %v2581_v2 = vadd.f32 %v2580_v45, %v2468_v46  ;;  %v2357_v59 = vpop.f32.mrf.mxu2  ;;  %v1781_v54 = vpop.f32.mrf.mxu1  ;;  %v2778_v49 = vadd.f32 %v2777_v37, %v4449_v62  ;;  %v5026_v37 = vld [vmem:[#allocation73_spill] sm:$0xff] }
 0x2d6   : > { %v1782_v36 = vadd.f32 %v1781_v54, %v5016_v32 }
 0x2d7   : > { %v4595_v17 = vadd.f32 %v2581_v2, %v1861_v25  ;;  %v2779_v28 = vadd.f32 %v2778_v49, %v4460_v60  ;;  %v5023_v2 = vld [vmem:[#allocation72_spill] sm:$0xff] }
 0x2d8   : > { %v1863_v42 = vadd.f32 %v1782_v36, %v1042_v22  ;;  %v2586_v35 = vpop.f32.mrf.mxu0 }
 0x2d9   : > { %2762 = vst [vmem:[%s4392_s21 + $0xa8] sm:$0xff] %v4595_v17  ;;  %v2780_v1 = vadd.f32 %v2779_v28, %v4471_v14 }
 0x2da   : > { %v2470_v15 = vpop.f32.mrf.mxu3 }
 0x2db   : > { %v2471_v11 = vadd.f32 %v2470_v15, %v2357_v59  ;;  %v5024_v15 = vld [vmem:[#allocation22_spill] sm:$0xff] }
 0x2dd   : > { %v2584_v50 = vadd.f32 %v2583_v29, %v2471_v11  ;;  %v2360_v45 = vpop.f32.mrf.mxu2  ;;  %v1784_v25 = vpop.f32.mrf.mxu1  ;;  %v5020_v29 = vld [vmem:[#allocation20_spill] sm:$0xff]  ;;  %v938_v11 = vadd.f32 %v5025_v3, %v5024_v15 }
 0x2de   : > { %v1785_v0 = vadd.f32 %v1784_v25, %v4307_v18  ;;  %v935_v46 = vadd.f32 %v5021_v4, %v5020_v29  ;;  %v2781_v18 = vadd.f32 %v2780_v1, %v4482_v40  ;;  %v5027_v1 = vld [vmem:[#allocation25_spill] sm:$0xff] }
 0x2df   : > { %v4607_v38 = vadd.f32 %v2584_v50, %v1862_v53  ;;  %v1051_v50 = vadd.f32 %v5026_v37, %v938_v11 }
 0x2e0   : > { %v1864_v44 = vadd.f32 %v1785_v0, %v1045_v61  ;;  %v2589_v41 = vpop.f32.mrf.mxu0  ;;  %v1048_v8 = vadd.f32 %v5022_v26, %v935_v46  ;;  %v2782_v54 = vadd.f32 %v2781_v18, %v4493_v52  ;;  %v5029_v18 = vld [vmem:[#allocation75_spill] sm:$0xff] }
 0x2e1   : > { %2763 = vst [vmem:[%s4392_s21 + $0xb0] sm:$0xff] %v4607_v38 }
 0x2e2   : > { %v2473_v9 = vpop.f32.mrf.mxu3  ;;  %v2783_v36 = vadd.f32 %v2782_v54, %v4504_v6 }
 0x2e3   : > { %v2474_v55 = vadd.f32 %v2473_v9, %v2360_v45 }
 0x2e5   : > { %v2587_v48 = vadd.f32 %v2586_v35, %v2474_v55  ;;  %v2363_v27 = vpop.f32.mrf.mxu2  ;;  %v1787_v53 = vpop.f32.mrf.mxu1  ;;  %v2784_v35 = vadd.f32 %v2783_v36, %v4515_v43  ;;  %v5028_v55 = vld [vmem:[#allocation74_spill] sm:$0xff] }
 0x2e6   : > { %v1788_v59 = vadd.f32 %v1787_v53, %v5023_v2  ;;  %v941_v29 = vadd.f32 %v5028_v55, %v5027_v1  ;;  %v5036_v1 = vld [vmem:[#allocation79_spill] sm:$0xff] }
 0x2e7   : > { %v4619_v10 = vadd.f32 %v2587_v48, %v1863_v42  ;;  %v2785_v12 = vadd.f32 %v2784_v35, %v4526_v5  ;;  %v5031_v35 = vld [vmem:[#allocation28_spill] sm:$0xff] }
 0x2e8   : > { %v1865_v22 = vadd.f32 %v1788_v59, %v1048_v8  ;;  %v2592_v32 = vpop.f32.mrf.mxu0  ;;  %v1054_v48 = vadd.f32 %v5029_v18, %v941_v29 }
 0x2e9   : > { %2764 = vst [vmem:[%s4392_s21 + $0xb8] sm:$0xff] %v4619_v10  ;;  %v2786_v25 = vadd.f32 %v2785_v12, %v4536_v24 }
 0x2ea   : > { %v2476_v56 = vpop.f32.mrf.mxu3 }
 0x2eb   : > { %v2477_v51 = vadd.f32 %v2476_v56, %v2363_v27  ;;  %v2787_v49 = vadd.f32 %v2786_v25, %v4544_v31  ;;  %v5030_v27 = vld [vmem:[#allocation77_spill] sm:$0xff] }
 0x2ed   : > { %v2590_v21 = vadd.f32 %v2589_v41, %v2477_v51  ;;  %v2366_v19 = vpop.f32.mrf.mxu2  ;;  %v1790_v42 = vpop.f32.mrf.mxu1  ;;  %v2788_v41 = vadd.f32 %v2787_v49, %v4552_v33  ;;  %v5032_v51 = vld [vmem:[#allocation76_spill] sm:$0xff] }
 0x2ee   : > { %v1791_v45 = vadd.f32 %v1790_v42, %v4327_v16  ;;  %v944_v15 = vadd.f32 %v5032_v51, %v5031_v35  ;;  %v5034_v42 = vld [vmem:[#allocation80_spill] sm:$0xff]  ;;  %v5039_v35 = vld [vmem:[#allocation34_spill] sm:$0xff] }
 0x2ef   : > { %v4631_v63 = vadd.f32 %v2590_v21, %v1864_v44  ;;  %v2789_v16 = vadd.f32 %v2788_v41, %v4560_v23  ;;  %v5033_v21 = vld [vmem:[#allocation78_spill] sm:$0xff] }
 0x2f0   : > { %v1866_v61 = vadd.f32 %v1791_v45, %v1051_v50  ;;  %v2595_v0 = vpop.f32.mrf.mxu0 }
 0x2f1   : > { %2765 = vst [vmem:[%s4392_s21 + $0xc0] sm:$0xff] %v4631_v63  ;;  %v2790_v26 = vadd.f32 %v2789_v16, %v4568_v34 }
 0x2f2   : > { %v2479_v28 = vpop.f32.mrf.mxu3 }
 0x2f3   : > { %v2480_v9 = vadd.f32 %v2479_v28, %v2366_v19  ;;  %v2791_v59 = vadd.f32 %v2790_v26, %v4576_v57  ;;  %v1057_v19 = vadd.f32 %v5033_v21, %v944_v15  ;;  %v5042_v21 = vld [vmem:[#allocation86_spill] sm:$0xff] }
 0x2f5   : > { %v2593_v4 = vadd.f32 %v2592_v32, %v2480_v9  ;;  %v2369_v46 = vpop.f32.mrf.mxu2  ;;  %v1793_v44 = vpop.f32.mrf.mxu1  ;;  %v2792_v32 = vadd.f32 %v2791_v59, %v4584_v13  ;;  %v5035_v9 = vld [vmem:[#allocation31_spill] sm:$0xff] }
 0x2f6   : > { %v1794_v53 = vadd.f32 %v1793_v44, %v5030_v27  ;;  %v947_v55 = vadd.f32 %v5036_v1, %v5035_v9  ;;  %v5037_v44 = vld [vmem:[#allocation81_spill] sm:$0xff] }
 0x2f7   : > { %v4643_v8 = vadd.f32 %v2593_v4, %v1865_v22  ;;  %v2793_v3 = vadd.f32 %v2792_v32, %v4595_v17 }
 0x2f8   : > { %v1867_v2 = vadd.f32 %v1794_v53, %v1054_v48  ;;  %v2598_v36 = vpop.f32.mrf.mxu0  ;;  %v1060_v18 = vadd.f32 %v5037_v44, %v947_v55  ;;  %v5038_v48 = vld [vmem:[#allocation83_spill] sm:$0xff] }
 0x2f9   : > { %2766 = vst [vmem:[%s4392_s21 + $0xc8] sm:$0xff] %v4643_v8  ;;  %v2794_v50 = vadd.f32 %v2793_v3, %v4607_v38 }
 0x2fa   : > { %v2482_v54 = vpop.f32.mrf.mxu3 }
 0x2fb   : > { %v2483_v56 = vadd.f32 %v2482_v54, %v2369_v46  ;;  %v2795_v49 = vadd.f32 %v2794_v50, %v4619_v10 }
 0x2fd   : > { %v2596_v11 = vadd.f32 %v2595_v0, %v2483_v56  ;;  %v2372_v12 = vpop.f32.mrf.mxu2  ;;  %v1796_v22 = vpop.f32.mrf.mxu1  ;;  %v2796_v41 = vadd.f32 %v2795_v49, %v4631_v63 }
 0x2fe   : > { %v1797_v37 = vadd.f32 %v1796_v22, %v5034_v42 }
 0x2ff   : > { %v4655_v45 = vadd.f32 %v2596_v11, %v1866_v61  ;;  %v2797_v16 = vadd.f32 %v2796_v41, %v4643_v8  ;;  %v5043_v41 = vld [vmem:[#allocation36_spill] sm:$0xff] }
 0x300   : > { %v1868_v25 = vadd.f32 %v1797_v37, %v1057_v19  ;;  %v2601_v29 = vpop.f32.mrf.mxu0 }
 0x301   : > { %2767 = vst [vmem:[%s4392_s21 + $0xd0] sm:$0xff] %v4655_v45  ;;  %v2798_v53 = vadd.f32 %v2797_v16, %v4655_v45 }
 0x302   : > { %v2485_v28 = vpop.f32.mrf.mxu3 }
 0x303   : > { %v2486_v0 = vadd.f32 %v2485_v28, %v2372_v12  ;;  %v5041_v12 = vld [vmem:[#allocation84_spill] sm:$0xff] }
 0x305   : > { %v2599_v4 = vadd.f32 %v2598_v36, %v2486_v0  ;;  %v2375_v46 = vpop.f32.mrf.mxu2  ;;  %v1799_v61 = vpop.f32.mrf.mxu1  ;;  %v5040_v36 = vld [vmem:[#allocation82_spill] sm:$0xff]  ;;  %v5044_v0 = vld [vmem:[#allocation85_spill] sm:$0xff] }
 0x306   : > { %v1800_v27 = vadd.f32 %v1799_v61, %v5038_v48  ;;  %v950_v51 = vadd.f32 %v5040_v36, %v5039_v35  ;;  %v953_v9 = vadd.f32 %v5044_v0, %v5043_v41 }
 0x307   : > { %v4667_v26 = vadd.f32 %v2599_v4, %v1867_v2 }
 0x308   : > { %v1869_v59 = vadd.f32 %v1800_v27, %v1060_v18  ;;  %v1063_v22 = vadd.f32 %v5041_v12, %v950_v51  ;;  %v2604_v42 = vpop.f32.mrf.mxu0 }
 0x309   : > { %2768 = vst [vmem:[%s4392_s21 + $0xd8] sm:$0xff] %v4667_v26  ;;  %v2799_v54 = vadd.f32 %v2798_v53, %v4667_v26 }
 0x30a   : > { %v2488_v32 = vpop.f32.mrf.mxu3 }
 0x30b   : > { %v2489_v56 = vadd.f32 %v2488_v32, %v2375_v46  ;;  %v5046_v46 = vld [vmem:[#allocation88_spill] sm:$0xff] }
 0x30d   : > { %v2602_v15 = vadd.f32 %v2601_v29, %v2489_v56  ;;  %v2378_v3 = vpop.f32.mrf.mxu2  ;;  %v1802_v11 = vpop.f32.mrf.mxu1  ;;  %v5045_v29 = vld [vmem:[#allocation87_spill] sm:$0xff] }
 0x30e   : > { %v1803_v19 = vadd.f32 %v1802_v11, %v5042_v21  ;;  %v1066_v16 = vadd.f32 %v5045_v29, %v953_v9 }
 0x30f   : > { %v4676_v2 = vadd.f32 %v2602_v15, %v1868_v25 }
 0x310   : > { %v1870_v37 = vadd.f32 %v1803_v19, %v1063_v22  ;;  %v2607_v18 = vpop.f32.mrf.mxu0 }
 0x311   : > { %2769 = vst [vmem:[%s4392_s21 + $0xe0] sm:$0xff] %v4676_v2  ;;  %v2800_v50 = vadd.f32 %v2799_v54, %v4676_v2 }
 0x312   : > { %v2491_v49 = vpop.f32.mrf.mxu3 }
 0x313   : > { %v2492_v28 = vadd.f32 %v2491_v49, %v2378_v3 }
 0x315   : > { %v2605_v1 = vadd.f32 %v2604_v42, %v2492_v28  ;;  %v1805_v55 = vpop.f32.mrf.mxu1  ;;  %v2381_v4 = vpop.f32.mrf.mxu2 }
 0x316   : > { %v1806_v25 = vadd.f32 %v1805_v55, %v5046_v46 }
 0x317   : > { %v4685_v61 = vadd.f32 %v2605_v1, %v1869_v59 }
 0x318   : > { %v1871_v44 = vadd.f32 %v1806_v25, %v1066_v16  ;;  %v2610_v36 = vpop.f32.mrf.mxu0 }
 0x319   : > { %2770 = vst [vmem:[%s4392_s21 + $0xe8] sm:$0xff] %v4685_v61  ;;  %v2801_v48 = vadd.f32 %v2800_v50, %v4685_v61 }
 0x31a   : > { %v2494_v27 = vpop.f32.mrf.mxu3 }
 0x31b   : > { %v2495_v53 = vadd.f32 %v2494_v27, %v2381_v4 }
 0x31d   : > { %v2608_v54 = vadd.f32 %v2607_v18, %v2495_v53  ;;  %v2384_v56 = vpop.f32.mrf.mxu2 }
 0x31f   : > { %v4691_v32 = vadd.f32 %v2608_v54, %v1870_v37 }
 0x321   : > { %2771 = vst [vmem:[%s4392_s21 + $0xf0] sm:$0xff] %v4691_v32  ;;  %v2802_v59 = vadd.f32 %v2801_v48, %v4691_v32 }
 0x322   : > { %v2497_v35 = vpop.f32.mrf.mxu3 }
 0x323   : > { %v2498_v51 = vadd.f32 %v2497_v35, %v2384_v56 }
 0x325   : > { %v2611_v15 = vadd.f32 %v2610_v36, %v2498_v51 }
 0x327   : > { %v2676_v3 = vadd.f32 %v2611_v15, %v1871_v44 }
 0x329   : > { %2772 = vst [vmem:[%s4392_s21 + $0xf8] sm:$0xff] %v2676_v3  ;;  %v2803_v11 = vadd.f32 %v2802_v59, %v2676_v3 }
 0x32a   : > { %3373 = shalt.err (!%p3370_p10)
}
 0x32b   : > { %s3482_s7 = smov 128   ;;  %s3483_s21 = smov 8   ;;  %v2804_v12 = vrot.slane %v2803_v11, 4 }
 0x32c   : > { %3172 = dma.vmem_to_hbm [thread:$0]  (%p3580_p3), %s2936_s27, 4096, %s2938_s28, %s2915_s6, %s3482_s7, %s3482_s7, %s3483_s21  }
 0x32d   : > { %v2805_v22 = vadd.f32 %v2804_v12, %v2803_v11  ;;  %s2949_s5 = scalar_lea.hbm %s4859_s3, %s3530_s19  ;;  %s2919_s24 = sand.u32 1, %s3530_s19  }
 0x32e   : > { %s244_s11 = scalar_lea.vmem [#allocation10], %s3610_s10  ;;  %s2953_s12 = sshll.u32 %s2949_s5, 4  ;;  %s2954_s12 = int_to_ptr.hbm [resolvable:$true] %s2953_s12 }
 0x32f   : > { %v2806_v21 = vrot.slane %v2805_v22, 2  ;;  %s2951_s13 = sshll.u32 %s244_s11, 4  ;;  %s4718_s14 = scalar_lea.sflag [#allocation11], %s2919_s24  ;;  %s2952_s13 = int_to_ptr.vmem [resolvable:$true] %s2951_s13 }
 0x330   : > { %s3388_s27 = sshra.s32 %s2954_s12, 4  ;;  %s3394_s20 = scalar_lea.hbm %s4859_s3, 2  ;;  %s3389_s27 = int_to_ptr.hbm [resolvable:$true] %s3388_s27 }
 0x331   : > { %v2807_v19 = vadd.f32 %v2806_v21, %v2805_v22  ;;  %s3390_s28 = scalar_lea.hbm %s3389_s27, 1  ;;  %p3395_p5 = scmp.lt.s32.totalorder %s3389_s27, %s4859_s3 }
 0x332   : > { %p3391_p12 = scmp.ne.s32.totalorder %s3389_s27, %s3390_s28  ;;  %p3396_p7 = scmp.lt.s32.totalorder %s3394_s20, %s3390_s28 }
 0x333   : > { %v2808_v42 = vrot.slane %v2807_v19, 1 }
 0x334   : > { %p3392_p13 = pnand %p3391_p12, %p3580_p3  ;;  %p3397_p1 = por %p3396_p7, %p3395_p5 }
 0x335   : > { %v2809_v37 = vadd.f32 %v2808_v42, %v2807_v19 }
 0x336   : > { %p3393_p0 = pneg %p3392_p13 }
 0x337   : > { %2843 = vst [vmem:[%s244_s11] sm:$0x1] %v2809_v37 }
 0x338   : > { %p3398_p4 = pnand %p3397_p1, %p3393_p0 }
 0x33a   : > { %3401 = shalt.err (!%p3398_p4)
}
 0x33b   : > { %3173 = dma.vmem_to_hbm [thread:$0]  (%p3580_p3), %s2952_s13, 16, %s2954_s12, %s4718_s14   ;;  %v4731_v50 = vmul.f32 0.00390625, %v2809_v37 }
 0x33c   : > { %s2962_s30 = scalar_lea.hbm %s4860_s4, %s3530_s19  ;;  %s250_s5 = scalar_lea.vmem [#allocation12], %s3610_s10 }
 0x33d   : > { %v4735_v49 = vsub.f32 %v4655_v45, %v4731_v50  ;;  %v4739_v28 = vsub.f32 %v4667_v26, %v4731_v50  ;;  %v4743_v41 = vsub.f32 %v4676_v2, %v4731_v50  ;;  %v4747_v0 = vsub.f32 %v4685_v61, %v4731_v50  ;;  %s2964_s24 = sshll.u32 %s250_s5, 4  ;;  %s2966_s11 = sshll.u32 %s2962_s30, 4  ;;  %s2965_s24 = int_to_ptr.vmem [resolvable:$true] %s2964_s24  ;;  %s2967_s11 = int_to_ptr.hbm [resolvable:$true] %s2966_s11 }
 0x33e   : > { %v4751_v9 = vsub.f32 %v4691_v32, %v4731_v50  ;;  %v4754_v1 = vsub.f32 %v2676_v3, %v4731_v50  ;;  %v2811_v45 = vsub.f32 %v4386_v30, %v4731_v50  ;;  %v2812_v26 = vsub.f32 %v4399_v47, %v4731_v50  ;;  %s3416_s13 = sshra.s32 %s2967_s11, 4  ;;  %s3422_s19 = scalar_lea.hbm %s4860_s4, 2  ;;  %s3417_s13 = int_to_ptr.hbm [resolvable:$true] %s3416_s13 }
 0x33f   : > { %v2813_v2 = vsub.f32 %v4410_v58, %v4731_v50  ;;  %v2814_v16 = vsub.f32 %v4419_v7, %v4731_v50  ;;  %v2815_v4 = vsub.f32 %v4428_v39, %v4731_v50  ;;  %v2816_v61 = vsub.f32 %v4437_v20, %v4731_v50  ;;  %s3418_s12 = scalar_lea.hbm %s3417_s13, 1  ;;  %p3423_p2 = scmp.lt.s32.totalorder %s3417_s13, %s4860_s4 }
 0x340   : > { %v2844_v55 = vmul.f32 %v2811_v45, %v2811_v45  ;;  %v2845_v29 = vmul.f32 %v2812_v26, %v2812_v26  ;;  %v2817_v47 = vsub.f32 %v4449_v62, %v4731_v50  ;;  %v2818_v48 = vsub.f32 %v4460_v60, %v4731_v50  ;;  %p3419_p8 = scmp.ne.s32.totalorder %s3417_s13, %s3418_s12  ;;  %p3424_p10 = scmp.lt.s32.totalorder %s3422_s19, %s3418_s12 }
 0x341   : > { %v2846_v46 = vmul.f32 %v2813_v2, %v2813_v2  ;;  %v2847_v30 = vmul.f32 %v2814_v16, %v2814_v16  ;;  %v2848_v18 = vmul.f32 %v2815_v4, %v2815_v4  ;;  %v2849_v27 = vmul.f32 %v2816_v61, %v2816_v61 }
 0x342   : > { %v2876_v25 = vadd.f32 %v2845_v29, %v2844_v55  ;;  %v2819_v39 = vsub.f32 %v4471_v14, %v4731_v50  ;;  %v2850_v53 = vmul.f32 %v2817_v47, %v2817_v47  ;;  %v2820_v20 = vsub.f32 %v4482_v40, %v4731_v50  ;;  %p3420_p11 = pnand %p3419_p8, %p3580_p3  ;;  %p3425_p12 = por %p3424_p10, %p3423_p2 }
 0x343   : > { %v2851_v32 = vmul.f32 %v2818_v48, %v2818_v48  ;;  %v2821_v62 = vsub.f32 %v4493_v52, %v4731_v50  ;;  %v2822_v60 = vsub.f32 %v4504_v6, %v4731_v50  ;;  %v2823_v14 = vsub.f32 %v4515_v43, %v4731_v50 }
 0x344   : > { %v2877_v44 = vadd.f32 %v2876_v25, %v2846_v46  ;;  %v2852_v59 = vmul.f32 %v2819_v39, %v2819_v39  ;;  %v2853_v36 = vmul.f32 %v2820_v20, %v2820_v20  ;;  %v2824_v40 = vsub.f32 %v4526_v5, %v4731_v50  ;;  %p3421_p9 = pneg %p3420_p11 }
 0x345   : > { %v2854_v15 = vmul.f32 %v2821_v62, %v2821_v62  ;;  %v2855_v11 = vmul.f32 %v2822_v60, %v2822_v60  ;;  %v2825_v52 = vsub.f32 %v4536_v24, %v4731_v50  ;;  %v2856_v22 = vmul.f32 %v2823_v14, %v2823_v14 }
 0x346   : > { %v2878_v58 = vadd.f32 %v2877_v44, %v2847_v30  ;;  %v2826_v6 = vsub.f32 %v4544_v31, %v4731_v50  ;;  %v2857_v19 = vmul.f32 %v2824_v40, %v2824_v40  ;;  %v2827_v43 = vsub.f32 %v4552_v33, %v4731_v50  ;;  %p3426_p13 = pnand %p3425_p12, %p3421_p9 }
 0x347   : > { %v2858_v37 = vmul.f32 %v2825_v52, %v2825_v52  ;;  %v2828_v5 = vsub.f32 %v4560_v23, %v4731_v50  ;;  %v2829_v24 = vsub.f32 %v4568_v34, %v4731_v50  ;;  %v2830_v31 = vsub.f32 %v4576_v57, %v4731_v50 }
 0x348   : > { %v2879_v7 = vadd.f32 %v2878_v58, %v2848_v18  ;;  %v2859_v26 = vmul.f32 %v2826_v6, %v2826_v6  ;;  %v2860_v55 = vmul.f32 %v2827_v43, %v2827_v43  ;;  %v2831_v33 = vsub.f32 %v4584_v13, %v4731_v50 }
 0x349   : > { %v2861_v16 = vmul.f32 %v2828_v5, %v2828_v5  ;;  %v2862_v46 = vmul.f32 %v2829_v24, %v2829_v24  ;;  %v2832_v23 = vsub.f32 %v4595_v17, %v4731_v50  ;;  %v2863_v61 = vmul.f32 %v2830_v31, %v2830_v31 }
 0x34a   : > { %v2880_v54 = vadd.f32 %v2879_v7, %v2849_v27  ;;  %v2833_v34 = vsub.f32 %v4607_v38, %v4731_v50  ;;  %v2864_v44 = vmul.f32 %v2831_v33, %v2831_v33  ;;  %v2834_v57 = vsub.f32 %v4619_v10, %v4731_v50 }
 0x34b   : > { %v2865_v18 = vmul.f32 %v2832_v23, %v2832_v23  ;;  %v2835_v13 = vsub.f32 %v4631_v63, %v4731_v50  ;;  %v2836_v17 = vsub.f32 %v4643_v8, %v4731_v50  ;;  %v2872_v62 = vmul.f32 %v4743_v41, %v4743_v41 }
 0x34c   : > { %v2881_v56 = vadd.f32 %v2880_v54, %v2850_v53  ;;  %v2866_v48 = vmul.f32 %v2833_v34, %v2833_v34  ;;  %v2867_v7 = vmul.f32 %v2834_v57, %v2834_v57  ;;  %v2873_v50 = vmul.f32 %v4747_v0, %v4747_v0 }
 0x34d   : > { %v2868_v53 = vmul.f32 %v2835_v13, %v2835_v13  ;;  %v2869_v38 = vmul.f32 %v2836_v17, %v2836_v17 }
 0x34e   : > { %v2882_v35 = vadd.f32 %v2881_v56, %v2851_v32  ;;  %v2870_v32 = vmul.f32 %v4735_v49, %v4735_v49  ;;  %v2871_v56 = vmul.f32 %v4739_v28, %v4739_v28  ;;  %v2875_v49 = vmul.f32 %v4754_v1, %v4754_v1 }
 0x350   : > { %v2883_v51 = vadd.f32 %v2882_v35, %v2852_v59  ;;  %v2874_v35 = vmul.f32 %v4751_v9, %v4751_v9 }
 0x352   : > { %v2884_v3 = vadd.f32 %v2883_v51, %v2853_v36 }
 0x354   : > { %v2885_v12 = vadd.f32 %v2884_v3, %v2854_v15 }
 0x356   : > { %v2886_v21 = vadd.f32 %v2885_v12, %v2855_v11 }
 0x358   : > { %v2887_v42 = vadd.f32 %v2886_v21, %v2856_v22 }
 0x35a   : > { %v2888_v45 = vadd.f32 %v2887_v42, %v2857_v19 }
 0x35c   : > { %v2889_v2 = vadd.f32 %v2888_v45, %v2858_v37 }
 0x35e   : > { %v2890_v29 = vadd.f32 %v2889_v2, %v2859_v26 }
 0x360   : > { %v2891_v4 = vadd.f32 %v2890_v29, %v2860_v55 }
 0x362   : > { %v2892_v25 = vadd.f32 %v2891_v4, %v2861_v16 }
 0x364   : > { %v2893_v30 = vadd.f32 %v2892_v25, %v2862_v46 }
 0x366   : > { %v2894_v47 = vadd.f32 %v2893_v30, %v2863_v61 }
 0x368   : > { %v2895_v58 = vadd.f32 %v2894_v47, %v2864_v44 }
 0x36a   : > { %v2896_v27 = vadd.f32 %v2895_v58, %v2865_v18 }
 0x36c   : > { %v2897_v39 = vadd.f32 %v2896_v27, %v2866_v48 }
 0x36e   : > { %v2898_v54 = vadd.f32 %v2897_v39, %v2867_v7 }
 0x370   : > { %v2899_v20 = vadd.f32 %v2898_v54, %v2868_v53 }
 0x372   : > { %v2900_v10 = vadd.f32 %v2899_v20, %v2869_v38 }
 0x374   : > { %v2901_v63 = vadd.f32 %v2900_v10, %v2870_v32 }
 0x376   : > { %v2902_v8 = vadd.f32 %v2901_v63, %v2871_v56 }
 0x378   : > { %v2903_v59 = vadd.f32 %v2902_v8, %v2872_v62 }
 0x37a   : > { %v2904_v60 = vadd.f32 %v2903_v59, %v2873_v50 }
 0x37c   : > { %v2905_v36 = vadd.f32 %v2904_v60, %v2874_v35 }
 0x37e   : > { %v2906_v51 = vadd.f32 %v2905_v36, %v2875_v49 }
 0x380   : > { %v2907_v28 = vrot.slane %v2906_v51, 4 }
 0x382   : > { %v2908_v14 = vadd.f32 %v2907_v28, %v2906_v51 }
 0x384   : > { %v2909_v15 = vrot.slane %v2908_v14, 2 }
 0x386   : > { %v2910_v41 = vadd.f32 %v2909_v15, %v2908_v14 }
 0x388   : > { %v2911_v0 = vrot.slane %v2910_v41, 1 }
 0x38a   : > { %v2912_v9 = vadd.f32 %v2911_v0, %v2910_v41 }
 0x38c   : > { %2913 = vst [vmem:[%s250_s5] sm:$0x1] %v2912_v9 }
 0x38d   : > { %3429 = shalt.err (!%p3426_p13)
}
 0x38e   : > { %3174 = dma.vmem_to_hbm [thread:$0]  (%p3580_p3), %s2965_s24, 16, %s2967_s11, %s4718_s14  }
 0x38f PF: > { %s2978_s23 = sand.u32 1, %s3464_s15   ;;  %p5047_p0 = scmp.ge.s32.totalorder %s3476_s18, 2 }
 0x390   : > { %s2979_s20 = scalar_lea.sflag [#allocation6], %s2978_s23 }
 0x391   : > { %p3187_p5 = pnand %p5047_p0, %p3546_p6 }
 0x393   : > { %p3188_p7 = pneg %p3187_p5 }
 0x395   : > { %3455 = dma.done.wait (%p3188_p7), %s2979_s20, 4096  }
 0x396   : > { %3457 = vsyncadd (%p3188_p7), %s2979_s20, 4294963200  ;;  %s5048_s25 = sadd.s32 4294967294, %s3476_s18  }
 0x397   : > { %s2988_s7 = sand.u32 1, %s5048_s25  }
 0x398   : > { %s2989_s21 = scalar_lea.sflag [#allocation11], %s2988_s7 }
 0x399   : > { %3459 = dma.done.wait (%p3188_p7), %s2989_s21, 32  }
 0x39a   : > { %3461 = vsyncadd (%p3188_p7), %s2989_s21, 4294967264  ;;  %p22_p3 = scmp.ge.s32.totalorder %s3564_s29, 4   ;;  %s5049_s15 = smov %s3468_s16 }
 0x39b   : > { %s5050_s16 = smov %s3472_s17  ;;  %s5051_s17 = smov %s3576_s8 }
 0x39c   : > { %s5052_s18 = smov %s3564_s29  ;;  %24 = sbr.rel (!%p22_p3) target bundleno = 8 (0x8), region = 114 }
 0x3a1   :  { %3003 = vsyncpa [#allocation5], 1 }
 0x3a2   :  { %3005 = vsyncpa [#allocation5 + $0x1], 1 }
 0x3a3   :  { %3006 = vsyncpa [#allocation8], 1 }
 0x3a4   :  { %3007 = vsyncpa [#allocation6], 1 }
 0x3a5   :  { %3009 = vsyncpa [#allocation6 + $0x1], 1 }
 0x3a6   :  { %3010 = vsyncpa [#allocation11], 1 }
 0x3a7   :  { %3012 = vsyncpa [#allocation11 + $0x1], 1 }

</bundles_post_ra>
